<compile_context>
chip_gen: v5e
topology: v5e:2x2
jax: 0.10.0
libtpu: 0.0.40
codegen_flags: <defaults>
</compile_context>

<pallas_src>
import functools
import math

import jax
import jax.numpy as jnp
from jax.experimental import pallas as pl
from jax.experimental.pallas import tpu as pltpu


def _round_up(a, b):
    return (a + b - 1) // b * b


def _llama_hidden_dim(dim, hidden_dim, multiple_of, ffn_dim_multiplier):
    hidden_dim = int(2 * hidden_dim / 3)
    if ffn_dim_multiplier is not None:
        hidden_dim = int(ffn_dim_multiplier * hidden_dim)
    return multiple_of * ((hidden_dim + multiple_of - 1) // multiple_of)


def _vmem_capacity_bytes():
    # v5e/v6e: 128 MiB per core; v7x: 64 MiB per core.
    try:
        return int(pltpu.get_tpu_info().vmem_capacity_bytes)
    except Exception:
        return 64 * 1024 * 1024


def _default_vmem_limit_bytes():
    cap = _vmem_capacity_bytes()
    return int(min(100 * 1024 * 1024, cap * 9 // 10))


def _choose_hidden_tile(hidden, th=None):
    """Hidden-dim tile for the streamed FFN.  Must match between weight prep
    and feed_forward (both default to this function)."""
    if th is None:
        # v7x (64 MiB VMEM): th=512 keeps double-buffered bf16 weight tiles +
        # f32 accumulator comfortably resident; v5e/v6e (128 MiB) take th=1024.
        th = 512 if _vmem_capacity_bytes() <= 64 * 1024 * 1024 else 1024
    th = min(th, hidden)
    while th > 128 and (hidden % th != 0 or th % 128 != 0):
        th -= 128
    if hidden % th != 0 or th % 128 != 0:
        th = hidden
    return th


def _choose_row_tile(M, tm=None):
    if tm is None:
        # On 128 MiB-VMEM chips (v5e/v6e) a 512-row tile doubles weight reuse
        # for prefill and still fits easily; otherwise stay at 256.
        tm = 512 if (_vmem_capacity_bytes() >= 128 * 1024 * 1024 and M >= 512) else 256
    return max(16, min(tm, _round_up(M, 16)))


# --------------------------------------------------------------------------- #
# RMSNorm
# --------------------------------------------------------------------------- #
def _rmsnorm_kernel(x_ref, w_ref, o_ref, *, eps):
    x = x_ref[...].astype(jnp.float32)
    ms = jnp.mean(x * x, axis=-1, keepdims=True)
    y = x * jax.lax.rsqrt(ms + eps)
    o_ref[...] = (y * w_ref[...].astype(jnp.float32)).astype(o_ref.dtype)


def rms_norm(x, w, *, eps=1e-5, tm=256, out_dtype=None):
    """x: [M, dim], w: [dim] -> [M, dim] in out_dtype (default: x.dtype)."""
    M, dim = x.shape
    if out_dtype is None:
        out_dtype = x.dtype
    tm = max(8, min(tm, _round_up(M, 8)))
    Mp = _round_up(M, tm)
    xp = jnp.pad(x, ((0, Mp - M), (0, 0))) if Mp != M else x
    out = pl.pallas_call(
        functools.partial(_rmsnorm_kernel, eps=eps),
        out_shape=jax.ShapeDtypeStruct((Mp, dim), out_dtype),
        grid_spec=pltpu.PrefetchScalarGridSpec(
            num_scalar_prefetch=0,
            grid=(Mp // tm,),
            in_specs=[
                pl.BlockSpec((tm, dim), lambda i: (i, 0)),
                pl.BlockSpec((1, dim), lambda i: (0, 0)),
            ],
            out_specs=pl.BlockSpec((tm, dim), lambda i: (i, 0)),
        ),
        compiler_params=pltpu.CompilerParams(dimension_semantics=("parallel",)),
    )(xp, w.reshape(1, dim))
    return out[:M] if Mp != M else out


# --------------------------------------------------------------------------- #
# FeedForward: w2( silu(w1(x)) * w3(x) )   -- fused, streamed over hidden dim
# --------------------------------------------------------------------------- #
def prepare_ffn_weights(w1, w3, w2, *, th=None, dtype=jnp.bfloat16):
    """One-time weight prep: fuse w1/w3 into a single [dim, 2*hidden] bf16
    weight, interleaved per hidden tile so grid step k streams [w1_k | w3_k]
    through one BlockSpec/DMA.  Done at load time, never per forward call."""
    dim, hidden = w1.shape
    th = _choose_hidden_tile(hidden, th)
    nk = hidden // th
    w13 = jnp.concatenate(
        [w1.astype(dtype).reshape(dim, nk, th),
         w3.astype(dtype).reshape(dim, nk, th)],
        axis=2,
    ).reshape(dim, 2 * hidden)
    return {"w13": w13, "w2": w2.astype(dtype)}


def _ffn_kernel(x_ref, w13_ref, w2_ref, o_ref, acc_ref, *, th):
    # x_ref:   (tm, dim)     bf16 row tile
    # w13_ref: (dim, 2*th)   bf16, [w1 tile | w3 tile] for hidden tile k
    # w2_ref:  (th, dim)     bf16
    # acc_ref: (tm, dim)     f32 accumulator over the hidden (k) grid axis
    k = pl.program_id(1)

    @pl.when(k == 0)
    def _():
        acc_ref[...] = jnp.zeros_like(acc_ref)

    x = x_ref[...]
    h = jnp.dot(x, w13_ref[...], preferred_element_type=jnp.float32)
    h1 = h[:, :th]
    h3 = h[:, th:]
    gated = (h1 * jax.nn.sigmoid(h1)) * h3          # f32 silu/gate math
    acc_ref[...] += jnp.dot(gated.astype(w2_ref.dtype), w2_ref[...],
                            preferred_element_type=jnp.float32)

    @pl.when(k == pl.num_programs(1) - 1)
    def _():
        o_ref[...] = acc_ref[...].astype(o_ref.dtype)


def feed_forward(x, ffn, *, tm=None, th=None, vmem_limit_bytes=None):
    """x: [M, dim] (compute dtype); ffn: dict from prepare_ffn_weights."""
    w13, w2 = ffn["w13"], ffn["w2"]
    M, dim = x.shape
    hidden = w2.shape[0]
    out_dtype = x.dtype
    assert dim % 128 == 0, "model dim must be a multiple of 128 (lane width)"
    assert hidden % 128 == 0, "hidden dim must be a multiple of 128"

    th = _choose_hidden_tile(hidden, th)     # must match prepare_ffn_weights
    nk = hidden // th
    tm = _choose_row_tile(M, tm)
    Mp = _round_up(M, tm)

    xc = x.astype(w13.dtype)
    if Mp != M:
        xc = jnp.pad(xc, ((0, Mp - M), (0, 0)))

    if vmem_limit_bytes is None:
        vmem_limit_bytes = _default_vmem_limit_bytes()

    itemsize = jnp.dtype(w13.dtype).itemsize
    n_row_tiles = Mp // tm
    cost = pl.CostEstimate(
        flops=6 * Mp * dim * hidden,               # up-proj (2h) + down-proj
        transcendentals=Mp * hidden,               # sigmoid
        bytes_accessed=(xc.size * itemsize
                        + (w13.size + w2.size) * itemsize * n_row_tiles
                        + Mp * dim * jnp.dtype(out_dtype).itemsize),
    )

    # TODO(synk): on v7x (2 TensorCores) decode, add a parallel output-column
    # grid axis so the second core gets work when Mp//tm == 1.
    out = pl.pallas_call(
        functools.partial(_ffn_kernel, th=th),
        out_shape=jax.ShapeDtypeStruct((Mp, dim), out_dtype),
        grid_spec=pltpu.PrefetchScalarGridSpec(
            num_scalar_prefetch=0,
            grid=(n_row_tiles, nk),                                # reduction last
            in_specs=[
                pl.BlockSpec((tm, dim), lambda i, k: (i, 0)),      # x row tile
                pl.BlockSpec((dim, 2 * th), lambda i, k: (0, k)),  # fused w1|w3
                pl.BlockSpec((th, dim), lambda i, k: (k, 0)),      # w2 tile
            ],
            out_specs=pl.BlockSpec((tm, dim), lambda i, k: (i, 0)),
            scratch_shapes=[pltpu.VMEM((tm, dim), jnp.float32)],
        ),
        compiler_params=pltpu.CompilerParams(
            dimension_semantics=("parallel", "arbitrary"),
            vmem_limit_bytes=vmem_limit_bytes,
        ),
        cost_estimate=cost,
    )(xc, w13, w2)
    return out[:M] if Mp != M else out


# --------------------------------------------------------------------------- #
# Attention core: softmax(q k^T / sqrt(d) + causal mask) v, one batch per step.
# Inputs stay in [b, s, h, d] / [b, kv, kvh, d] layout (no transposes); GQA is
# handled by mapping query head j -> kv head j // n_rep inside the kernel
# (matches torch.repeat_interleave semantics, no KV-cache repeat in HBM).
# --------------------------------------------------------------------------- #
def _attn_kernel(q_ref, k_ref, v_ref, o_ref, *, scale, n_rep, start_pos):
    s_len, n_heads, _ = q_ref.shape
    kv_len = k_ref.shape[0]

    # Causal mask generated in-kernel (no (s, kv) f32 mask array in HBM).
    q_pos = jax.lax.broadcasted_iota(jnp.int32, (s_len, kv_len), 0) + start_pos
    k_pos = jax.lax.broadcasted_iota(jnp.int32, (s_len, kv_len), 1)
    mask = jnp.where(k_pos <= q_pos, 0.0, -1e30).astype(jnp.float32)

    for j in range(n_heads):                     # static unroll over heads
        g = j // n_rep                           # GQA: query head -> kv head
        q = q_ref[:, j, :]                       # (s, d)  bf16
        k = k_ref[:, g, :]                       # (kv, d) bf16
        v = v_ref[:, g, :]
        s = jax.lax.dot_general(q, k, (((1,), (1,)), ((), ())),
                                preferred_element_type=jnp.float32) * scale
        s = s + mask
        s = s - jnp.max(s, axis=-1, keepdims=True)
        p = jnp.exp(s)
        denom = jnp.sum(p, axis=-1, keepdims=True)
        p = p * pl.reciprocal(denom, approx=True)    # EUP reciprocal, not VPU divide
        o = jnp.dot(p.astype(v.dtype), v, preferred_element_type=jnp.float32)
        o_ref[:, j, :] = o.astype(o_ref.dtype)


def attention_core(q, k, v, *, scale, n_rep, start_pos):
    """q: [b, s, h, d]; k/v: [b, kv, kvh, d] -> [b, s, h, d]."""
    b, s, h, d = q.shape
    kv, kvh = k.shape[1], k.shape[2]
    # TODO(synk): for long sequences, tile the kv axis as a trailing
    # "arbitrary" grid axis with online softmax (flash pattern); the demo
    # sequence length keeps full per-batch K/V comfortably in VMEM.
    return pl.pallas_call(
        functools.partial(_attn_kernel, scale=scale, n_rep=n_rep,
                          start_pos=start_pos),
        out_shape=jax.ShapeDtypeStruct((b, s, h, d), q.dtype),
        grid_spec=pltpu.PrefetchScalarGridSpec(
            num_scalar_prefetch=0,
            grid=(b,),
            in_specs=[
                pl.BlockSpec((None, s, h, d), lambda i: (i, 0, 0, 0)),
                pl.BlockSpec((None, kv, kvh, d), lambda i: (i, 0, 0, 0)),
                pl.BlockSpec((None, kv, kvh, d), lambda i: (i, 0, 0, 0)),
            ],
            out_specs=pl.BlockSpec((None, s, h, d), lambda i: (i, 0, 0, 0)),
        ),
        compiler_params=pltpu.CompilerParams(dimension_semantics=("parallel",)),
    )(q, k, v)


# --------------------------------------------------------------------------- #
# Rotary embedding (real-valued form of torch's complex view) + block glue
# --------------------------------------------------------------------------- #
def precompute_freqs(head_dim, positions, theta=10000.0):
    freqs = 1.0 / (theta ** (jnp.arange(0, head_dim, 2, dtype=jnp.float32) / head_dim))
    ang = jnp.outer(positions.astype(jnp.float32), freqs)     # (seq, head_dim/2)
    return jnp.cos(ang), jnp.sin(ang)


def apply_rotary_emb(xq, xk, freqs_cos, freqs_sin):
    def rot(x):
        xf = x.astype(jnp.float32)
        xr, xi = xf[..., 0::2], xf[..., 1::2]
        c = freqs_cos[None, :, None, :]
        s = freqs_sin[None, :, None, :]
        out = jnp.stack([xr * c - xi * s, xr * s + xi * c], axis=-1)
        return out.reshape(x.shape).astype(x.dtype)
    return rot(xq), rot(xk)


def prepare_params(raw, *, compute_dtype=jnp.bfloat16):
    """One-time weight/layout prep: bf16 projection weights, fused+interleaved
    bf16 w13/w2, bf16 KV cache.  Keep this out of the per-step forward."""
    return {
        "attention_norm": raw["attention_norm"],
        "ffn_norm": raw["ffn_norm"],
        "wq": raw["wq"].astype(compute_dtype),
        "wk": raw["wk"].astype(compute_dtype),
        "wv": raw["wv"].astype(compute_dtype),
        "wo": raw["wo"].astype(compute_dtype),
        "cache_k": raw["cache_k"].astype(compute_dtype),
        "cache_v": raw["cache_v"].astype(compute_dtype),
        "ffn": prepare_ffn_weights(raw["w1"], raw["w3"], raw["w2"],
                                   dtype=compute_dtype),
    }


# TODO(synk): QKV/output projections, rotary embedding and the KV-cache
# dynamic_update_slice remain plain XLA glue (bf16-in / f32-acc); RMSNorm, the
# attention core and the SwiGLU FFN run as Pallas kernels.
def transformer_block(x, p, freqs_cos, freqs_sin, *, start_pos,
                      n_heads, n_kv_heads, norm_eps,
                      compute_dtype=jnp.bfloat16):
    bsz, seqlen, dim = x.shape
    head_dim = dim // n_heads
    n_rep = n_heads // n_kv_heads
    x2 = x.reshape(bsz * seqlen, dim)

    # ---- attention branch ----
    xn = rms_norm(x2, p["attention_norm"], eps=norm_eps, out_dtype=compute_dtype)
    xq = (xn @ p["wq"]).reshape(bsz, seqlen, n_heads, head_dim)
    xk = (xn @ p["wk"]).reshape(bsz, seqlen, n_kv_heads, head_dim)
    xv = (xn @ p["wv"]).reshape(bsz, seqlen, n_kv_heads, head_dim)
    xq, xk = apply_rotary_emb(xq, xk, freqs_cos, freqs_sin)

    cache_k = jax.lax.dynamic_update_slice(p["cache_k"], xk, (0, start_pos, 0, 0))
    cache_v = jax.lax.dynamic_update_slice(p["cache_v"], xv, (0, start_pos, 0, 0))
    keys = cache_k[:bsz, :start_pos + seqlen]          # [b, kv, kvh, d], no repeat
    values = cache_v[:bsz, :start_pos + seqlen]

    attn = attention_core(xq, keys, values, scale=1.0 / math.sqrt(head_dim),
                          n_rep=n_rep, start_pos=start_pos)
    attn = attn.reshape(bsz * seqlen, n_heads * head_dim)
    h = x2 + jnp.dot(attn, p["wo"], preferred_element_type=jnp.float32)

    # ---- feed-forward branch ----
    hn = rms_norm(h, p["ffn_norm"], eps=norm_eps, out_dtype=compute_dtype)
    out = h + feed_forward(hn, p["ffn"])
    return out.reshape(bsz, seqlen, dim), cache_k, cache_v


# --------------------------------------------------------------------------- #
# Pure-JAX f32 reference (same math as the PyTorch module)
# --------------------------------------------------------------------------- #
def reference_block(x, p, start_pos, freqs_cos, freqs_sin, mask, *,
                    n_heads, n_kv_heads, norm_eps):
    bsz, seqlen, dim = x.shape
    head_dim = dim // n_heads
    n_rep = n_heads // n_kv_heads

    def rms(t, w):
        tf = t.astype(jnp.float32)
        y = tf * jax.lax.rsqrt(jnp.mean(tf * tf, axis=-1, keepdims=True) + norm_eps)
        return (y * w.astype(jnp.float32)).astype(t.dtype)

    x2 = x.reshape(bsz * seqlen, dim)
    xn = rms(x2, p["attention_norm"])
    xq = (xn @ p["wq"]).reshape(bsz, seqlen, n_heads, head_dim)
    xk = (xn @ p["wk"]).reshape(bsz, seqlen, n_kv_heads, head_dim)
    xv = (xn @ p["wv"]).reshape(bsz, seqlen, n_kv_heads, head_dim)
    xq, xk = apply_rotary_emb(xq, xk, freqs_cos, freqs_sin)
    cache_k = jax.lax.dynamic_update_slice(p["cache_k"], xk, (0, start_pos, 0, 0))
    cache_v = jax.lax.dynamic_update_slice(p["cache_v"], xv, (0, start_pos, 0, 0))
    keys = cache_k[:bsz, :start_pos + seqlen]
    values = cache_v[:bsz, :start_pos + seqlen]
    if n_rep > 1:
        keys = jnp.repeat(keys, n_rep, axis=2)
        values = jnp.repeat(values, n_rep, axis=2)
    q = jnp.transpose(xq, (0, 2, 1, 3))
    k = jnp.transpose(keys, (0, 2, 1, 3))
    v = jnp.transpose(values, (0, 2, 1, 3))
    scores = jnp.einsum("bhqd,bhkd->bhqk", q, k) / math.sqrt(head_dim)
    scores = scores + mask[None, None]
    probs = jax.nn.softmax(scores.astype(jnp.float32), axis=-1)
    attn = jnp.einsum("bhqk,bhkd->bhqd", probs, v)
    attn = jnp.transpose(attn, (0, 2, 1, 3)).reshape(bsz * seqlen, n_heads * head_dim)
    h = x2 + attn @ p["wo"]

    hn = rms(h, p["ffn_norm"])
    h1 = hn @ p["w1"]
    h3 = hn @ p["w3"]
    ffn = ((h1 * jax.nn.sigmoid(h1)) * h3) @ p["w2"]
    return (h + ffn).reshape(bsz, seqlen, dim)


if __name__ == "__main__":
    # Small, module-consistent shapes.  All trailing dims are multiples of 128
    # so the Pallas kernels see lane-dense tiles (real LLaMA dims are >= 4096).
    dim = 256
    n_heads = 8
    n_kv_heads = 4            # exercises GQA (n_rep = 2)
    head_dim = dim // n_heads  # 32
    multiple_of = 256
    hidden = _llama_hidden_dim(dim, 4 * dim, multiple_of, None)   # 768
    norm_eps = 1e-5

    bsz, seqlen = 2, 8
    max_batch, max_seq = 2, 16
    start_pos = 0

    key = jax.random.PRNGKey(0)
    ks = jax.random.split(key, 8)
    wscale = 0.02
    x = jax.random.normal(ks[0], (bsz, seqlen, dim), dtype=jnp.float32)
    raw_params = {
        "attention_norm": jnp.ones((dim,), jnp.float32),
        "ffn_norm": jnp.ones((dim,), jnp.float32),
        # all weights stored pre-transposed as [in_features, out_features]
        "wq": jax.random.normal(ks[1], (dim, n_heads * head_dim), jnp.float32) * wscale,
        "wk": jax.random.normal(ks[2], (dim, n_kv_heads * head_dim), jnp.float32) * wscale,
        "wv": jax.random.normal(ks[3], (dim, n_kv_heads * head_dim), jnp.float32) * wscale,
        "wo": jax.random.normal(ks[4], (n_heads * head_dim, dim), jnp.float32) * wscale,
        "w1": jax.random.normal(ks[5], (dim, hidden), jnp.float32) * wscale,
        "w2": jax.random.normal(ks[6], (hidden, dim), jnp.float32) * wscale,
        "w3": jax.random.normal(ks[7], (dim, hidden), jnp.float32) * wscale,
        "cache_k": jnp.zeros((max_batch, max_seq, n_kv_heads, head_dim), jnp.float32),
        "cache_v": jnp.zeros((max_batch, max_seq, n_kv_heads, head_dim), jnp.float32),
    }

    # One-time weight prep (bf16 casts + fused/interleaved w13) — outside jit.
    params = prepare_params(raw_params)

    positions = jnp.arange(start_pos, start_pos + seqlen)
    freqs_cos, freqs_sin = precompute_freqs(head_dim, positions)
    # Causal mask (reference only; the Pallas kernel builds it in-kernel).
    mask = jnp.triu(jnp.full((seqlen, seqlen), -1e30, dtype=jnp.float32), k=1)
    if start_pos > 0:
        mask = jnp.concatenate(
            [jnp.zeros((seqlen, start_pos), jnp.float32), mask], axis=1)

    fwd = jax.jit(functools.partial(
        transformer_block, start_pos=start_pos,
        n_heads=n_heads, n_kv_heads=n_kv_heads, norm_eps=norm_eps))
    out, cache_k, cache_v = fwd(x, params, freqs_cos, freqs_sin)
    jax.block_until_ready(out)

    ref = reference_block(x, raw_params, start_pos, freqs_cos, freqs_sin, mask,
                          n_heads=n_heads, n_kv_heads=n_kv_heads, norm_eps=norm_eps)
    assert out.shape == (bsz, seqlen, dim)
    assert cache_k.shape == (max_batch, max_seq, n_kv_heads, head_dim)
    assert bool(jnp.all(jnp.isfinite(out)))
    # Whole block runs with bf16 MXU inputs (f32 accumulation) vs an f32
    # reference, so allow a small tolerance (intentional, matches LLaMA practice).
    assert jnp.allclose(out.astype(jnp.float32), ref.astype(jnp.float32),
                        atol=2e-2, rtol=2e-2), (
        f"mismatch vs reference: max abs diff = {jnp.max(jnp.abs(out - ref))}")

    print("KERNEL_OK")
</pallas_src>

<mosaic_0001>
module attributes {stable_mosaic.version = 11 : i64} {
  func.func @_rmsnorm_kernel(%arg0: i32, %arg1: memref<16x256xf32, #tpu.memory_space<vmem>>, %arg2: memref<1x256xf32, #tpu.memory_space<vmem>>, %arg3: memref<16x256xbf16, #tpu.memory_space<vmem>>) attributes {dimension_semantics = [#tpu.dimension_semantics<parallel>], iteration_bounds = array<i64: 1>, scalar_prefetch = 0 : i64, scratch_operands = 0 : i64, tpu.core_type = #tpu.core_type<tc>, window_params = [{transform_indices = @transform_0, window_bounds = array<i64: 16, 256>}, {pipeline_mode = #tpu.pipeline_mode<synchronous>, transform_indices = @transform_1, window_bounds = array<i64: 1, 256>}, {transform_indices = @transform_2, window_bounds = array<i64: 16, 256>}]} {
    %c0 = arith.constant 0 : index
    %c0_0 = arith.constant 0 : index
    %0 = vector.load %arg1[%c0, %c0_0] : memref<16x256xf32, #tpu.memory_space<vmem>>, vector<16x256xf32>
    %1 = arith.mulf %0, %0 : vector<16x256xf32>
    %cst = arith.constant dense<0.000000e+00> : vector<16xf32>
    %2 = vector.multi_reduction <add>, %1, %cst [1] : vector<16x256xf32> to vector<16xf32>
    %3 = vector.shape_cast %2 : vector<16xf32> to vector<16x1xf32>
    %cst_1 = arith.constant 2.560000e+02 : f32
    %4 = vector.broadcast %cst_1 : f32 to vector<16x1xf32>
    %5 = arith.divf %3, %4 : vector<16x1xf32>
    %cst_2 = arith.constant 9.99999974E-6 : f32
    %6 = vector.broadcast %cst_2 : f32 to vector<16x1xf32>
    %7 = arith.addf %5, %6 : vector<16x1xf32>
    %8 = math.rsqrt %7 : vector<16x1xf32>
    %9 = vector.broadcast %8 : vector<16x1xf32> to vector<16x256xf32>
    %10 = arith.mulf %0, %9 : vector<16x256xf32>
    %c0_3 = arith.constant 0 : index
    %c0_4 = arith.constant 0 : index
    %11 = vector.load %arg2[%c0_3, %c0_4] : memref<1x256xf32, #tpu.memory_space<vmem>>, vector<1x256xf32>
    %12 = vector.broadcast %11 : vector<1x256xf32> to vector<16x256xf32>
    %13 = arith.mulf %10, %12 : vector<16x256xf32>
    %14 = arith.truncf %13 : vector<16x256xf32> to vector<16x256xbf16>
    %c0_5 = arith.constant 0 : index
    %c0_6 = arith.constant 0 : index
    %15 = vector.load %arg3[%c0_5, %c0_6] : memref<16x256xbf16, #tpu.memory_space<vmem>>, vector<16x256xbf16>
    tpu.vector_store %arg3[%c0_5, %c0_6], %14 {strides = array<i32>} : memref<16x256xbf16, #tpu.memory_space<vmem>>, vector<16x256xbf16>,
    return
  }
  func.func @transform_0(%arg0: i32) -> (i32, i32) {
    %c0_i32 = arith.constant 0 : i32
    %c0_i32_0 = arith.constant 0 : i32
    return %arg0, %c0_i32 : i32, i32
  }
  func.func @transform_1(%arg0: i32) -> (i32, i32) {
    %c0_i32 = arith.constant 0 : i32
    %c0_i32_0 = arith.constant 0 : i32
    %c0_i32_1 = arith.constant 0 : i32
    return %c0_i32, %c0_i32_0 : i32, i32
  }
  func.func @transform_2(%arg0: i32) -> (i32, i32) {
    %c0_i32 = arith.constant 0 : i32
    %c0_i32_0 = arith.constant 0 : i32
    return %arg0, %c0_i32 : i32, i32
  }
}

module attributes {stable_mosaic.version = 11 : i64} {
  func.func @_ffn_kernel(%arg0: i32, %arg1: i32, %arg2: memref<16x256xbf16, #tpu.memory_space<vmem>>, %arg3: memref<256x768xbf16, #tpu.memory_space<vmem>>, %arg4: memref<384x256xbf16, #tpu.memory_space<vmem>>, %arg5: memref<16x256xbf16, #tpu.memory_space<vmem>>, %arg6: memref<16x256xf32, #tpu.memory_space<vmem>>) attributes {dimension_semantics = [#tpu.dimension_semantics<parallel>, #tpu.dimension_semantics<arbitrary>], iteration_bounds = array<i64: 1, 2>, scalar_prefetch = 0 : i64, scratch_operands = 1 : i64, tpu.core_type = #tpu.core_type<tc>, window_params = [{transform_indices = @transform_0, window_bounds = array<i64: 16, 256>}, {transform_indices = @transform_1, window_bounds = array<i64: 256, 768>}, {transform_indices = @transform_2, window_bounds = array<i64: 384, 256>}, {transform_indices = @transform_3, window_bounds = array<i64: 16, 256>}]} {
    %c0_i32 = arith.constant 0 : i32
    %0 = arith.cmpi eq, %arg1, %c0_i32 : i32
    %1 = arith.extui %0 : i1 to i32
    %c0_i32_0 = arith.constant 0 : i32
    %2 = arith.cmpi ne, %1, %c0_i32_0 : i32
    scf.if %2 {
      %cst_13 = arith.constant 0.000000e+00 : f32
      %24 = vector.broadcast %cst_13 : f32 to vector<16x256xf32>
      %c0_14 = arith.constant 0 : index
      %c0_15 = arith.constant 0 : index
      %25 = vector.load %arg6[%c0_14, %c0_15] : memref<16x256xf32, #tpu.memory_space<vmem>>, vector<16x256xf32>
      tpu.vector_store %arg6[%c0_14, %c0_15], %24 {strides = array<i32>} : memref<16x256xf32, #tpu.memory_space<vmem>>, vector<16x256xf32>,
    } else {
    }
    %c0 = arith.constant 0 : index
    %c0_1 = arith.constant 0 : index
    %3 = vector.load %arg2[%c0, %c0_1] : memref<16x256xbf16, #tpu.memory_space<vmem>>, vector<16x256xbf16>
    %c0_2 = arith.constant 0 : index
    %c0_3 = arith.constant 0 : index
    %4 = vector.load %arg3[%c0_2, %c0_3] : memref<256x768xbf16, #tpu.memory_space<vmem>>, vector<256x768xbf16>
    %cst = arith.constant dense<0.000000e+00> : vector<16x768xf32>
    %5 = tpu.matmul %3, %4, %cst {dimension_numbers = #tpu.dot_dimension_numbers<[1], [0], [0], [1], [0, 0, 1, 1], [], []>} : vector<16x256xbf16>, vector<256x768xbf16>, vector<16x768xf32> -> vector<16x768xf32>
    %6 = vector.extract_strided_slice %5 {offsets = [0, 0], sizes = [16, 384], strides = [1, 1]} : vector<16x768xf32> to vector<16x384xf32>
    %7 = vector.extract_strided_slice %5 {offsets = [0, 384], sizes = [16, 384], strides = [1, 1]} : vector<16x768xf32> to vector<16x384xf32>
    %8 = arith.negf %6 : vector<16x384xf32>
    %9 = math.exp %8 : vector<16x384xf32>
    %cst_4 = arith.constant 1.000000e+00 : f32
    %10 = vector.broadcast %cst_4 : f32 to vector<16x384xf32>
    %11 = arith.addf %10, %9 : vector<16x384xf32>
    %12 = arith.divf %10, %11 : vector<16x384xf32>
    %13 = arith.mulf %6, %12 : vector<16x384xf32>
    %14 = arith.mulf %13, %7 : vector<16x384xf32>
    %c0_5 = arith.constant 0 : index
    %c0_6 = arith.constant 0 : index
    %15 = vector.load %arg6[%c0_5, %c0_6] : memref<16x256xf32, #tpu.memory_space<vmem>>, vector<16x256xf32>
    %16 = arith.truncf %14 : vector<16x384xf32> to vector<16x384xbf16>
    %c0_7 = arith.constant 0 : index
    %c0_8 = arith.constant 0 : index
    %17 = vector.load %arg4[%c0_7, %c0_8] : memref<384x256xbf16, #tpu.memory_space<vmem>>, vector<384x256xbf16>
    %cst_9 = arith.constant dense<0.000000e+00> : vector<16x256xf32>
    %18 = tpu.matmul %16, %17, %cst_9 {dimension_numbers = #tpu.dot_dimension_numbers<[1], [0], [0], [1], [0, 0, 1, 1], [], []>} : vector<16x384xbf16>, vector<384x256xbf16>, vector<16x256xf32> -> vector<16x256xf32>
    %19 = arith.addf %15, %18 : vector<16x256xf32>
    %c0_10 = arith.constant 0 : index
    %c0_11 = arith.constant 0 : index
    %20 = vector.load %arg6[%c0_10, %c0_11] : memref<16x256xf32, #tpu.memory_space<vmem>>, vector<16x256xf32>
    tpu.vector_store %arg6[%c0_10, %c0_11], %19 {strides = array<i32>} : memref<16x256xf32, #tpu.memory_space<vmem>>, vector<16x256xf32>,
    %c1_i32 = arith.constant 1 : i32
    %21 = arith.cmpi eq, %arg1, %c1_i32 : i32
    %22 = arith.extui %21 : i1 to i32
    %c0_i32_12 = arith.constant 0 : i32
    %23 = arith.cmpi ne, %22, %c0_i32_12 : i32
    scf.if %23 {
      %c0_13 = arith.constant 0 : index
      %c0_14 = arith.constant 0 : index
      %24 = vector.load %arg6[%c0_13, %c0_14] : memref<16x256xf32, #tpu.memory_space<vmem>>, vector<16x256xf32>
      %25 = arith.truncf %24 : vector<16x256xf32> to vector<16x256xbf16>
      %c0_15 = arith.constant 0 : index
      %c0_16 = arith.constant 0 : index
      %26 = vector.load %arg5[%c0_15, %c0_16] : memref<16x256xbf16, #tpu.memory_space<vmem>>, vector<16x256xbf16>
      tpu.vector_store %arg5[%c0_15, %c0_16], %25 {strides = array<i32>} : memref<16x256xbf16, #tpu.memory_space<vmem>>, vector<16x256xbf16>,
    } else {
    }
    return
  }
  func.func @transform_0(%arg0: i32, %arg1: i32) -> (i32, i32) {
    %c0_i32 = arith.constant 0 : i32
    %c0_i32_0 = arith.constant 0 : i32
    return %arg0, %c0_i32 : i32, i32
  }
  func.func @transform_1(%arg0: i32, %arg1: i32) -> (i32, i32) {
    %c0_i32 = arith.constant 0 : i32
    %c0_i32_0 = arith.constant 0 : i32
    return %c0_i32, %arg1 : i32, i32
  }
  func.func @transform_2(%arg0: i32, %arg1: i32) -> (i32, i32) {
    %c0_i32 = arith.constant 0 : i32
    %c0_i32_0 = arith.constant 0 : i32
    return %arg1, %c0_i32 : i32, i32
  }
  func.func @transform_3(%arg0: i32, %arg1: i32) -> (i32, i32) {
    %c0_i32 = arith.constant 0 : i32
    %c0_i32_0 = arith.constant 0 : i32
    return %arg0, %c0_i32 : i32, i32
  }
}

module attributes {stable_mosaic.version = 11 : i64} {
  func.func @_attn_kernel(%arg0: i32, %arg1: memref<1x8x8x32xbf16, #tpu.memory_space<vmem>>, %arg2: memref<1x8x4x32xbf16, #tpu.memory_space<vmem>>, %arg3: memref<1x8x4x32xbf16, #tpu.memory_space<vmem>>, %arg4: memref<1x8x8x32xbf16, #tpu.memory_space<vmem>>) attributes {dimension_semantics = [#tpu.dimension_semantics<parallel>], iteration_bounds = array<i64: 2>, scalar_prefetch = 0 : i64, scratch_operands = 0 : i64, tpu.core_type = #tpu.core_type<tc>, window_params = [{transform_indices = @transform_0, window_bounds = array<i64: 1, 8, 8, 32>}, {transform_indices = @transform_1, window_bounds = array<i64: 1, 8, 4, 32>}, {transform_indices = @transform_2, window_bounds = array<i64: 1, 8, 4, 32>}, {transform_indices = @transform_3, window_bounds = array<i64: 1, 8, 8, 32>}]} {
    %0 = tpu.iota {dimensions = array<i32: 0>} : vector<8x8xi32>
    %c0_i32 = arith.constant 0 : i32
    %1 = vector.broadcast %c0_i32 : i32 to vector<8x8xi32>
    %2 = arith.addi %0, %1 : vector<8x8xi32>
    %3 = tpu.iota {dimensions = array<i32: 1>} : vector<8x8xi32>
    %4 = arith.cmpi sle, %3, %2 : vector<8x8xi32>
    %cst = arith.constant 0.000000e+00 : f32
    %cst_0 = arith.constant -1.000000e+30 : f32
    %5 = vector.broadcast %cst : f32 to vector<8x8xf32>
    %6 = vector.broadcast %cst_0 : f32 to vector<8x8xf32>
    %7 = arith.select %4, %5, %6 : vector<8x8xi1>, vector<8x8xf32>
    %c0 = arith.constant 0 : index
    %c0_1 = arith.constant 0 : index
    %c0_2 = arith.constant 0 : index
    %c0_3 = arith.constant 0 : index
    %8 = vector.load %arg1[%c0, %c0_1, %c0_2, %c0_3] : memref<1x8x8x32xbf16, #tpu.memory_space<vmem>>, vector<1x8x1x32xbf16>
    %9 = vector.shape_cast %8 : vector<1x8x1x32xbf16> to vector<8x32xbf16>
    %c0_4 = arith.constant 0 : index
    %c0_5 = arith.constant 0 : index
    %c0_6 = arith.constant 0 : index
    %c0_7 = arith.constant 0 : index
    %10 = vector.load %arg2[%c0_4, %c0_5, %c0_6, %c0_7] : memref<1x8x4x32xbf16, #tpu.memory_space<vmem>>, vector<1x8x1x32xbf16>
    %11 = vector.shape_cast %10 : vector<1x8x1x32xbf16> to vector<8x32xbf16>
    %c0_8 = arith.constant 0 : index
    %c0_9 = arith.constant 0 : index
    %c0_10 = arith.constant 0 : index
    %c0_11 = arith.constant 0 : index
    %12 = vector.load %arg3[%c0_8, %c0_9, %c0_10, %c0_11] : memref<1x8x4x32xbf16, #tpu.memory_space<vmem>>, vector<1x8x1x32xbf16>
    %13 = vector.shape_cast %12 : vector<1x8x1x32xbf16> to vector<8x32xbf16>
    %cst_12 = arith.constant dense<0.000000e+00> : vector<8x8xf32>
    %14 = tpu.matmul %9, %11, %cst_12 {dimension_numbers = #tpu.dot_dimension_numbers<[1], [1], [0], [0], [0, 0, 1, 0], [], []>} : vector<8x32xbf16>, vector<8x32xbf16>, vector<8x8xf32> -> vector<8x8xf32>
    %cst_13 = arith.constant 0.176776692 : f32
    %15 = vector.broadcast %cst_13 : f32 to vector<8x8xf32>
    %16 = arith.mulf %14, %15 : vector<8x8xf32>
    %17 = arith.addf %16, %7 : vector<8x8xf32>
    %cst_14 = arith.constant dense<0xFF800000> : vector<8xf32>
    %18 = vector.multi_reduction <maximumf>, %17, %cst_14 [1] : vector<8x8xf32> to vector<8xf32>
    %19 = vector.shape_cast %18 : vector<8xf32> to vector<8x1xf32>
    %20 = vector.broadcast %19 : vector<8x1xf32> to vector<8x8xf32>
    %21 = arith.subf %17, %20 : vector<8x8xf32>
    %22 = math.exp %21 : vector<8x8xf32>
    %cst_15 = arith.constant dense<0.000000e+00> : vector<8xf32>
    %23 = vector.multi_reduction <add>, %22, %cst_15 [1] : vector<8x8xf32> to vector<8xf32>
    %24 = vector.shape_cast %23 : vector<8xf32> to vector<8x1xf32>
    %25 = tpu.reciprocal %24 {approx = true} : vector<8x1xf32> -> vector<8x1xf32>
    %26 = vector.broadcast %25 : vector<8x1xf32> to vector<8x8xf32>
    %27 = arith.mulf %22, %26 : vector<8x8xf32>
    %28 = arith.truncf %27 : vector<8x8xf32> to vector<8x8xbf16>
    %cst_16 = arith.constant dense<0.000000e+00> : vector<8x32xf32>
    %29 = tpu.matmul %28, %13, %cst_16 {dimension_numbers = #tpu.dot_dimension_numbers<[1], [0], [0], [1], [0, 0, 1, 1], [], []>} : vector<8x8xbf16>, vector<8x32xbf16>, vector<8x32xf32> -> vector<8x32xf32>
    %30 = arith.truncf %29 : vector<8x32xf32> to vector<8x32xbf16>
    %c0_17 = arith.constant 0 : index
    %c0_18 = arith.constant 0 : index
    %c0_19 = arith.constant 0 : index
    %c0_20 = arith.constant 0 : index
    %31 = vector.load %arg4[%c0_17, %c0_18, %c0_19, %c0_20] : memref<1x8x8x32xbf16, #tpu.memory_space<vmem>>, vector<1x8x1x32xbf16>
    %32 = vector.shape_cast %31 : vector<1x8x1x32xbf16> to vector<8x32xbf16>
    %33 = vector.shape_cast %30 : vector<8x32xbf16> to vector<1x8x1x32xbf16>
    tpu.vector_store %arg4[%c0_17, %c0_18, %c0_19, %c0_20], %33 {strides = array<i32>} : memref<1x8x8x32xbf16, #tpu.memory_space<vmem>>, vector<1x8x1x32xbf16>,
    %c0_21 = arith.constant 0 : index
    %c0_22 = arith.constant 0 : index
    %c1 = arith.constant 1 : index
    %c0_23 = arith.constant 0 : index
    %34 = vector.load %arg1[%c0_21, %c0_22, %c1, %c0_23] : memref<1x8x8x32xbf16, #tpu.memory_space<vmem>>, vector<1x8x1x32xbf16>
    %35 = vector.shape_cast %34 : vector<1x8x1x32xbf16> to vector<8x32xbf16>
    %c0_24 = arith.constant 0 : index
    %c0_25 = arith.constant 0 : index
    %c0_26 = arith.constant 0 : index
    %c0_27 = arith.constant 0 : index
    %36 = vector.load %arg2[%c0_24, %c0_25, %c0_26, %c0_27] : memref<1x8x4x32xbf16, #tpu.memory_space<vmem>>, vector<1x8x1x32xbf16>
    %37 = vector.shape_cast %36 : vector<1x8x1x32xbf16> to vector<8x32xbf16>
    %c0_28 = arith.constant 0 : index
    %c0_29 = arith.constant 0 : index
    %c0_30 = arith.constant 0 : index
    %c0_31 = arith.constant 0 : index
    %38 = vector.load %arg3[%c0_28, %c0_29, %c0_30, %c0_31] : memref<1x8x4x32xbf16, #tpu.memory_space<vmem>>, vector<1x8x1x32xbf16>
    %39 = vector.shape_cast %38 : vector<1x8x1x32xbf16> to vector<8x32xbf16>
    %cst_32 = arith.constant dense<0.000000e+00> : vector<8x8xf32>
    %40 = tpu.matmul %35, %37, %cst_32 {dimension_numbers = #tpu.dot_dimension_numbers<[1], [1], [0], [0], [0, 0, 1, 0], [], []>} : vector<8x32xbf16>, vector<8x32xbf16>, vector<8x8xf32> -> vector<8x8xf32>
    %cst_33 = arith.constant 0.176776692 : f32
    %41 = vector.broadcast %cst_33 : f32 to vector<8x8xf32>
    %42 = arith.mulf %40, %41 : vector<8x8xf32>
    %43 = arith.addf %42, %7 : vector<8x8xf32>
    %cst_34 = arith.constant dense<0xFF800000> : vector<8xf32>
    %44 = vector.multi_reduction <maximumf>, %43, %cst_34 [1] : vector<8x8xf32> to vector<8xf32>
    %45 = vector.shape_cast %44 : vector<8xf32> to vector<8x1xf32>
    %46 = vector.broadcast %45 : vector<8x1xf32> to vector<8x8xf32>
    %47 = arith.subf %43, %46 : vector<8x8xf32>
    %48 = math.exp %47 : vector<8x8xf32>
    %cst_35 = arith.constant dense<0.000000e+00> : vector<8xf32>
    %49 = vector.multi_reduction <add>, %48, %cst_35 [1] : vector<8x8xf32> to vector<8xf32>
    %50 = vector.shape_cast %49 : vector<8xf32> to vector<8x1xf32>
    %51 = tpu.reciprocal %50 {approx = true} : vector<8x1xf32> -> vector<8x1xf32>
    %52 = vector.broadcast %51 : vector<8x1xf32> to vector<8x8xf32>
    %53 = arith.mulf %48, %52 : vector<8x8xf32>
    %54 = arith.truncf %53 : vector<8x8xf32> to vector<8x8xbf16>
    %cst_36 = arith.constant dense<0.000000e+00> : vector<8x32xf32>
    %55 = tpu.matmul %54, %39, %cst_36 {dimension_numbers = #tpu.dot_dimension_numbers<[1], [0], [0], [1], [0, 0, 1, 1], [], []>} : vector<8x8xbf16>, vector<8x32xbf16>, vector<8x32xf32> -> vector<8x32xf32>
    %56 = arith.truncf %55 : vector<8x32xf32> to vector<8x32xbf16>
    %c0_37 = arith.constant 0 : index
    %c0_38 = arith.constant 0 : index
    %c1_39 = arith.constant 1 : index
    %c0_40 = arith.constant 0 : index
    %57 = vector.load %arg4[%c0_37, %c0_38, %c1_39, %c0_40] : memref<1x8x8x32xbf16, #tpu.memory_space<vmem>>, vector<1x8x1x32xbf16>
    %58 = vector.shape_cast %57 : vector<1x8x1x32xbf16> to vector<8x32xbf16>
    %59 = vector.shape_cast %56 : vector<8x32xbf16> to vector<1x8x1x32xbf16>
    tpu.vector_store %arg4[%c0_37, %c0_38, %c1_39, %c0_40], %59 {strides = array<i32>} : memref<1x8x8x32xbf16, #tpu.memory_space<vmem>>, vector<1x8x1x32xbf16>,
    %c0_41 = arith.constant 0 : index
    %c0_42 = arith.constant 0 : index
    %c2 = arith.constant 2 : index
    %c0_43 = arith.constant 0 : index
    %60 = vector.load %arg1[%c0_41, %c0_42, %c2, %c0_43] : memref<1x8x8x32xbf16, #tpu.memory_space<vmem>>, vector<1x8x1x32xbf16>
    %61 = vector.shape_cast %60 : vector<1x8x1x32xbf16> to vector<8x32xbf16>
    %c0_44 = arith.constant 0 : index
    %c0_45 = arith.constant 0 : index
    %c1_46 = arith.constant 1 : index
    %c0_47 = arith.constant 0 : index
    %62 = vector.load %arg2[%c0_44, %c0_45, %c1_46, %c0_47] : memref<1x8x4x32xbf16, #tpu.memory_space<vmem>>, vector<1x8x1x32xbf16>
    %63 = vector.shape_cast %62 : vector<1x8x1x32xbf16> to vector<8x32xbf16>
    %c0_48 = arith.constant 0 : index
    %c0_49 = arith.constant 0 : index
    %c1_50 = arith.constant 1 : index
    %c0_51 = arith.constant 0 : index
    %64 = vector.load %arg3[%c0_48, %c0_49, %c1_50, %c0_51] : memref<1x8x4x32xbf16, #tpu.memory_space<vmem>>, vector<1x8x1x32xbf16>
    %65 = vector.shape_cast %64 : vector<1x8x1x32xbf16> to vector<8x32xbf16>
    %cst_52 = arith.constant dense<0.000000e+00> : vector<8x8xf32>
    %66 = tpu.matmul %61, %63, %cst_52 {dimension_numbers = #tpu.dot_dimension_numbers<[1], [1], [0], [0], [0, 0, 1, 0], [], []>} : vector<8x32xbf16>, vector<8x32xbf16>, vector<8x8xf32> -> vector<8x8xf32>
    %cst_53 = arith.constant 0.176776692 : f32
    %67 = vector.broadcast %cst_53 : f32 to vector<8x8xf32>
    %68 = arith.mulf %66, %67 : vector<8x8xf32>
    %69 = arith.addf %68, %7 : vector<8x8xf32>
    %cst_54 = arith.constant dense<0xFF800000> : vector<8xf32>
    %70 = vector.multi_reduction <maximumf>, %69, %cst_54 [1] : vector<8x8xf32> to vector<8xf32>
    %71 = vector.shape_cast %70 : vector<8xf32> to vector<8x1xf32>
    %72 = vector.broadcast %71 : vector<8x1xf32> to vector<8x8xf32>
    %73 = arith.subf %69, %72 : vector<8x8xf32>
    %74 = math.exp %73 : vector<8x8xf32>
    %cst_55 = arith.constant dense<0.000000e+00> : vector<8xf32>
    %75 = vector.multi_reduction <add>, %74, %cst_55 [1] : vector<8x8xf32> to vector<8xf32>
    %76 = vector.shape_cast %75 : vector<8xf32> to vector<8x1xf32>
    %77 = tpu.reciprocal %76 {approx = true} : vector<8x1xf32> -> vector<8x1xf32>
    %78 = vector.broadcast %77 : vector<8x1xf32> to vector<8x8xf32>
    %79 = arith.mulf %74, %78 : vector<8x8xf32>
    %80 = arith.truncf %79 : vector<8x8xf32> to vector<8x8xbf16>
    %cst_56 = arith.constant dense<0.000000e+00> : vector<8x32xf32>
    %81 = tpu.matmul %80, %65, %cst_56 {dimension_numbers = #tpu.dot_dimension_numbers<[1], [0], [0], [1], [0, 0, 1, 1], [], []>} : vector<8x8xbf16>, vector<8x32xbf16>, vector<8x32xf32> -> vector<8x32xf32>
    %82 = arith.truncf %81 : vector<8x32xf32> to vector<8x32xbf16>
    %c0_57 = arith.constant 0 : index
    %c0_58 = arith.constant 0 : index
    %c2_59 = arith.constant 2 : index
    %c0_60 = arith.constant 0 : index
    %83 = vector.load %arg4[%c0_57, %c0_58, %c2_59, %c0_60] : memref<1x8x8x32xbf16, #tpu.memory_space<vmem>>, vector<1x8x1x32xbf16>
    %84 = vector.shape_cast %83 : vector<1x8x1x32xbf16> to vector<8x32xbf16>
    %85 = vector.shape_cast %82 : vector<8x32xbf16> to vector<1x8x1x32xbf16>
    tpu.vector_store %arg4[%c0_57, %c0_58, %c2_59, %c0_60], %85 {strides = array<i32>} : memref<1x8x8x32xbf16, #tpu.memory_space<vmem>>, vector<1x8x1x32xbf16>,
    %c0_61 = arith.constant 0 : index
    %c0_62 = arith.constant 0 : index
    %c3 = arith.constant 3 : index
    %c0_63 = arith.constant 0 : index
    %86 = vector.load %arg1[%c0_61, %c0_62, %c3, %c0_63] : memref<1x8x8x32xbf16, #tpu.memory_space<vmem>>, vector<1x8x1x32xbf16>
    %87 = vector.shape_cast %86 : vector<1x8x1x32xbf16> to vector<8x32xbf16>
    %c0_64 = arith.constant 0 : index
    %c0_65 = arith.constant 0 : index
    %c1_66 = arith.constant 1 : index
    %c0_67 = arith.constant 0 : index
    %88 = vector.load %arg2[%c0_64, %c0_65, %c1_66, %c0_67] : memref<1x8x4x32xbf16, #tpu.memory_space<vmem>>, vector<1x8x1x32xbf16>
    %89 = vector.shape_cast %88 : vector<1x8x1x32xbf16> to vector<8x32xbf16>
    %c0_68 = arith.constant 0 : index
    %c0_69 = arith.constant 0 : index
    %c1_70 = arith.constant 1 : index
    %c0_71 = arith.constant 0 : index
    %90 = vector.load %arg3[%c0_68, %c0_69, %c1_70, %c0_71] : memref<1x8x4x32xbf16, #tpu.memory_space<vmem>>, vector<1x8x1x32xbf16>
    %91 = vector.shape_cast %90 : vector<1x8x1x32xbf16> to vector<8x32xbf16>
    %cst_72 = arith.constant dense<0.000000e+00> : vector<8x8xf32>
    %92 = tpu.matmul %87, %89, %cst_72 {dimension_numbers = #tpu.dot_dimension_numbers<[1], [1], [0], [0], [0, 0, 1, 0], [], []>} : vector<8x32xbf16>, vector<8x32xbf16>, vector<8x8xf32> -> vector<8x8xf32>
    %cst_73 = arith.constant 0.176776692 : f32
    %93 = vector.broadcast %cst_73 : f32 to vector<8x8xf32>
    %94 = arith.mulf %92, %93 : vector<8x8xf32>
    %95 = arith.addf %94, %7 : vector<8x8xf32>
    %cst_74 = arith.constant dense<0xFF800000> : vector<8xf32>
    %96 = vector.multi_reduction <maximumf>, %95, %cst_74 [1] : vector<8x8xf32> to vector<8xf32>
    %97 = vector.shape_cast %96 : vector<8xf32> to vector<8x1xf32>
    %98 = vector.broadcast %97 : vector<8x1xf32> to vector<8x8xf32>
    %99 = arith.subf %95, %98 : vector<8x8xf32>
    %100 = math.exp %99 : vector<8x8xf32>
    %cst_75 = arith.constant dense<0.000000e+00> : vector<8xf32>
    %101 = vector.multi_reduction <add>, %100, %cst_75 [1] : vector<8x8xf32> to vector<8xf32>
    %102 = vector.shape_cast %101 : vector<8xf32> to vector<8x1xf32>
    %103 = tpu.reciprocal %102 {approx = true} : vector<8x1xf32> -> vector<8x1xf32>
    %104 = vector.broadcast %103 : vector<8x1xf32> to vector<8x8xf32>
    %105 = arith.mulf %100, %104 : vector<8x8xf32>
    %106 = arith.truncf %105 : vector<8x8xf32> to vector<8x8xbf16>
    %cst_76 = arith.constant dense<0.000000e+00> : vector<8x32xf32>
    %107 = tpu.matmul %106, %91, %cst_76 {dimension_numbers = #tpu.dot_dimension_numbers<[1], [0], [0], [1], [0, 0, 1, 1], [], []>} : vector<8x8xbf16>, vector<8x32xbf16>, vector<8x32xf32> -> vector<8x32xf32>
    %108 = arith.truncf %107 : vector<8x32xf32> to vector<8x32xbf16>
    %c0_77 = arith.constant 0 : index
    %c0_78 = arith.constant 0 : index
    %c3_79 = arith.constant 3 : index
    %c0_80 = arith.constant 0 : index
    %109 = vector.load %arg4[%c0_77, %c0_78, %c3_79, %c0_80] : memref<1x8x8x32xbf16, #tpu.memory_space<vmem>>, vector<1x8x1x32xbf16>
    %110 = vector.shape_cast %109 : vector<1x8x1x32xbf16> to vector<8x32xbf16>
    %111 = vector.shape_cast %108 : vector<8x32xbf16> to vector<1x8x1x32xbf16>
    tpu.vector_store %arg4[%c0_77, %c0_78, %c3_79, %c0_80], %111 {strides = array<i32>} : memref<1x8x8x32xbf16, #tpu.memory_space<vmem>>, vector<1x8x1x32xbf16>,
    %c0_81 = arith.constant 0 : index
    %c0_82 = arith.constant 0 : index
    %c4 = arith.constant 4 : index
    %c0_83 = arith.constant 0 : index
    %112 = vector.load %arg1[%c0_81, %c0_82, %c4, %c0_83] : memref<1x8x8x32xbf16, #tpu.memory_space<vmem>>, vector<1x8x1x32xbf16>
    %113 = vector.shape_cast %112 : vector<1x8x1x32xbf16> to vector<8x32xbf16>
    %c0_84 = arith.constant 0 : index
    %c0_85 = arith.constant 0 : index
    %c2_86 = arith.constant 2 : index
    %c0_87 = arith.constant 0 : index
    %114 = vector.load %arg2[%c0_84, %c0_85, %c2_86, %c0_87] : memref<1x8x4x32xbf16, #tpu.memory_space<vmem>>, vector<1x8x1x32xbf16>
    %115 = vector.shape_cast %114 : vector<1x8x1x32xbf16> to vector<8x32xbf16>
    %c0_88 = arith.constant 0 : index
    %c0_89 = arith.constant 0 : index
    %c2_90 = arith.constant 2 : index
    %c0_91 = arith.constant 0 : index
    %116 = vector.load %arg3[%c0_88, %c0_89, %c2_90, %c0_91] : memref<1x8x4x32xbf16, #tpu.memory_space<vmem>>, vector<1x8x1x32xbf16>
    %117 = vector.shape_cast %116 : vector<1x8x1x32xbf16> to vector<8x32xbf16>
    %cst_92 = arith.constant dense<0.000000e+00> : vector<8x8xf32>
    %118 = tpu.matmul %113, %115, %cst_92 {dimension_numbers = #tpu.dot_dimension_numbers<[1], [1], [0], [0], [0, 0, 1, 0], [], []>} : vector<8x32xbf16>, vector<8x32xbf16>, vector<8x8xf32> -> vector<8x8xf32>
    %cst_93 = arith.constant 0.176776692 : f32
    %119 = vector.broadcast %cst_93 : f32 to vector<8x8xf32>
    %120 = arith.mulf %118, %119 : vector<8x8xf32>
    %121 = arith.addf %120, %7 : vector<8x8xf32>
    %cst_94 = arith.constant dense<0xFF800000> : vector<8xf32>
    %122 = vector.multi_reduction <maximumf>, %121, %cst_94 [1] : vector<8x8xf32> to vector<8xf32>
    %123 = vector.shape_cast %122 : vector<8xf32> to vector<8x1xf32>
    %124 = vector.broadcast %123 : vector<8x1xf32> to vector<8x8xf32>
    %125 = arith.subf %121, %124 : vector<8x8xf32>
    %126 = math.exp %125 : vector<8x8xf32>
    %cst_95 = arith.constant dense<0.000000e+00> : vector<8xf32>
    %127 = vector.multi_reduction <add>, %126, %cst_95 [1] : vector<8x8xf32> to vector<8xf32>
    %128 = vector.shape_cast %127 : vector<8xf32> to vector<8x1xf32>
    %129 = tpu.reciprocal %128 {approx = true} : vector<8x1xf32> -> vector<8x1xf32>
    %130 = vector.broadcast %129 : vector<8x1xf32> to vector<8x8xf32>
    %131 = arith.mulf %126, %130 : vector<8x8xf32>
    %132 = arith.truncf %131 : vector<8x8xf32> to vector<8x8xbf16>
    %cst_96 = arith.constant dense<0.000000e+00> : vector<8x32xf32>
    %133 = tpu.matmul %132, %117, %cst_96 {dimension_numbers = #tpu.dot_dimension_numbers<[1], [0], [0], [1], [0, 0, 1, 1], [], []>} : vector<8x8xbf16>, vector<8x32xbf16>, vector<8x32xf32> -> vector<8x32xf32>
    %134 = arith.truncf %133 : vector<8x32xf32> to vector<8x32xbf16>
    %c0_97 = arith.constant 0 : index
    %c0_98 = arith.constant 0 : index
    %c4_99 = arith.constant 4 : index
    %c0_100 = arith.constant 0 : index
    %135 = vector.load %arg4[%c0_97, %c0_98, %c4_99, %c0_100] : memref<1x8x8x32xbf16, #tpu.memory_space<vmem>>, vector<1x8x1x32xbf16>
    %136 = vector.shape_cast %135 : vector<1x8x1x32xbf16> to vector<8x32xbf16>
    %137 = vector.shape_cast %134 : vector<8x32xbf16> to vector<1x8x1x32xbf16>
    tpu.vector_store %arg4[%c0_97, %c0_98, %c4_99, %c0_100], %137 {strides = array<i32>} : memref<1x8x8x32xbf16, #tpu.memory_space<vmem>>, vector<1x8x1x32xbf16>,
    %c0_101 = arith.constant 0 : index
    %c0_102 = arith.constant 0 : index
    %c5 = arith.constant 5 : index
    %c0_103 = arith.constant 0 : index
    %138 = vector.load %arg1[%c0_101, %c0_102, %c5, %c0_103] : memref<1x8x8x32xbf16, #tpu.memory_space<vmem>>, vector<1x8x1x32xbf16>
    %139 = vector.shape_cast %138 : vector<1x8x1x32xbf16> to vector<8x32xbf16>
    %c0_104 = arith.constant 0 : index
    %c0_105 = arith.constant 0 : index
    %c2_106 = arith.constant 2 : index
    %c0_107 = arith.constant 0 : index
    %140 = vector.load %arg2[%c0_104, %c0_105, %c2_106, %c0_107] : memref<1x8x4x32xbf16, #tpu.memory_space<vmem>>, vector<1x8x1x32xbf16>
    %141 = vector.shape_cast %140 : vector<1x8x1x32xbf16> to vector<8x32xbf16>
    %c0_108 = arith.constant 0 : index
    %c0_109 = arith.constant 0 : index
    %c2_110 = arith.constant 2 : index
    %c0_111 = arith.constant 0 : index
    %142 = vector.load %arg3[%c0_108, %c0_109, %c2_110, %c0_111] : memref<1x8x4x32xbf16, #tpu.memory_space<vmem>>, vector<1x8x1x32xbf16>
    %143 = vector.shape_cast %142 : vector<1x8x1x32xbf16> to vector<8x32xbf16>
    %cst_112 = arith.constant dense<0.000000e+00> : vector<8x8xf32>
    %144 = tpu.matmul %139, %141, %cst_112 {dimension_numbers = #tpu.dot_dimension_numbers<[1], [1], [0], [0], [0, 0, 1, 0], [], []>} : vector<8x32xbf16>, vector<8x32xbf16>, vector<8x8xf32> -> vector<8x8xf32>
    %cst_113 = arith.constant 0.176776692 : f32
    %145 = vector.broadcast %cst_113 : f32 to vector<8x8xf32>
    %146 = arith.mulf %144, %145 : vector<8x8xf32>
    %147 = arith.addf %146, %7 : vector<8x8xf32>
    %cst_114 = arith.constant dense<0xFF800000> : vector<8xf32>
    %148 = vector.multi_reduction <maximumf>, %147, %cst_114 [1] : vector<8x8xf32> to vector<8xf32>
    %149 = vector.shape_cast %148 : vector<8xf32> to vector<8x1xf32>
    %150 = vector.broadcast %149 : vector<8x1xf32> to vector<8x8xf32>
    %151 = arith.subf %147, %150 : vector<8x8xf32>
    %152 = math.exp %151 : vector<8x8xf32>
    %cst_115 = arith.constant dense<0.000000e+00> : vector<8xf32>
    %153 = vector.multi_reduction <add>, %152, %cst_115 [1] : vector<8x8xf32> to vector<8xf32>
    %154 = vector.shape_cast %153 : vector<8xf32> to vector<8x1xf32>
    %155 = tpu.reciprocal %154 {approx = true} : vector<8x1xf32> -> vector<8x1xf32>
    %156 = vector.broadcast %155 : vector<8x1xf32> to vector<8x8xf32>
    %157 = arith.mulf %152, %156 : vector<8x8xf32>
    %158 = arith.truncf %157 : vector<8x8xf32> to vector<8x8xbf16>
    %cst_116 = arith.constant dense<0.000000e+00> : vector<8x32xf32>
    %159 = tpu.matmul %158, %143, %cst_116 {dimension_numbers = #tpu.dot_dimension_numbers<[1], [0], [0], [1], [0, 0, 1, 1], [], []>} : vector<8x8xbf16>, vector<8x32xbf16>, vector<8x32xf32> -> vector<8x32xf32>
    %160 = arith.truncf %159 : vector<8x32xf32> to vector<8x32xbf16>
    %c0_117 = arith.constant 0 : index
    %c0_118 = arith.constant 0 : index
    %c5_119 = arith.constant 5 : index
    %c0_120 = arith.constant 0 : index
    %161 = vector.load %arg4[%c0_117, %c0_118, %c5_119, %c0_120] : memref<1x8x8x32xbf16, #tpu.memory_space<vmem>>, vector<1x8x1x32xbf16>
    %162 = vector.shape_cast %161 : vector<1x8x1x32xbf16> to vector<8x32xbf16>
    %163 = vector.shape_cast %160 : vector<8x32xbf16> to vector<1x8x1x32xbf16>
    tpu.vector_store %arg4[%c0_117, %c0_118, %c5_119, %c0_120], %163 {strides = array<i32>} : memref<1x8x8x32xbf16, #tpu.memory_space<vmem>>, vector<1x8x1x32xbf16>,
    %c0_121 = arith.constant 0 : index
    %c0_122 = arith.constant 0 : index
    %c6 = arith.constant 6 : index
    %c0_123 = arith.constant 0 : index
    %164 = vector.load %arg1[%c0_121, %c0_122, %c6, %c0_123] : memref<1x8x8x32xbf16, #tpu.memory_space<vmem>>, vector<1x8x1x32xbf16>
    %165 = vector.shape_cast %164 : vector<1x8x1x32xbf16> to vector<8x32xbf16>
    %c0_124 = arith.constant 0 : index
    %c0_125 = arith.constant 0 : index
    %c3_126 = arith.constant 3 : index
    %c0_127 = arith.constant 0 : index
    %166 = vector.load %arg2[%c0_124, %c0_125, %c3_126, %c0_127] : memref<1x8x4x32xbf16, #tpu.memory_space<vmem>>, vector<1x8x1x32xbf16>
    %167 = vector.shape_cast %166 : vector<1x8x1x32xbf16> to vector<8x32xbf16>
    %c0_128 = arith.constant 0 : index
    %c0_129 = arith.constant 0 : index
    %c3_130 = arith.constant 3 : index
    %c0_131 = arith.constant 0 : index
    %168 = vector.load %arg3[%c0_128, %c0_129, %c3_130, %c0_131] : memref<1x8x4x32xbf16, #tpu.memory_space<vmem>>, vector<1x8x1x32xbf16>
    %169 = vector.shape_cast %168 : vector<1x8x1x32xbf16> to vector<8x32xbf16>
    %cst_132 = arith.constant dense<0.000000e+00> : vector<8x8xf32>
    %170 = tpu.matmul %165, %167, %cst_132 {dimension_numbers = #tpu.dot_dimension_numbers<[1], [1], [0], [0], [0, 0, 1, 0], [], []>} : vector<8x32xbf16>, vector<8x32xbf16>, vector<8x8xf32> -> vector<8x8xf32>
    %cst_133 = arith.constant 0.176776692 : f32
    %171 = vector.broadcast %cst_133 : f32 to vector<8x8xf32>
    %172 = arith.mulf %170, %171 : vector<8x8xf32>
    %173 = arith.addf %172, %7 : vector<8x8xf32>
    %cst_134 = arith.constant dense<0xFF800000> : vector<8xf32>
    %174 = vector.multi_reduction <maximumf>, %173, %cst_134 [1] : vector<8x8xf32> to vector<8xf32>
    %175 = vector.shape_cast %174 : vector<8xf32> to vector<8x1xf32>
    %176 = vector.broadcast %175 : vector<8x1xf32> to vector<8x8xf32>
    %177 = arith.subf %173, %176 : vector<8x8xf32>
    %178 = math.exp %177 : vector<8x8xf32>
    %cst_135 = arith.constant dense<0.000000e+00> : vector<8xf32>
    %179 = vector.multi_reduction <add>, %178, %cst_135 [1] : vector<8x8xf32> to vector<8xf32>
    %180 = vector.shape_cast %179 : vector<8xf32> to vector<8x1xf32>
    %181 = tpu.reciprocal %180 {approx = true} : vector<8x1xf32> -> vector<8x1xf32>
    %182 = vector.broadcast %181 : vector<8x1xf32> to vector<8x8xf32>
    %183 = arith.mulf %178, %182 : vector<8x8xf32>
    %184 = arith.truncf %183 : vector<8x8xf32> to vector<8x8xbf16>
    %cst_136 = arith.constant dense<0.000000e+00> : vector<8x32xf32>
    %185 = tpu.matmul %184, %169, %cst_136 {dimension_numbers = #tpu.dot_dimension_numbers<[1], [0], [0], [1], [0, 0, 1, 1], [], []>} : vector<8x8xbf16>, vector<8x32xbf16>, vector<8x32xf32> -> vector<8x32xf32>
    %186 = arith.truncf %185 : vector<8x32xf32> to vector<8x32xbf16>
    %c0_137 = arith.constant 0 : index
    %c0_138 = arith.constant 0 : index
    %c6_139 = arith.constant 6 : index
    %c0_140 = arith.constant 0 : index
    %187 = vector.load %arg4[%c0_137, %c0_138, %c6_139, %c0_140] : memref<1x8x8x32xbf16, #tpu.memory_space<vmem>>, vector<1x8x1x32xbf16>
    %188 = vector.shape_cast %187 : vector<1x8x1x32xbf16> to vector<8x32xbf16>
    %189 = vector.shape_cast %186 : vector<8x32xbf16> to vector<1x8x1x32xbf16>
    tpu.vector_store %arg4[%c0_137, %c0_138, %c6_139, %c0_140], %189 {strides = array<i32>} : memref<1x8x8x32xbf16, #tpu.memory_space<vmem>>, vector<1x8x1x32xbf16>,
    %c0_141 = arith.constant 0 : index
    %c0_142 = arith.constant 0 : index
    %c7 = arith.constant 7 : index
    %c0_143 = arith.constant 0 : index
    %190 = vector.load %arg1[%c0_141, %c0_142, %c7, %c0_143] : memref<1x8x8x32xbf16, #tpu.memory_space<vmem>>, vector<1x8x1x32xbf16>
    %191 = vector.shape_cast %190 : vector<1x8x1x32xbf16> to vector<8x32xbf16>
    %c0_144 = arith.constant 0 : index
    %c0_145 = arith.constant 0 : index
    %c3_146 = arith.constant 3 : index
    %c0_147 = arith.constant 0 : index
    %192 = vector.load %arg2[%c0_144, %c0_145, %c3_146, %c0_147] : memref<1x8x4x32xbf16, #tpu.memory_space<vmem>>, vector<1x8x1x32xbf16>
    %193 = vector.shape_cast %192 : vector<1x8x1x32xbf16> to vector<8x32xbf16>
    %c0_148 = arith.constant 0 : index
    %c0_149 = arith.constant 0 : index
    %c3_150 = arith.constant 3 : index
    %c0_151 = arith.constant 0 : index
    %194 = vector.load %arg3[%c0_148, %c0_149, %c3_150, %c0_151] : memref<1x8x4x32xbf16, #tpu.memory_space<vmem>>, vector<1x8x1x32xbf16>
    %195 = vector.shape_cast %194 : vector<1x8x1x32xbf16> to vector<8x32xbf16>
    %cst_152 = arith.constant dense<0.000000e+00> : vector<8x8xf32>
    %196 = tpu.matmul %191, %193, %cst_152 {dimension_numbers = #tpu.dot_dimension_numbers<[1], [1], [0], [0], [0, 0, 1, 0], [], []>} : vector<8x32xbf16>, vector<8x32xbf16>, vector<8x8xf32> -> vector<8x8xf32>
    %cst_153 = arith.constant 0.176776692 : f32
    %197 = vector.broadcast %cst_153 : f32 to vector<8x8xf32>
    %198 = arith.mulf %196, %197 : vector<8x8xf32>
    %199 = arith.addf %198, %7 : vector<8x8xf32>
    %cst_154 = arith.constant dense<0xFF800000> : vector<8xf32>
    %200 = vector.multi_reduction <maximumf>, %199, %cst_154 [1] : vector<8x8xf32> to vector<8xf32>
    %201 = vector.shape_cast %200 : vector<8xf32> to vector<8x1xf32>
    %202 = vector.broadcast %201 : vector<8x1xf32> to vector<8x8xf32>
    %203 = arith.subf %199, %202 : vector<8x8xf32>
    %204 = math.exp %203 : vector<8x8xf32>
    %cst_155 = arith.constant dense<0.000000e+00> : vector<8xf32>
    %205 = vector.multi_reduction <add>, %204, %cst_155 [1] : vector<8x8xf32> to vector<8xf32>
    %206 = vector.shape_cast %205 : vector<8xf32> to vector<8x1xf32>
    %207 = tpu.reciprocal %206 {approx = true} : vector<8x1xf32> -> vector<8x1xf32>
    %208 = vector.broadcast %207 : vector<8x1xf32> to vector<8x8xf32>
    %209 = arith.mulf %204, %208 : vector<8x8xf32>
    %210 = arith.truncf %209 : vector<8x8xf32> to vector<8x8xbf16>
    %cst_156 = arith.constant dense<0.000000e+00> : vector<8x32xf32>
    %211 = tpu.matmul %210, %195, %cst_156 {dimension_numbers = #tpu.dot_dimension_numbers<[1], [0], [0], [1], [0, 0, 1, 1], [], []>} : vector<8x8xbf16>, vector<8x32xbf16>, vector<8x32xf32> -> vector<8x32xf32>
    %212 = arith.truncf %211 : vector<8x32xf32> to vector<8x32xbf16>
    %c0_157 = arith.constant 0 : index
    %c0_158 = arith.constant 0 : index
    %c7_159 = arith.constant 7 : index
    %c0_160 = arith.constant 0 : index
    %213 = vector.load %arg4[%c0_157, %c0_158, %c7_159, %c0_160] : memref<1x8x8x32xbf16, #tpu.memory_space<vmem>>, vector<1x8x1x32xbf16>
    %214 = vector.shape_cast %213 : vector<1x8x1x32xbf16> to vector<8x32xbf16>
    %215 = vector.shape_cast %212 : vector<8x32xbf16> to vector<1x8x1x32xbf16>
    tpu.vector_store %arg4[%c0_157, %c0_158, %c7_159, %c0_160], %215 {strides = array<i32>} : memref<1x8x8x32xbf16, #tpu.memory_space<vmem>>, vector<1x8x1x32xbf16>,
    return
  }
  func.func @transform_0(%arg0: i32) -> (i32, i32, i32, i32) {
    %c0_i32 = arith.constant 0 : i32
    %c0_i32_0 = arith.constant 0 : i32
    %c0_i32_1 = arith.constant 0 : i32
    %c0_i32_2 = arith.constant 0 : i32
    return %arg0, %c0_i32, %c0_i32_0, %c0_i32_1 : i32, i32, i32, i32
  }
  func.func @transform_1(%arg0: i32) -> (i32, i32, i32, i32) {
    %c0_i32 = arith.constant 0 : i32
    %c0_i32_0 = arith.constant 0 : i32
    %c0_i32_1 = arith.constant 0 : i32
    %c0_i32_2 = arith.constant 0 : i32
    return %arg0, %c0_i32, %c0_i32_0, %c0_i32_1 : i32, i32, i32, i32
  }
  func.func @transform_2(%arg0: i32) -> (i32, i32, i32, i32) {
    %c0_i32 = arith.constant 0 : i32
    %c0_i32_0 = arith.constant 0 : i32
    %c0_i32_1 = arith.constant 0 : i32
    %c0_i32_2 = arith.constant 0 : i32
    return %arg0, %c0_i32, %c0_i32_0, %c0_i32_1 : i32, i32, i32, i32
  }
  func.func @transform_3(%arg0: i32) -> (i32, i32, i32, i32) {
    %c0_i32 = arith.constant 0 : i32
    %c0_i32_0 = arith.constant 0 : i32
    %c0_i32_1 = arith.constant 0 : i32
    %c0_i32_2 = arith.constant 0 : i32
    return %arg0, %c0_i32, %c0_i32_0, %c0_i32_1 : i32, i32, i32, i32
  }
}

</mosaic_0001>

<bundles_post_ra>
// kernel: transformer_block.4
= control target key start
LH: loop header
LB: loop body
LE: loop exit
PB: predicated region body
PF: predicated region fallthrough
CT: control target
= control target key end

     0   :  { %v85_v10 = vmov 256.0   ;;  %s122_s0 = inlined_call_operand.vmem [shape: f32[16,256], index: 0, kind: input, shape index: {}]   ;;  %s123_s1 = inlined_call_operand.vmem [shape: f32[1,256], index: 1, kind: input, shape index: {}]   ;;  %s124_s2 = inlined_call_operand.vmem [shape: bf16[16,256], index: 2, kind: output, shape index: {}]  }
   0x1   :  { %v11_v0 = vld [vmem:[%s122_s0] sm:$0xff]  ;;  %v12_v1 = vld [vmem:[%s122_s0 + $0x8] sm:$0xff]  ;;  %v13_v4 = vld [vmem:[%s122_s0 + $0x10] sm:$0xff]  ;;  %79 = vrcp.f32 %v85_v10 }
   0x2   :  { %v15_v2 = vmul.f32 %v11_v0, %v11_v0  ;;  %v16_v3 = vmul.f32 %v12_v1, %v12_v1  ;;  %v14_v5 = vld [vmem:[%s122_s0 + $0x18] sm:$0xff]  ;;  %v17_v7 = vmul.f32 %v13_v4, %v13_v4  ;;  %v60_v27 = vld [vmem:[%s123_s1] sm:$0x3] }
   0x3   :  { %v18_v8 = vmul.f32 %v14_v5, %v14_v5  ;;  %v62_v32 = vperm.slane %v60_v27, 0  ;;  %v63_v33 = vperm.slane %v60_v27, 1 }
   0x4   :  { %v19_v6 = vadd.f32 %v16_v3, %v15_v2 }
   0x5   :  { %v22_v9 = vadd.f32 %v18_v8, %v17_v7 }
   0x6   :  { %20 = vadd.xlane.f32.xlu0 %v19_v6 }
   0x7   :  { %v80_v11 = vpop.eup %79 }
   0x8   :  { %v26_v12 = vmul.f32 256.0, %v80_v11  ;;  %vm30_vm0 = vweird.f32 %v80_v11 }
   0xa   :  { %v27_v13 = vsub.f32 1.0, %v26_v12 }
   0xc   :  { %v28_v14 = vmul.f32 %v80_v11, %v27_v13 }
   0xe   :  { %23 = vadd.xlane.f32.xlu0 %v22_v9  ;;  %v29_v15 = vadd.f32 %v80_v11, %v28_v14 }
  0x10   :  { %v31_v16 = vsel %vm30_vm0, %v80_v11, %v29_v15 }
  0x79   :  { %v21_v17 = vpop.xlane.xlu0 %20 }
  0x7a   :  { %v32_v18 = vmul.f32 %v31_v16, %v21_v17 }
  0x7c   :  { %v34_v19 = vadd.f32 1e-05, %v32_v18 }
  0x7e   :  { %81 = vrsqrt.f32 %v34_v19  ;;  %vm42_vm2 = vweird.f32 %v34_v19 }
  0x81   :  { %v24_v20 = vpop.xlane.xlu0 %23 }
  0x82   :  { %v33_v21 = vmul.f32 %v31_v16, %v24_v20 }
  0x84   :  { %v82_v22 = vpop.eup %81  ;;  %v35_v23 = vadd.f32 1e-05, %v33_v21 }
  0x85   :  { %v37_v24 = vmul.f32 %v82_v22, %v34_v19  ;;  %vm43_vm1 = vweird.f32 %v82_v22 }
  0x86   :  { %83 = vrsqrt.f32 %v35_v23  ;;  %vm44_vm3 = vmor %vm42_vm2, %vm43_vm1  ;;  %vm52_vm5 = vweird.f32 %v35_v23 }
  0x87   :  { %v38_v25 = vmul.f32 %v82_v22, %v37_v24 }
  0x89   :  { %v39_v26 = vmul.f32 0.5, %v38_v25 }
  0x8b   :  { %v40_v28 = vsub.f32 1.5, %v39_v26 }
  0x8c   :  { %v84_v29 = vpop.eup %83 }
  0x8d   :  { %v41_v30 = vmul.f32 %v82_v22, %v40_v28  ;;  %v47_v31 = vmul.f32 %v84_v29, %v35_v23  ;;  %vm53_vm4 = vweird.f32 %v84_v29 }
  0x8e   :  { %vm54_vm6 = vmor %vm52_vm5, %vm53_vm4 }
  0x8f   :  { %v45_v34 = vsel %vm44_vm3, %v82_v22, %v41_v30  ;;  %v48_v35 = vmul.f32 %v84_v29, %v47_v31 }
  0x90   :  { %v56_v36 = vmul.f32 %v45_v34, %v11_v0  ;;  %v57_v37 = vmul.f32 %v45_v34, %v12_v1 }
  0x91   :  { %v49_v38 = vmul.f32 0.5, %v48_v35 }
  0x92   :  { %v66_v39 = vmul.f32 %v62_v32, %v56_v36  ;;  %v67_v40 = vmul.f32 %v63_v33, %v57_v37 }
  0x93   :  { %v50_v41 = vsub.f32 1.5, %v49_v38 }
  0x94   :  { %v70_v42 = vpack.c.bf16 %v67_v40, %v66_v39 }
  0x95   :  { %v51_v43 = vmul.f32 %v84_v29, %v50_v41 }
  0x96   :  { %72 = vst [vmem:[%s124_s2] sm:$0xff] %v70_v42 }
  0x97   :  { %v55_v44 = vsel %vm54_vm6, %v84_v29, %v51_v43 }
  0x98   :  { %v58_v45 = vmul.f32 %v55_v44, %v13_v4  ;;  %v59_v46 = vmul.f32 %v55_v44, %v14_v5 }
  0x9a   :  { %v68_v47 = vmul.f32 %v62_v32, %v58_v45  ;;  %v69_v48 = vmul.f32 %v63_v33, %v59_v46 }
  0x9c   :  { %v71_v49 = vpack.c.bf16 %v69_v48, %v68_v47 }
  0x9e   :  { %73 = vst [vmem:[%s124_s2 + $0x8] sm:$0xff] %v71_v49 }

// kernel: transformer_block.7
= control target key start
LH: loop header
LB: loop body
LE: loop exit
PB: predicated region body
PF: predicated region fallthrough
CT: control target
= control target key end

     0   :  { %s2713_s12 = smov 0   ;;  %s2715_s13 = smov 0   ;;  %s3447_s0 = inlined_call_operand.vmem [shape: bf16[16,256], index: 0, kind: input, shape index: {}]   ;;  %s3448_s1 = inlined_call_operand.vmem [shape: bf16[256,1536], index: 1, kind: input, shape index: {}]   ;;  %s3449_s2 = inlined_call_operand.vmem [shape: bf16[768,256], index: 2, kind: input, shape index: {}]   ;;  %s3450_s3 = inlined_call_operand.vmem [shape: bf16[16,256], index: 3, kind: output, shape index: {}]  }
   0x1   :  { %s2717_s14 = smov 0   ;;  %s2719_s15 = smov 0  }
   0x2   :  { %s2721_s16 = smov 0  }
   0x3 LB: > { %s22_s17 = sadd.s32 1, %s2686_s15  ;;  %p65_p1 = scmp.ne.s32.totalorder %s2678_s13, %s2674_s12  ;;  %s2690_s16 = sphi %s2721_s16, %s13_s16   ;;  %s2686_s15 = sphi %s2719_s15, %s3466_s15   ;;  %s2682_s14 = sphi %s2717_s14, %s3465_s14   ;;  %s2678_s13 = sphi %s2715_s13, %s3464_s13   ;;  %s2674_s12 = sphi %s2713_s12, %s3463_s12  }
   0x4   : > { %p23_p0 = scmp.ge.s32.totalorder %s22_s17, 2  ;;  %p66_p2 = scmp.eq.s32.totalorder %s2690_s16, 0 }
   0x5   : > { %s58_s19 = sadd.s32 1, %s2678_s13  ;;  %p1836_p5 = scmp.ge.s32.totalorder %s2690_s16, 2 }
   0x6   : > { %s3468_s17 = smov (%p23_p0, %s22_s17), 0  ;;  %p67_p3 = por %p66_p2, %p65_p1 }
   0x7   : > { %s55_s18 = ssub.s32 %s2686_s15, %s3468_s17  ;;  %153 = sbr.rel (%p1836_p5) target bundleno = 113 (0x71), region = 20 }
   0x8   : > { %p56_p4 = scmp.eq.s32.totalorder %s55_s18, 0 }
   0xa   : > { %s2748_s20 = scalar_select %p56_p4, %s2678_s13, %s58_s19  }
   0xc   : > { %156 = sbr.rel (!%p67_p3) target bundleno = 113 (0x71), region = 24  ;;  %s158_s21 = sand.u32 (%p67_p3), 1, %s2678_s13  }
   0xd   : > { %s2437_s22 = smul.u32 (%p67_p3), 24, %s2686_s15 }
   0xe   : > { %s2585_s23 = smul.u32 (%p67_p3), 768, %s158_s21 }
   0xf   : > { %s2756_s26 = scalar_lea.vmem (%p67_p3), %s3448_s1, %s2437_s22 }
  0x10   : > { %v176_v0 = vld [vmem:[%s2756_s26] sm:$0xff] (%p67_p3)  ;;  %v178_v1 = vld [vmem:[%s2756_s26 + $0x8] sm:$0xff] (%p67_p3)  ;;  %v180_v2 = vld [vmem:[%s2756_s26 + $0x10] sm:$0xff] (%p67_p3)  ;;  %s2761_s27 = scalar_lea.vmem (%p67_p3), [#allocation3], %s2585_s23 }
  0x11   : > { %177 = vst [vmem:[%s2761_s27] sm:$0xff] %v176_v0  ;;  %v182_v3 = vld [vmem:[%s2756_s26 + $0x30] sm:$0xff]  ;;  %v184_v4 = vld [vmem:[%s2756_s26 + $0x38] sm:$0xff]  ;;  %v186_v5 = vld [vmem:[%s2756_s26 + $0x40] sm:$0xff] }
  0x12   : > { %179 = vst [vmem:[%s2761_s27 + $0x8] sm:$0xff] %v178_v1  ;;  %v188_v6 = vld [vmem:[%s2756_s26 + $0x60] sm:$0xff]  ;;  %v190_v7 = vld [vmem:[%s2756_s26 + $0x68] sm:$0xff]  ;;  %v192_v8 = vld [vmem:[%s2756_s26 + $0x70] sm:$0xff] }
  0x13   : > { %181 = vst [vmem:[%s2761_s27 + $0x10] sm:$0xff] %v180_v2  ;;  %v194_v9 = vld [vmem:[%s2756_s26 + $0x90] sm:$0xff]  ;;  %v196_v10 = vld [vmem:[%s2756_s26 + $0x98] sm:$0xff]  ;;  %v198_v11 = vld [vmem:[%s2756_s26 + $0xa0] sm:$0xff] }
  0x14   : > { %183 = vst [vmem:[%s2761_s27 + $0x18] sm:$0xff] %v182_v3  ;;  %v200_v12 = vld [vmem:[%s2756_s26 + $0xc0] sm:$0xff]  ;;  %v202_v13 = vld [vmem:[%s2756_s26 + $0xc8] sm:$0xff]  ;;  %v204_v14 = vld [vmem:[%s2756_s26 + $0xd0] sm:$0xff] }
  0x15   : > { %185 = vst [vmem:[%s2761_s27 + $0x20] sm:$0xff] %v184_v4  ;;  %v206_v15 = vld [vmem:[%s2756_s26 + $0xf0] sm:$0xff]  ;;  %v208_v16 = vld [vmem:[%s2756_s26 + $0xf8] sm:$0xff]  ;;  %v210_v17 = vld [vmem:[%s2756_s26 + $0x100] sm:$0xff] }
  0x16   : > { %187 = vst [vmem:[%s2761_s27 + $0x28] sm:$0xff] %v186_v5  ;;  %v212_v18 = vld [vmem:[%s2756_s26 + $0x120] sm:$0xff]  ;;  %v214_v19 = vld [vmem:[%s2756_s26 + $0x128] sm:$0xff]  ;;  %v216_v20 = vld [vmem:[%s2756_s26 + $0x130] sm:$0xff] }
  0x17   : > { %189 = vst [vmem:[%s2761_s27 + $0x30] sm:$0xff] %v188_v6  ;;  %v218_v21 = vld [vmem:[%s2756_s26 + $0x150] sm:$0xff]  ;;  %v220_v22 = vld [vmem:[%s2756_s26 + $0x158] sm:$0xff]  ;;  %v222_v23 = vld [vmem:[%s2756_s26 + $0x160] sm:$0xff] }
  0x18   : > { %191 = vst [vmem:[%s2761_s27 + $0x38] sm:$0xff] %v190_v7  ;;  %v224_v24 = vld [vmem:[%s2756_s26 + $0x180] sm:$0xff]  ;;  %v226_v25 = vld [vmem:[%s2756_s26 + $0x188] sm:$0xff]  ;;  %v228_v26 = vld [vmem:[%s2756_s26 + $0x190] sm:$0xff] }
  0x19   : > { %193 = vst [vmem:[%s2761_s27 + $0x40] sm:$0xff] %v192_v8  ;;  %v230_v27 = vld [vmem:[%s2756_s26 + $0x1b0] sm:$0xff]  ;;  %v232_v28 = vld [vmem:[%s2756_s26 + $0x1b8] sm:$0xff]  ;;  %v234_v29 = vld [vmem:[%s2756_s26 + $0x1c0] sm:$0xff] }
  0x1a   : > { %195 = vst [vmem:[%s2761_s27 + $0x48] sm:$0xff] %v194_v9  ;;  %v236_v30 = vld [vmem:[%s2756_s26 + $0x1e0] sm:$0xff]  ;;  %v238_v31 = vld [vmem:[%s2756_s26 + $0x1e8] sm:$0xff]  ;;  %v240_v32 = vld [vmem:[%s2756_s26 + $0x1f0] sm:$0xff] }
  0x1b   : > { %197 = vst [vmem:[%s2761_s27 + $0x50] sm:$0xff] %v196_v10  ;;  %v242_v33 = vld [vmem:[%s2756_s26 + $0x210] sm:$0xff]  ;;  %v244_v34 = vld [vmem:[%s2756_s26 + $0x218] sm:$0xff]  ;;  %v246_v35 = vld [vmem:[%s2756_s26 + $0x220] sm:$0xff] }
  0x1c   : > { %199 = vst [vmem:[%s2761_s27 + $0x58] sm:$0xff] %v198_v11  ;;  %v248_v36 = vld [vmem:[%s2756_s26 + $0x240] sm:$0xff]  ;;  %v250_v37 = vld [vmem:[%s2756_s26 + $0x248] sm:$0xff]  ;;  %v252_v38 = vld [vmem:[%s2756_s26 + $0x250] sm:$0xff] }
  0x1d   : > { %201 = vst [vmem:[%s2761_s27 + $0x60] sm:$0xff] %v200_v12  ;;  %v254_v39 = vld [vmem:[%s2756_s26 + $0x270] sm:$0xff]  ;;  %v256_v40 = vld [vmem:[%s2756_s26 + $0x278] sm:$0xff]  ;;  %v258_v41 = vld [vmem:[%s2756_s26 + $0x280] sm:$0xff] }
  0x1e   : > { %203 = vst [vmem:[%s2761_s27 + $0x68] sm:$0xff] %v202_v13  ;;  %v260_v42 = vld [vmem:[%s2756_s26 + $0x2a0] sm:$0xff]  ;;  %v262_v43 = vld [vmem:[%s2756_s26 + $0x2a8] sm:$0xff]  ;;  %v264_v44 = vld [vmem:[%s2756_s26 + $0x2b0] sm:$0xff] }
  0x1f   : > { %205 = vst [vmem:[%s2761_s27 + $0x70] sm:$0xff] %v204_v14  ;;  %v266_v45 = vld [vmem:[%s2756_s26 + $0x2d0] sm:$0xff]  ;;  %v268_v46 = vld [vmem:[%s2756_s26 + $0x2d8] sm:$0xff]  ;;  %v270_v47 = vld [vmem:[%s2756_s26 + $0x2e0] sm:$0xff] }
  0x20   : > { %207 = vst [vmem:[%s2761_s27 + $0x78] sm:$0xff] %v206_v15  ;;  %v272_v48 = vld [vmem:[%s2756_s26 + $0x300] sm:$0xff]  ;;  %v274_v49 = vld [vmem:[%s2756_s26 + $0x308] sm:$0xff]  ;;  %v276_v50 = vld [vmem:[%s2756_s26 + $0x310] sm:$0xff] }
  0x21   : > { %209 = vst [vmem:[%s2761_s27 + $0x80] sm:$0xff] %v208_v16  ;;  %v278_v51 = vld [vmem:[%s2756_s26 + $0x330] sm:$0xff]  ;;  %v280_v52 = vld [vmem:[%s2756_s26 + $0x338] sm:$0xff]  ;;  %v282_v53 = vld [vmem:[%s2756_s26 + $0x340] sm:$0xff] }
  0x22   : > { %211 = vst [vmem:[%s2761_s27 + $0x88] sm:$0xff] %v210_v17  ;;  %v284_v54 = vld [vmem:[%s2756_s26 + $0x360] sm:$0xff]  ;;  %v286_v55 = vld [vmem:[%s2756_s26 + $0x368] sm:$0xff]  ;;  %v288_v56 = vld [vmem:[%s2756_s26 + $0x370] sm:$0xff] }
  0x23   : > { %213 = vst [vmem:[%s2761_s27 + $0x90] sm:$0xff] %v212_v18  ;;  %v290_v57 = vld [vmem:[%s2756_s26 + $0x390] sm:$0xff]  ;;  %v292_v58 = vld [vmem:[%s2756_s26 + $0x398] sm:$0xff]  ;;  %v294_v59 = vld [vmem:[%s2756_s26 + $0x3a0] sm:$0xff] }
  0x24   : > { %215 = vst [vmem:[%s2761_s27 + $0x98] sm:$0xff] %v214_v19  ;;  %v296_v60 = vld [vmem:[%s2756_s26 + $0x3c0] sm:$0xff]  ;;  %v298_v61 = vld [vmem:[%s2756_s26 + $0x3c8] sm:$0xff]  ;;  %v300_v62 = vld [vmem:[%s2756_s26 + $0x3d0] sm:$0xff] }
  0x25   : > { %217 = vst [vmem:[%s2761_s27 + $0xa0] sm:$0xff] %v216_v20  ;;  %v302_v63 = vld [vmem:[%s2756_s26 + $0x3f0] sm:$0xff]  ;;  %v304_v0 = vld [vmem:[%s2756_s26 + $0x3f8] sm:$0xff]  ;;  %v306_v1 = vld [vmem:[%s2756_s26 + $0x400] sm:$0xff] }
  0x26   : > { %219 = vst [vmem:[%s2761_s27 + $0xa8] sm:$0xff] %v218_v21  ;;  %v308_v2 = vld [vmem:[%s2756_s26 + $0x420] sm:$0xff]  ;;  %v310_v3 = vld [vmem:[%s2756_s26 + $0x428] sm:$0xff]  ;;  %v312_v4 = vld [vmem:[%s2756_s26 + $0x430] sm:$0xff] }
  0x27   : > { %221 = vst [vmem:[%s2761_s27 + $0xb0] sm:$0xff] %v220_v22  ;;  %v314_v5 = vld [vmem:[%s2756_s26 + $0x450] sm:$0xff]  ;;  %v316_v6 = vld [vmem:[%s2756_s26 + $0x458] sm:$0xff]  ;;  %v318_v7 = vld [vmem:[%s2756_s26 + $0x460] sm:$0xff] }
  0x28   : > { %223 = vst [vmem:[%s2761_s27 + $0xb8] sm:$0xff] %v222_v23  ;;  %v320_v8 = vld [vmem:[%s2756_s26 + $0x480] sm:$0xff]  ;;  %v322_v9 = vld [vmem:[%s2756_s26 + $0x488] sm:$0xff]  ;;  %v324_v10 = vld [vmem:[%s2756_s26 + $0x490] sm:$0xff] }
  0x29   : > { %225 = vst [vmem:[%s2761_s27 + $0xc0] sm:$0xff] %v224_v24  ;;  %v326_v11 = vld [vmem:[%s2756_s26 + $0x4b0] sm:$0xff]  ;;  %v328_v12 = vld [vmem:[%s2756_s26 + $0x4b8] sm:$0xff]  ;;  %v330_v13 = vld [vmem:[%s2756_s26 + $0x4c0] sm:$0xff] }
  0x2a   : > { %227 = vst [vmem:[%s2761_s27 + $0xc8] sm:$0xff] %v226_v25  ;;  %v332_v14 = vld [vmem:[%s2756_s26 + $0x4e0] sm:$0xff]  ;;  %v334_v15 = vld [vmem:[%s2756_s26 + $0x4e8] sm:$0xff]  ;;  %v336_v16 = vld [vmem:[%s2756_s26 + $0x4f0] sm:$0xff] }
  0x2b   : > { %229 = vst [vmem:[%s2761_s27 + $0xd0] sm:$0xff] %v228_v26  ;;  %v338_v17 = vld [vmem:[%s2756_s26 + $0x510] sm:$0xff]  ;;  %v340_v18 = vld [vmem:[%s2756_s26 + $0x518] sm:$0xff]  ;;  %v342_v19 = vld [vmem:[%s2756_s26 + $0x520] sm:$0xff] }
  0x2c   : > { %231 = vst [vmem:[%s2761_s27 + $0xd8] sm:$0xff] %v230_v27  ;;  %v344_v20 = vld [vmem:[%s2756_s26 + $0x540] sm:$0xff]  ;;  %v346_v21 = vld [vmem:[%s2756_s26 + $0x548] sm:$0xff]  ;;  %v348_v22 = vld [vmem:[%s2756_s26 + $0x550] sm:$0xff] }
  0x2d   : > { %233 = vst [vmem:[%s2761_s27 + $0xe0] sm:$0xff] %v232_v28  ;;  %v350_v23 = vld [vmem:[%s2756_s26 + $0x570] sm:$0xff]  ;;  %v352_v24 = vld [vmem:[%s2756_s26 + $0x578] sm:$0xff]  ;;  %v354_v25 = vld [vmem:[%s2756_s26 + $0x580] sm:$0xff] }
  0x2e   : > { %235 = vst [vmem:[%s2761_s27 + $0xe8] sm:$0xff] %v234_v29  ;;  %v356_v26 = vld [vmem:[%s2756_s26 + $0x5a0] sm:$0xff]  ;;  %v358_v27 = vld [vmem:[%s2756_s26 + $0x5a8] sm:$0xff]  ;;  %v360_v28 = vld [vmem:[%s2756_s26 + $0x5b0] sm:$0xff] }
  0x2f   : > { %237 = vst [vmem:[%s2761_s27 + $0xf0] sm:$0xff] %v236_v30  ;;  %v362_v29 = vld [vmem:[%s2756_s26 + $0x5d0] sm:$0xff]  ;;  %v364_v30 = vld [vmem:[%s2756_s26 + $0x5d8] sm:$0xff] }
  0x30   : > { %239 = vst [vmem:[%s2761_s27 + $0xf8] sm:$0xff] %v238_v31  ;;  %v366_v31 = vld [vmem:[%s2756_s26 + $0x5e0] sm:$0xff] }
  0x31   : > { %241 = vst [vmem:[%s2761_s27 + $0x100] sm:$0xff] %v240_v32 }
  0x32   : > { %243 = vst [vmem:[%s2761_s27 + $0x108] sm:$0xff] %v242_v33 }
  0x33   : > { %245 = vst [vmem:[%s2761_s27 + $0x110] sm:$0xff] %v244_v34 }
  0x34   : > { %247 = vst [vmem:[%s2761_s27 + $0x118] sm:$0xff] %v246_v35 }
  0x35   : > { %249 = vst [vmem:[%s2761_s27 + $0x120] sm:$0xff] %v248_v36 }
  0x36   : > { %251 = vst [vmem:[%s2761_s27 + $0x128] sm:$0xff] %v250_v37 }
  0x37   : > { %253 = vst [vmem:[%s2761_s27 + $0x130] sm:$0xff] %v252_v38 }
  0x38   : > { %255 = vst [vmem:[%s2761_s27 + $0x138] sm:$0xff] %v254_v39 }
  0x39   : > { %257 = vst [vmem:[%s2761_s27 + $0x140] sm:$0xff] %v256_v40 }
  0x3a   : > { %259 = vst [vmem:[%s2761_s27 + $0x148] sm:$0xff] %v258_v41 }
  0x3b   : > { %261 = vst [vmem:[%s2761_s27 + $0x150] sm:$0xff] %v260_v42 }
  0x3c   : > { %263 = vst [vmem:[%s2761_s27 + $0x158] sm:$0xff] %v262_v43 }
  0x3d   : > { %265 = vst [vmem:[%s2761_s27 + $0x160] sm:$0xff] %v264_v44 }
  0x3e   : > { %267 = vst [vmem:[%s2761_s27 + $0x168] sm:$0xff] %v266_v45 }
  0x3f   : > { %269 = vst [vmem:[%s2761_s27 + $0x170] sm:$0xff] %v268_v46 }
  0x40   : > { %271 = vst [vmem:[%s2761_s27 + $0x178] sm:$0xff] %v270_v47 }
  0x41   : > { %273 = vst [vmem:[%s2761_s27 + $0x180] sm:$0xff] %v272_v48 }
  0x42   : > { %275 = vst [vmem:[%s2761_s27 + $0x188] sm:$0xff] %v274_v49 }
  0x43   : > { %277 = vst [vmem:[%s2761_s27 + $0x190] sm:$0xff] %v276_v50 }
  0x44   : > { %279 = vst [vmem:[%s2761_s27 + $0x198] sm:$0xff] %v278_v51 }
  0x45   : > { %281 = vst [vmem:[%s2761_s27 + $0x1a0] sm:$0xff] %v280_v52 }
  0x46   : > { %283 = vst [vmem:[%s2761_s27 + $0x1a8] sm:$0xff] %v282_v53 }
  0x47   : > { %285 = vst [vmem:[%s2761_s27 + $0x1b0] sm:$0xff] %v284_v54 }
  0x48   : > { %287 = vst [vmem:[%s2761_s27 + $0x1b8] sm:$0xff] %v286_v55 }
  0x49   : > { %289 = vst [vmem:[%s2761_s27 + $0x1c0] sm:$0xff] %v288_v56 }
  0x4a   : > { %291 = vst [vmem:[%s2761_s27 + $0x1c8] sm:$0xff] %v290_v57 }
  0x4b   : > { %293 = vst [vmem:[%s2761_s27 + $0x1d0] sm:$0xff] %v292_v58 }
  0x4c   : > { %295 = vst [vmem:[%s2761_s27 + $0x1d8] sm:$0xff] %v294_v59 }
  0x4d   : > { %297 = vst [vmem:[%s2761_s27 + $0x1e0] sm:$0xff] %v296_v60 }
  0x4e   : > { %299 = vst [vmem:[%s2761_s27 + $0x1e8] sm:$0xff] %v298_v61 }
  0x4f   : > { %301 = vst [vmem:[%s2761_s27 + $0x1f0] sm:$0xff] %v300_v62 }
  0x50   : > { %303 = vst [vmem:[%s2761_s27 + $0x1f8] sm:$0xff] %v302_v63 }
  0x51   : > { %305 = vst [vmem:[%s2761_s27 + $0x200] sm:$0xff] %v304_v0 }
  0x52   : > { %307 = vst [vmem:[%s2761_s27 + $0x208] sm:$0xff] %v306_v1 }
  0x53   : > { %309 = vst [vmem:[%s2761_s27 + $0x210] sm:$0xff] %v308_v2 }
  0x54   : > { %311 = vst [vmem:[%s2761_s27 + $0x218] sm:$0xff] %v310_v3 }
  0x55   : > { %313 = vst [vmem:[%s2761_s27 + $0x220] sm:$0xff] %v312_v4 }
  0x56   : > { %315 = vst [vmem:[%s2761_s27 + $0x228] sm:$0xff] %v314_v5 }
  0x57   : > { %317 = vst [vmem:[%s2761_s27 + $0x230] sm:$0xff] %v316_v6 }
  0x58   : > { %319 = vst [vmem:[%s2761_s27 + $0x238] sm:$0xff] %v318_v7 }
  0x59   : > { %321 = vst [vmem:[%s2761_s27 + $0x240] sm:$0xff] %v320_v8 }
  0x5a   : > { %323 = vst [vmem:[%s2761_s27 + $0x248] sm:$0xff] %v322_v9 }
  0x5b   : > { %325 = vst [vmem:[%s2761_s27 + $0x250] sm:$0xff] %v324_v10 }
  0x5c   : > { %327 = vst [vmem:[%s2761_s27 + $0x258] sm:$0xff] %v326_v11 }
  0x5d   : > { %329 = vst [vmem:[%s2761_s27 + $0x260] sm:$0xff] %v328_v12 }
  0x5e   : > { %331 = vst [vmem:[%s2761_s27 + $0x268] sm:$0xff] %v330_v13 }
  0x5f   : > { %333 = vst [vmem:[%s2761_s27 + $0x270] sm:$0xff] %v332_v14 }
  0x60   : > { %335 = vst [vmem:[%s2761_s27 + $0x278] sm:$0xff] %v334_v15 }
  0x61   : > { %337 = vst [vmem:[%s2761_s27 + $0x280] sm:$0xff] %v336_v16 }
  0x62   : > { %339 = vst [vmem:[%s2761_s27 + $0x288] sm:$0xff] %v338_v17 }
  0x63   : > { %341 = vst [vmem:[%s2761_s27 + $0x290] sm:$0xff] %v340_v18 }
  0x64   : > { %343 = vst [vmem:[%s2761_s27 + $0x298] sm:$0xff] %v342_v19 }
  0x65   : > { %345 = vst [vmem:[%s2761_s27 + $0x2a0] sm:$0xff] %v344_v20 }
  0x66   : > { %347 = vst [vmem:[%s2761_s27 + $0x2a8] sm:$0xff] %v346_v21 }
  0x67   : > { %349 = vst [vmem:[%s2761_s27 + $0x2b0] sm:$0xff] %v348_v22 }
  0x68   : > { %351 = vst [vmem:[%s2761_s27 + $0x2b8] sm:$0xff] %v350_v23 }
  0x69   : > { %353 = vst [vmem:[%s2761_s27 + $0x2c0] sm:$0xff] %v352_v24 }
  0x6a   : > { %355 = vst [vmem:[%s2761_s27 + $0x2c8] sm:$0xff] %v354_v25 }
  0x6b   : > { %357 = vst [vmem:[%s2761_s27 + $0x2d0] sm:$0xff] %v356_v26 }
  0x6c   : > { %359 = vst [vmem:[%s2761_s27 + $0x2d8] sm:$0xff] %v358_v27 }
  0x6d   : > { %361 = vst [vmem:[%s2761_s27 + $0x2e0] sm:$0xff] %v360_v28 }
  0x6e   : > { %363 = vst [vmem:[%s2761_s27 + $0x2e8] sm:$0xff] %v362_v29 }
  0x6f   : > { %365 = vst [vmem:[%s2761_s27 + $0x2f0] sm:$0xff] %v364_v30 }
  0x70   : > { %367 = vst [vmem:[%s2761_s27 + $0x2f8] sm:$0xff] %v366_v31 }
  0x71 PF: > { %p1838_p6 = scmp.ge.s32.totalorder %s2690_s16, 1  ;;  %p382_p7 = scmp.lt.s32.totalorder %s2690_s16, 3 }
  0x73   : > { %p383_p8 = pnand %p1838_p6, %p382_p7 }
  0x74   : > { %s389_s28 = sand.u32 (!%p383_p8), 1, %s2674_s12   ;;  %s433_s29 = smul.u32 (!%p383_p8), 48, %s2682_s14 }
  0x75   : > { %386 = sbr.rel (%p383_p8) target bundleno = 536 (0x218), region = 51  ;;  %p1841_p10 = scmp.ne.s32.totalorder (!%p383_p8), %s2682_s14, 0 }
  0x76   : > { %s2586_s30 = smul.u32 (!%p383_p8), 768, %s389_s28  ;;  %p434_p9 = scmp.lt.s32.totalorder (!%p383_p8), %s433_s29, 95 }
  0x78   : > { %s2961_s8 = scalar_lea.vmem (!%p383_p8), [#allocation3], %s2586_s30 }
  0x7a   : > { %s3470_s29 = smov (!%p434_p9, %s433_s29), 95  ;;  %450 = sbr.rel (%p1841_p10) target bundleno = 132 (0x84), region = 59 }
  0x7b   : > { %s2438_s4 = sshll.u32 %s3470_s29, 3 }
  0x7c   : > { %s2959_s7 = scalar_lea.vmem %s3449_s2, %s2438_s4 }
  0x7f   : > { %v2692_v32 = vmov 0.0  }
  0x80   : > { %451 = vst [vmem:[#allocation2 + $0x10] sm:$0xff] %v2692_v32 }
  0x81   : > { %452 = vst [vmem:[#allocation2] sm:$0xff] %v2692_v32 }
  0x82   : > { %453 = vst [vmem:[#allocation2 + $0x18] sm:$0xff] %v2692_v32 }
  0x83   : > { %454 = vst [vmem:[#allocation2 + $0x8] sm:$0xff] %v2692_v32 }
  0x84 PF: > { %v2020_v33 = vld [vmem:[%s2961_s8 + $0x150] sm:$0xf]  ;;  %v2486_v34 = vld [vmem:[%s2961_s8 + $0x164] sm:$0xf0]  ;;  %v2483_v38 = vld [vmem:[%s2961_s8 + $0x154] sm:$0xf] }
  0x85   : > { %v2212_v35 = vld [vmem:[%s2961_s8 + $0x2d0] sm:$0xf]  ;;  %v2021_v36 = vor.u32 %v2486_v34, %v2020_v33  ;;  %v2534_v37 = vld [vmem:[%s2961_s8 + $0x2e4] sm:$0xf0]  ;;  %v2022_v39 = vld [vmem:[%s2961_s8 + $0x168] sm:$0xf0] }
  0x86   : > { %v2213_v40 = vor.u32 %v2534_v37, %v2212_v35  ;;  %v2025_v41 = vor.u32 %v2483_v38, %v2022_v39  ;;  %v2531_v42 = vld [vmem:[%s2961_s8 + $0x2d4] sm:$0xf]  ;;  %v2214_v43 = vld [vmem:[%s2961_s8 + $0x2e8] sm:$0xf0]  ;;  %v1996_v44 = vld [vmem:[%s2961_s8 + $0x120] sm:$0xf] }
  0x87   : > { %1043 = vmatpush.bf16.msra.mxu0 %v2021_v36  ;;  %v2217_v45 = vor.u32 %v2531_v42, %v2214_v43  ;;  %v2480_v46 = vld [vmem:[%s2961_s8 + $0x134] sm:$0xf0]  ;;  %v2188_v47 = vld [vmem:[%s2961_s8 + $0x2a0] sm:$0xf]  ;;  %v2477_v51 = vld [vmem:[%s2961_s8 + $0x124] sm:$0xf] }
  0x88   : > { %v2528_v48 = vld [vmem:[%s2961_s8 + $0x2b4] sm:$0xf0]  ;;  %1057 = vmatpush.bf16.msra.mxu1 %v2213_v40  ;;  %1071 = vmatpush.bf16.msra.mxu2 %v2025_v41  ;;  %v1997_v49 = vor.u32 %v2480_v46, %v1996_v44  ;;  %v1998_v52 = vld [vmem:[%s2961_s8 + $0x138] sm:$0xf0]  ;;  %v2525_v53 = vld [vmem:[%s2961_s8 + $0x2a4] sm:$0xf] }
  0x89   : > { %v2189_v50 = vor.u32 %v2528_v48, %v2188_v47  ;;  %1085 = vmatpush.bf16.msra.mxu3 %v2217_v45  ;;  %v2001_v54 = vor.u32 %v2477_v51, %v1998_v52  ;;  %v2190_v55 = vld [vmem:[%s2961_s8 + $0x2b8] sm:$0xf0]  ;;  %v1972_v56 = vld [vmem:[%s2961_s8 + $0xf0] sm:$0xf]  ;;  %v2474_v57 = vld [vmem:[%s2961_s8 + $0x104] sm:$0xf0] }
  0x8a   : > { %v2193_v58 = vor.u32 %v2525_v53, %v2190_v55  ;;  %v2164_v59 = vld [vmem:[%s2961_s8 + $0x270] sm:$0xf]  ;;  %v2522_v60 = vld [vmem:[%s2961_s8 + $0x284] sm:$0xf0]  ;;  %v2471_v61 = vld [vmem:[%s2961_s8 + $0xf4] sm:$0xf]  ;;  %v1973_v62 = vor.u32 %v2474_v57, %v1972_v56 }
  0x8b   : > { %1044 = vmatpush.bf16.msra.mxu0 %v1997_v49  ;;  %v1974_v63 = vld [vmem:[%s2961_s8 + $0x108] sm:$0xf0]  ;;  %v2519_v0 = vld [vmem:[%s2961_s8 + $0x274] sm:$0xf]  ;;  %v2165_v2 = vor.u32 %v2522_v60, %v2164_v59  ;;  %v1948_v4 = vld [vmem:[%s2961_s8 + $0xc0] sm:$0xf] }
  0x8c   : > { %v2166_v1 = vld [vmem:[%s2961_s8 + $0x288] sm:$0xf0]  ;;  %1058 = vmatpush.bf16.msra.mxu1 %v2189_v50  ;;  %1072 = vmatpush.bf16.msra.mxu2 %v2001_v54  ;;  %v1977_v3 = vor.u32 %v2471_v61, %v1974_v63  ;;  %v2468_v5 = vld [vmem:[%s2961_s8 + $0xd4] sm:$0xf0]  ;;  %v2140_v6 = vld [vmem:[%s2961_s8 + $0x240] sm:$0xf] }
  0x8d   : > { %1086 = vmatpush.bf16.msra.mxu3 %v2193_v58  ;;  %v2169_v7 = vor.u32 %v2519_v0, %v2166_v1  ;;  %v2516_v8 = vld [vmem:[%s2961_s8 + $0x254] sm:$0xf0]  ;;  %v2465_v9 = vld [vmem:[%s2961_s8 + $0xc4] sm:$0xf]  ;;  %v1950_v10 = vld [vmem:[%s2961_s8 + $0xd8] sm:$0xf0]  ;;  %v1949_v13 = vor.u32 %v2468_v5, %v1948_v4 }
  0x8e   : > { %v2513_v11 = vld [vmem:[%s2961_s8 + $0x244] sm:$0xf]  ;;  %v2142_v12 = vld [vmem:[%s2961_s8 + $0x258] sm:$0xf0]  ;;  %v2141_v14 = vor.u32 %v2516_v8, %v2140_v6  ;;  %v1953_v15 = vor.u32 %v2465_v9, %v1950_v10  ;;  %v1924_v16 = vld [vmem:[%s2961_s8 + $0x90] sm:$0xf] }
  0x8f   : > { %1045 = vmatpush.bf16.msra.mxu0 %v1973_v62  ;;  %v2462_v17 = vld [vmem:[%s2961_s8 + $0xa4] sm:$0xf0]  ;;  %v2116_v18 = vld [vmem:[%s2961_s8 + $0x210] sm:$0xf]  ;;  %v2145_v19 = vor.u32 %v2513_v11, %v2142_v12  ;;  %v2459_v21 = vld [vmem:[%s2961_s8 + $0x94] sm:$0xf] }
  0x90   : > { %1059 = vmatpush.bf16.msra.mxu1 %v2165_v2  ;;  %1073 = vmatpush.bf16.msra.mxu2 %v1977_v3  ;;  %v2510_v20 = vld [vmem:[%s2961_s8 + $0x224] sm:$0xf0]  ;;  %v1926_v22 = vld [vmem:[%s2961_s8 + $0xa8] sm:$0xf0]  ;;  %v2507_v23 = vld [vmem:[%s2961_s8 + $0x214] sm:$0xf]  ;;  %v1925_v25 = vor.u32 %v2462_v17, %v1924_v16 }
  0x91   : > { %1087 = vmatpush.bf16.msra.mxu3 %v2169_v7  ;;  %v2118_v24 = vld [vmem:[%s2961_s8 + $0x228] sm:$0xf0]  ;;  %v2117_v26 = vor.u32 %v2510_v20, %v2116_v18  ;;  %v1929_v27 = vor.u32 %v2459_v21, %v1926_v22  ;;  %v1900_v28 = vld [vmem:[%s2961_s8 + $0x60] sm:$0xf]  ;;  %v2456_v29 = vld [vmem:[%s2961_s8 + $0x74] sm:$0xf0] }
  0x92   : > { %v2092_v30 = vld [vmem:[%s2961_s8 + $0x1e0] sm:$0xf]  ;;  %v2121_v31 = vor.u32 %v2507_v23, %v2118_v24  ;;  %v2504_v32 = vld [vmem:[%s2961_s8 + $0x1f4] sm:$0xf0]  ;;  %v2453_v33 = vld [vmem:[%s2961_s8 + $0x64] sm:$0xf]  ;;  %v1901_v37 = vor.u32 %v2456_v29, %v1900_v28 }
  0x93   : > { %1046 = vmatpush.bf16.msra.mxu0 %v1949_v13  ;;  %v1902_v34 = vld [vmem:[%s2961_s8 + $0x78] sm:$0xf0]  ;;  %v2501_v35 = vld [vmem:[%s2961_s8 + $0x1e4] sm:$0xf]  ;;  %v2093_v38 = vor.u32 %v2504_v32, %v2092_v30  ;;  %v1876_v40 = vld [vmem:[%s2961_s8 + $0x30] sm:$0xf] }
  0x94   : > { %1060 = vmatpush.bf16.msra.mxu1 %v2141_v14  ;;  %1074 = vmatpush.bf16.msra.mxu2 %v1953_v15  ;;  %v2094_v36 = vld [vmem:[%s2961_s8 + $0x1f8] sm:$0xf0]  ;;  %v1905_v39 = vor.u32 %v2453_v33, %v1902_v34  ;;  %v2450_v41 = vld [vmem:[%s2961_s8 + $0x44] sm:$0xf0]  ;;  %v2068_v42 = vld [vmem:[%s2961_s8 + $0x1b0] sm:$0xf] }
  0x95   : > { %1088 = vmatpush.bf16.msra.mxu3 %v2145_v19  ;;  %v2097_v43 = vor.u32 %v2501_v35, %v2094_v36  ;;  %v2498_v44 = vld [vmem:[%s2961_s8 + $0x1c4] sm:$0xf0]  ;;  %v2447_v45 = vld [vmem:[%s2961_s8 + $0x34] sm:$0xf]  ;;  %v1878_v46 = vld [vmem:[%s2961_s8 + $0x48] sm:$0xf0]  ;;  %v1877_v49 = vor.u32 %v2450_v41, %v1876_v40 }
  0x96   : > { %v2495_v47 = vld [vmem:[%s2961_s8 + $0x1b4] sm:$0xf]  ;;  %v2070_v48 = vld [vmem:[%s2961_s8 + $0x1c8] sm:$0xf0]  ;;  %v1852_v50 = vld [vmem:[%s2961_s8] sm:$0xf]  ;;  %v2069_v53 = vor.u32 %v2498_v44, %v2068_v42  ;;  %v1881_v54 = vor.u32 %v2447_v45, %v1878_v46 }
  0x97   : > { %1047 = vmatpush.bf16.msra.mxu0 %v1925_v25  ;;  %v2444_v51 = vld [vmem:[%s2961_s8 + $0x14] sm:$0xf0]  ;;  %v2044_v52 = vld [vmem:[%s2961_s8 + $0x180] sm:$0xf]  ;;  %v2441_v56 = vld [vmem:[%s2961_s8 + $0x4] sm:$0xf]  ;;  %v2073_v58 = vor.u32 %v2495_v47, %v2070_v48 }
  0x98   : > { %1061 = vmatpush.bf16.msra.mxu1 %v2117_v26  ;;  %1075 = vmatpush.bf16.msra.mxu2 %v1929_v27  ;;  %v2492_v55 = vld [vmem:[%s2961_s8 + $0x194] sm:$0xf0]  ;;  %v1854_v57 = vld [vmem:[%s2961_s8 + $0x18] sm:$0xf0]  ;;  %v2489_v59 = vld [vmem:[%s2961_s8 + $0x184] sm:$0xf]  ;;  %v1853_v1 = vor.u32 %v2444_v51, %v1852_v50 }
  0x99   : > { %1089 = vmatpush.bf16.msra.mxu3 %v2121_v31  ;;  %v2046_v60 = vld [vmem:[%s2961_s8 + $0x198] sm:$0xf0]  ;;  %v2028_v61 = vld [vmem:[%s2961_s8 + $0x158] sm:$0xf]  ;;  %v2487_v62 = vld [vmem:[%s2961_s8 + $0x16c] sm:$0xf0]  ;;  %v2045_v5 = vor.u32 %v2492_v55, %v2044_v52  ;;  %v1857_v6 = vor.u32 %v2441_v56, %v1854_v57 }
  0x9a   : > { %v2220_v63 = vld [vmem:[%s2961_s8 + $0x2d8] sm:$0xf]  ;;  %v2535_v0 = vld [vmem:[%s2961_s8 + $0x2ec] sm:$0xf0]  ;;  %v2484_v2 = vld [vmem:[%s2961_s8 + $0x15c] sm:$0xf]  ;;  %v2049_v10 = vor.u32 %v2489_v59, %v2046_v60  ;;  %v2029_v11 = vor.u32 %v2487_v62, %v2028_v61 }
  0x9b   : > { %1048 = vmatpush.bf16.msra.mxu0 %v1901_v37  ;;  %v2030_v3 = vld [vmem:[%s2961_s8 + $0x170] sm:$0xf0]  ;;  %v2532_v4 = vld [vmem:[%s2961_s8 + $0x2dc] sm:$0xf]  ;;  %v1844_v8 = vld [vmem:[%s3447_s0] sm:$0xf]  ;;  %v2221_v14 = vor.u32 %v2535_v0, %v2220_v63 }
  0x9c   : > { %1062 = vmatpush.bf16.msra.mxu1 %v2093_v38  ;;  %1076 = vmatpush.bf16.msra.mxu2 %v1905_v39  ;;  %v2222_v7 = vld [vmem:[%s2961_s8 + $0x2f0] sm:$0xf0]  ;;  %v2440_v9 = vld [vmem:[%s3447_s0 + $0x4] sm:$0xf0]  ;;  %v2439_v12 = vld [vmem:[%s3447_s0 + $0x4] sm:$0xf]  ;;  %v2033_v15 = vor.u32 %v2484_v2, %v2030_v3 }
  0x9d   : > { %1090 = vmatpush.bf16.msra.mxu3 %v2097_v43  ;;  %v1846_v13 = vld [vmem:[%s3447_s0 + $0x8] sm:$0xf0]  ;;  %v2004_v16 = vld [vmem:[%s2961_s8 + $0x128] sm:$0xf]  ;;  %v2481_v17 = vld [vmem:[%s2961_s8 + $0x13c] sm:$0xf0]  ;;  %v2225_v19 = vor.u32 %v2532_v4, %v2222_v7  ;;  %v3051_v20 = vor.u32 %v2440_v9, %v1844_v8 }
  0x9e   : > { %v2196_v18 = vld [vmem:[%s2961_s8 + $0x2a8] sm:$0xf]  ;;  %v2529_v21 = vld [vmem:[%s2961_s8 + $0x2bc] sm:$0xf0]  ;;  %v2478_v22 = vld [vmem:[%s2961_s8 + $0x12c] sm:$0xf]  ;;  %v3056_v24 = vor.u32 %v2439_v12, %v1846_v13  ;;  %v2005_v27 = vor.u32 %v2481_v17, %v2004_v16 }
  0x9f   : > { %1049 = vmatpush.bf16.msra.mxu0 %v1877_v49  ;;  %v2006_v23 = vld [vmem:[%s2961_s8 + $0x140] sm:$0xf0]  ;;  %v2526_v25 = vld [vmem:[%s2961_s8 + $0x2ac] sm:$0xf]  ;;  %v2197_v28 = vor.u32 %v2529_v21, %v2196_v18  ;;  %v1980_v30 = vld [vmem:[%s2961_s8 + $0xf8] sm:$0xf] }
  0xa0   : > { %1063 = vmatpush.bf16.msra.mxu1 %v2069_v53  ;;  %1077 = vmatpush.bf16.msra.mxu2 %v1881_v54  ;;  %v2198_v26 = vld [vmem:[%s2961_s8 + $0x2c0] sm:$0xf0]  ;;  %v2009_v29 = vor.u32 %v2478_v22, %v2006_v23  ;;  %v2475_v31 = vld [vmem:[%s2961_s8 + $0x10c] sm:$0xf0]  ;;  %v2172_v32 = vld [vmem:[%s2961_s8 + $0x278] sm:$0xf] }
  0xa1   : > { %1091 = vmatpush.bf16.msra.mxu3 %v2073_v58  ;;  %v2201_v33 = vor.u32 %v2526_v25, %v2198_v26  ;;  %v2523_v34 = vld [vmem:[%s2961_s8 + $0x28c] sm:$0xf0]  ;;  %v2472_v35 = vld [vmem:[%s2961_s8 + $0xfc] sm:$0xf]  ;;  %v1982_v36 = vld [vmem:[%s2961_s8 + $0x110] sm:$0xf0]  ;;  %v1981_v39 = vor.u32 %v2475_v31, %v1980_v30 }
  0xa2   : > { %v2520_v37 = vld [vmem:[%s2961_s8 + $0x27c] sm:$0xf]  ;;  %v2174_v38 = vld [vmem:[%s2961_s8 + $0x290] sm:$0xf0]  ;;  %v2173_v40 = vor.u32 %v2523_v34, %v2172_v32  ;;  %v1985_v41 = vor.u32 %v2472_v35, %v1982_v36  ;;  %v1956_v42 = vld [vmem:[%s2961_s8 + $0xc8] sm:$0xf] }
  0xa3   : > { %1050 = vmatpush.bf16.msra.mxu0 %v1853_v1  ;;  %v2469_v43 = vld [vmem:[%s2961_s8 + $0xdc] sm:$0xf0]  ;;  %v2148_v44 = vld [vmem:[%s2961_s8 + $0x248] sm:$0xf]  ;;  %v2177_v45 = vor.u32 %v2520_v37, %v2174_v38  ;;  %v2466_v47 = vld [vmem:[%s2961_s8 + $0xcc] sm:$0xf] }
  0xa4   : > { %1064 = vmatpush.bf16.msra.mxu1 %v2045_v5  ;;  %1078 = vmatpush.bf16.msra.mxu2 %v1857_v6  ;;  %v2517_v46 = vld [vmem:[%s2961_s8 + $0x25c] sm:$0xf0]  ;;  %v1958_v48 = vld [vmem:[%s2961_s8 + $0xe0] sm:$0xf0]  ;;  %v2514_v49 = vld [vmem:[%s2961_s8 + $0x24c] sm:$0xf]  ;;  %v1957_v51 = vor.u32 %v2469_v43, %v1956_v42 }
  0xa5   : > { %1092 = vmatpush.bf16.msra.mxu3 %v2049_v10  ;;  %v2150_v50 = vld [vmem:[%s2961_s8 + $0x260] sm:$0xf0]  ;;  %v2149_v52 = vor.u32 %v2517_v46, %v2148_v44  ;;  %v1961_v53 = vor.u32 %v2466_v47, %v1958_v48  ;;  %v1932_v54 = vld [vmem:[%s2961_s8 + $0x98] sm:$0xf]  ;;  %v2463_v55 = vld [vmem:[%s2961_s8 + $0xac] sm:$0xf0] }
  0xa6   : > { %1051 = vmatmul.bf16.vlgmr.msra.gmra.mxu0 %v3051_v20  ;;  %v2124_v56 = vld [vmem:[%s2961_s8 + $0x218] sm:$0xf]  ;;  %v2153_v57 = vor.u32 %v2514_v49, %v2150_v50  ;;  %v2511_v58 = vld [vmem:[%s2961_s8 + $0x22c] sm:$0xf0]  ;;  %v2460_v59 = vld [vmem:[%s2961_s8 + $0x9c] sm:$0xf]  ;;  %v1933_v63 = vor.u32 %v2463_v55, %v1932_v54 }
  0xa7   : > { %1099 = vmatpush.bf16.msrb.mxu0 %v2029_v11  ;;  %1065 = vmatmul.bf16.vlgmr.msra.gmra.mxu1 %v3056_v24  ;;  %v1934_v60 = vld [vmem:[%s2961_s8 + $0xb0] sm:$0xf0]  ;;  %v2508_v61 = vld [vmem:[%s2961_s8 + $0x21c] sm:$0xf]  ;;  %v2125_v0 = vor.u32 %v2511_v58, %v2124_v56  ;;  %v1908_v2 = vld [vmem:[%s2961_s8 + $0x68] sm:$0xf] }
  0xa8   : > { %1113 = vmatpush.bf16.msrb.mxu1 %v2221_v14  ;;  %1127 = vmatpush.bf16.msrb.mxu2 %v2033_v15  ;;  %v2126_v62 = vld [vmem:[%s2961_s8 + $0x230] sm:$0xf0]  ;;  %v1937_v1 = vor.u32 %v2460_v59, %v1934_v60  ;;  %v2457_v3 = vld [vmem:[%s2961_s8 + $0x7c] sm:$0xf0]  ;;  %v2100_v4 = vld [vmem:[%s2961_s8 + $0x1e8] sm:$0xf] }
  0xa9   : > { %1141 = vmatpush.bf16.msrb.mxu3 %v2225_v19  ;;  %1079 = vmatmul.bf16.vlgmr.msra.gmra.mxu2 %v3051_v20  ;;  %v2129_v5 = vor.u32 %v2508_v61, %v2126_v62  ;;  %v2505_v6 = vld [vmem:[%s2961_s8 + $0x1fc] sm:$0xf0]  ;;  %v2454_v7 = vld [vmem:[%s2961_s8 + $0x6c] sm:$0xf]  ;;  %v1910_v8 = vld [vmem:[%s2961_s8 + $0x80] sm:$0xf0]  ;;  %v1909_v11 = vor.u32 %v2457_v3, %v1908_v2 }
  0xaa   : > { %1093 = vmatmul.bf16.vlgmr.msra.gmra.mxu3 %v3056_v24  ;;  %v2502_v9 = vld [vmem:[%s2961_s8 + $0x1ec] sm:$0xf]  ;;  %v2102_v10 = vld [vmem:[%s2961_s8 + $0x200] sm:$0xf0]  ;;  %v2101_v12 = vor.u32 %v2505_v6, %v2100_v4  ;;  %v1913_v13 = vor.u32 %v2454_v7, %v1910_v8  ;;  %v1884_v14 = vld [vmem:[%s2961_s8 + $0x38] sm:$0xf] }
  0xab   : > { %1100 = vmatpush.bf16.msrb.mxu0 %v2005_v27  ;;  %v2451_v15 = vld [vmem:[%s2961_s8 + $0x4c] sm:$0xf0]  ;;  %v2076_v16 = vld [vmem:[%s2961_s8 + $0x1b8] sm:$0xf]  ;;  %v2105_v17 = vor.u32 %v2502_v9, %v2102_v10  ;;  %v2448_v19 = vld [vmem:[%s2961_s8 + $0x3c] sm:$0xf] }
  0xac   : > { %1114 = vmatpush.bf16.msrb.mxu1 %v2197_v28  ;;  %1128 = vmatpush.bf16.msrb.mxu2 %v2009_v29  ;;  %v2499_v18 = vld [vmem:[%s2961_s8 + $0x1cc] sm:$0xf0]  ;;  %v1886_v21 = vld [vmem:[%s2961_s8 + $0x50] sm:$0xf0]  ;;  %v2496_v22 = vld [vmem:[%s2961_s8 + $0x1bc] sm:$0xf]  ;;  %v1885_v25 = vor.u32 %v2451_v15, %v1884_v14 }
  0xad   : > { %1142 = vmatpush.bf16.msrb.mxu3 %v2201_v33  ;;  %v2078_v23 = vld [vmem:[%s2961_s8 + $0x1d0] sm:$0xf0]  ;;  %v1860_v26 = vld [vmem:[%s2961_s8 + $0x8] sm:$0xf]  ;;  %v2445_v27 = vld [vmem:[%s2961_s8 + $0x1c] sm:$0xf0]  ;;  %v2077_v28 = vor.u32 %v2499_v18, %v2076_v16  ;;  %v1889_v29 = vor.u32 %v2448_v19, %v1886_v21 }
  0xae   : > { %v2052_v30 = vld [vmem:[%s2961_s8 + $0x188] sm:$0xf]  ;;  %v2493_v31 = vld [vmem:[%s2961_s8 + $0x19c] sm:$0xf0]  ;;  %v2442_v32 = vld [vmem:[%s2961_s8 + $0xc] sm:$0xf]  ;;  %v2081_v33 = vor.u32 %v2496_v22, %v2078_v23 }
  0xaf   : > { %1101 = vmatpush.bf16.msrb.mxu0 %v1981_v39  ;;  %v1862_v34 = vld [vmem:[%s2961_s8 + $0x20] sm:$0xf0]  ;;  %v2490_v35 = vld [vmem:[%s2961_s8 + $0x18c] sm:$0xf]  ;;  %v2036_v37 = vld [vmem:[%s2961_s8 + $0x160] sm:$0xf]  ;;  %v2053_v44 = vor.u32 %v2493_v31, %v2052_v30 }
  0xb0   : > { %1115 = vmatpush.bf16.msrb.mxu1 %v2173_v40  ;;  %1129 = vmatpush.bf16.msrb.mxu2 %v1985_v41  ;;  %v2054_v36 = vld [vmem:[%s2961_s8 + $0x1a0] sm:$0xf0]  ;;  %v2488_v38 = vld [vmem:[%s2961_s8 + $0x174] sm:$0xf0]  ;;  %v2228_v39 = vld [vmem:[%s2961_s8 + $0x2e0] sm:$0xf]  ;;  %v1861_v40 = vor.u32 %v2445_v27, %v1860_v26 }
  0xb1   : > { %1143 = vmatpush.bf16.msrb.mxu3 %v2177_v45  ;;  %v2536_v41 = vld [vmem:[%s2961_s8 + $0x2f4] sm:$0xf0]  ;;  %v2485_v42 = vld [vmem:[%s2961_s8 + $0x164] sm:$0xf]  ;;  %v2038_v43 = vld [vmem:[%s2961_s8 + $0x178] sm:$0xf0]  ;;  %v1865_v45 = vor.u32 %v2442_v32, %v1862_v34  ;;  %v2057_v48 = vor.u32 %v2490_v35, %v2054_v36  ;;  %v2037_v49 = vor.u32 %v2488_v38, %v2036_v37 }
  0xb2   : > { %v2533_v46 = vld [vmem:[%s2961_s8 + $0x2e4] sm:$0xf]  ;;  %v2230_v47 = vld [vmem:[%s2961_s8 + $0x2f8] sm:$0xf0]  ;;  %v2229_v50 = vor.u32 %v2536_v41, %v2228_v39  ;;  %v2204_v54 = vld [vmem:[%s2961_s8 + $0x2b0] sm:$0xf] }
  0xb3   : > { %1102 = vmatpush.bf16.msrb.mxu0 %v1957_v51  ;;  %v2041_v51 = vor.u32 %v2485_v42, %v2038_v43  ;;  %v2233_v55 = vor.u32 %v2533_v46, %v2230_v47  ;;  %v2530_v56 = vld [vmem:[%s2961_s8 + $0x2c4] sm:$0xf0]  ;;  %v2014_v58 = vld [vmem:[%s2961_s8 + $0x148] sm:$0xf0]  ;;  %v2527_v59 = vld [vmem:[%s2961_s8 + $0x2b4] sm:$0xf] }
  0xb4   : > { %1116 = vmatpush.bf16.msrb.mxu1 %v2149_v52  ;;  %1130 = vmatpush.bf16.msrb.mxu2 %v1961_v53  ;;  %v2012_v52 = vld [vmem:[%s2961_s8 + $0x130] sm:$0xf]  ;;  %v2482_v53 = vld [vmem:[%s2961_s8 + $0x144] sm:$0xf0]  ;;  %v2206_v60 = vld [vmem:[%s2961_s8 + $0x2c8] sm:$0xf0]  ;;  %v2205_v62 = vor.u32 %v2530_v56, %v2204_v54 }
  0xb5   : > { %1144 = vmatpush.bf16.msrb.mxu3 %v2153_v57  ;;  %v2479_v57 = vld [vmem:[%s2961_s8 + $0x134] sm:$0xf]  ;;  %v2013_v61 = vor.u32 %v2482_v53, %v2012_v52  ;;  %v2180_v2 = vld [vmem:[%s2961_s8 + $0x280] sm:$0xf]  ;;  %v2209_v3 = vor.u32 %v2527_v59, %v2206_v60  ;;  %v2524_v4 = vld [vmem:[%s2961_s8 + $0x294] sm:$0xf0] }
  0xb6   : > { %v1990_v6 = vld [vmem:[%s2961_s8 + $0x118] sm:$0xf0]  ;;  %v2521_v7 = vld [vmem:[%s2961_s8 + $0x284] sm:$0xf]  ;;  %v2181_v10 = vor.u32 %v2524_v4, %v2180_v2  ;;  %v2156_v14 = vld [vmem:[%s2961_s8 + $0x250] sm:$0xf] }
  0xb7   : > { %1103 = vmatpush.bf16.msrb.mxu0 %v1933_v63  ;;  %v2017_v63 = vor.u32 %v2479_v57, %v2014_v58  ;;  %v2182_v8 = vld [vmem:[%s2961_s8 + $0x298] sm:$0xf0]  ;;  %v2518_v16 = vld [vmem:[%s2961_s8 + $0x264] sm:$0xf0]  ;;  %v1966_v18 = vld [vmem:[%s2961_s8 + $0xe8] sm:$0xf0] }
  0xb8   : > { %1117 = vmatpush.bf16.msrb.mxu1 %v2125_v0  ;;  %1131 = vmatpush.bf16.msrb.mxu2 %v1937_v1  ;;  %v1988_v0 = vld [vmem:[%s2961_s8 + $0x100] sm:$0xf]  ;;  %v2476_v1 = vld [vmem:[%s2961_s8 + $0x114] sm:$0xf0]  ;;  %v2185_v15 = vor.u32 %v2521_v7, %v2182_v8  ;;  %v2515_v19 = vld [vmem:[%s2961_s8 + $0x254] sm:$0xf]  ;;  %v2157_v23 = vor.u32 %v2518_v16, %v2156_v14 }
  0xb9   : > { %1145 = vmatpush.bf16.msrb.mxu3 %v2129_v5  ;;  %v2473_v5 = vld [vmem:[%s2961_s8 + $0x104] sm:$0xf]  ;;  %v1989_v9 = vor.u32 %v2476_v1, %v1988_v0  ;;  %v2158_v21 = vld [vmem:[%s2961_s8 + $0x268] sm:$0xf0]  ;;  %v1940_v26 = vld [vmem:[%s2961_s8 + $0xa0] sm:$0xf] }
  0xba   : > { %v2464_v27 = vld [vmem:[%s2961_s8 + $0xb4] sm:$0xf0]  ;;  %v2461_v31 = vld [vmem:[%s2961_s8 + $0xa4] sm:$0xf]  ;;  %v1942_v32 = vld [vmem:[%s2961_s8 + $0xb8] sm:$0xf0] }
  0xbb   : > { %1104 = vmatpush.bf16.msrb.mxu0 %v1909_v11  ;;  %v1993_v11 = vor.u32 %v2473_v5, %v1990_v6  ;;  %v2512_v30 = vld [vmem:[%s2961_s8 + $0x234] sm:$0xf0]  ;;  %v2134_v34 = vld [vmem:[%s2961_s8 + $0x238] sm:$0xf0]  ;;  %v1941_v35 = vor.u32 %v2464_v27, %v1940_v26  ;;  %v1945_v37 = vor.u32 %v2461_v31, %v1942_v32  ;;  %v1916_v38 = vld [vmem:[%s2961_s8 + $0x70] sm:$0xf] }
  0xbc   : > { %1118 = vmatpush.bf16.msrb.mxu1 %v2101_v12  ;;  %1132 = vmatpush.bf16.msrb.mxu2 %v1913_v13  ;;  %v1964_v12 = vld [vmem:[%s2961_s8 + $0xd0] sm:$0xf]  ;;  %v2470_v13 = vld [vmem:[%s2961_s8 + $0xe4] sm:$0xf0]  ;;  %v2455_v43 = vld [vmem:[%s2961_s8 + $0x74] sm:$0xf] }
  0xbd   : > { %1146 = vmatpush.bf16.msrb.mxu3 %v2105_v17  ;;  %v2467_v17 = vld [vmem:[%s2961_s8 + $0xd4] sm:$0xf]  ;;  %v1965_v22 = vor.u32 %v2470_v13, %v1964_v12  ;;  %v2458_v39 = vld [vmem:[%s2961_s8 + $0x84] sm:$0xf0]  ;;  %v2110_v46 = vld [vmem:[%s2961_s8 + $0x208] sm:$0xf0] }
  0xbe   : > { %v2506_v42 = vld [vmem:[%s2961_s8 + $0x204] sm:$0xf0]  ;;  %v1917_v47 = vor.u32 %v2458_v39, %v1916_v38  ;;  %v2084_v52 = vld [vmem:[%s2961_s8 + $0x1c0] sm:$0xf]  ;;  %v2500_v54 = vld [vmem:[%s2961_s8 + $0x1d4] sm:$0xf0] }
  0xbf   : > { %1105 = vmatpush.bf16.msrb.mxu0 %v1885_v25  ;;  %v1969_v25 = vor.u32 %v2467_v17, %v1966_v18  ;;  %v1894_v56 = vld [vmem:[%s2961_s8 + $0x58] sm:$0xf0]  ;;  %v2497_v57 = vld [vmem:[%s2961_s8 + $0x1c4] sm:$0xf]  ;;  %v2085_v60 = vor.u32 %v2500_v54, %v2084_v52  ;;  %v2060_v0 = vld [vmem:[%s2961_s8 + $0x190] sm:$0xf] }
  0xc0   : > { %1119 = vmatpush.bf16.msrb.mxu1 %v2077_v28  ;;  %1133 = vmatpush.bf16.msrb.mxu2 %v1889_v29  ;;  %v2132_v28 = vld [vmem:[%s2961_s8 + $0x220] sm:$0xf]  ;;  %v2161_v29 = vor.u32 %v2515_v19, %v2158_v21  ;;  %v2086_v58 = vld [vmem:[%s2961_s8 + $0x1d8] sm:$0xf0]  ;;  %v2494_v2 = vld [vmem:[%s2961_s8 + $0x1a4] sm:$0xf0] }
  0xc1   : > { %1147 = vmatpush.bf16.msrb.mxu3 %v2081_v33  ;;  %v2509_v33 = vld [vmem:[%s2961_s8 + $0x224] sm:$0xf]  ;;  %v2133_v36 = vor.u32 %v2512_v30, %v2132_v28  ;;  %v2089_v1 = vor.u32 %v2497_v57, %v2086_v58  ;;  %v1870_v4 = vld [vmem:[%s2961_s8 + $0x28] sm:$0xf0]  ;;  %v2491_v5 = vld [vmem:[%s2961_s8 + $0x194] sm:$0xf]  ;;  %v2061_v8 = vor.u32 %v2494_v2, %v2060_v0 }
  0xc2   : > { %v2137_v41 = vor.u32 %v2509_v33, %v2134_v34  ;;  %v2062_v6 = vld [vmem:[%s2961_s8 + $0x1a8] sm:$0xf0]  ;;  %v2552_v12 = vld [vmem:[%s2959_s7 + $0x74] sm:$0xf0]  ;;  %v2290_v14 = vld [vmem:[%s2959_s7 + $0x60] sm:$0xf] }
  0xc3   : > { %1106 = vmatpush.bf16.msrb.mxu0 %v1861_v40  ;;  %v2108_v40 = vld [vmem:[%s2961_s8 + $0x1f0] sm:$0xf]  ;;  %v2551_v17 = vld [vmem:[%s2959_s7 + $0x74] sm:$0xf]  ;;  %v2300_v18 = vld [vmem:[%s2959_s7 + $0x78] sm:$0xf0] }
  0xc4   : > { %1120 = vmatpush.bf16.msrb.mxu1 %v2053_v44  ;;  %1134 = vmatpush.bf16.msrb.mxu2 %v1865_v45  ;;  %v1918_v44 = vld [vmem:[%s2961_s8 + $0x88] sm:$0xf0]  ;;  %v2503_v45 = vld [vmem:[%s2961_s8 + $0x1f4] sm:$0xf]  ;;  %v2303_v19 = vor.u32 %v2551_v17, %v2300_v18  ;;  %v2274_v26 = vld [vmem:[%s2959_s7 + $0x40] sm:$0xf] }
  0xc5   : > { %1148 = vmatpush.bf16.msrb.mxu3 %v2057_v48  ;;  %v2109_v48 = vor.u32 %v2506_v42, %v2108_v40  ;;  %v2113_v53 = vor.u32 %v2503_v45, %v2110_v46  ;;  %v2546_v27 = vld [vmem:[%s2959_s7 + $0x44] sm:$0xf0]  ;;  %v2284_v30 = vld [vmem:[%s2959_s7 + $0x58] sm:$0xf0]  ;;  %v2266_v32 = vld [vmem:[%s2959_s7 + $0x30] sm:$0xf] }
  0xc6   : > { %1107 = vmatmul.bf16.vlgmr.msrb.gmra.mxu0 %v3051_v20  ;;  %v2275_v28 = vor.u32 %v2546_v27, %v2274_v26  ;;  %v2544_v33 = vld [vmem:[%s2959_s7 + $0x34] sm:$0xf0]  ;;  %v2362_v34 = vld [vmem:[%s2959_s7 + $0xf0] sm:$0xf]  ;;  %v2545_v38 = vld [vmem:[%s2959_s7 + $0x44] sm:$0xf] }
  0xc7   : > { %1155 = vmatpush.bf16.msra.mxu0 %v2037_v49  ;;  %1121 = vmatmul.bf16.vlgmr.msrb.gmra.mxu1 %v3056_v24  ;;  %v1921_v49 = vor.u32 %v2455_v43, %v1918_v44  ;;  %v2276_v39 = vld [vmem:[%s2959_s7 + $0x48] sm:$0xf0]  ;;  %v2258_v43 = vld [vmem:[%s2959_s7 + $0x20] sm:$0xf]  ;;  %v2542_v44 = vld [vmem:[%s2959_s7 + $0x24] sm:$0xf0] }
  0xc8   : > { %1169 = vmatpush.bf16.msra.mxu1 %v2229_v50  ;;  %1183 = vmatpush.bf16.msra.mxu2 %v2041_v51  ;;  %v1892_v50 = vld [vmem:[%s2961_s8 + $0x40] sm:$0xf]  ;;  %v2452_v51 = vld [vmem:[%s2961_s8 + $0x54] sm:$0xf0]  ;;  %v2250_v54 = vld [vmem:[%s2959_s7 + $0x10] sm:$0xf] }
  0xc9   : > { %1197 = vmatpush.bf16.msra.mxu3 %v2233_v55  ;;  %1135 = vmatmul.bf16.vlgmr.msrb.gmra.mxu2 %v3051_v20  ;;  %v2449_v55 = vld [vmem:[%s2961_s8 + $0x44] sm:$0xf]  ;;  %v1893_v59 = vor.u32 %v2452_v51, %v1892_v50  ;;  %v2354_v45 = vld [vmem:[%s2959_s7 + $0xe0] sm:$0xf]  ;;  %v2543_v50 = vld [vmem:[%s2959_s7 + $0x34] sm:$0xf] }
  0xca   : > { %1149 = vmatmul.bf16.vlgmr.msrb.gmra.mxu3 %v3056_v24  ;;  %v2268_v51 = vld [vmem:[%s2959_s7 + $0x38] sm:$0xf0]  ;;  %v2564_v58 = vld [vmem:[%s2959_s7 + $0xd4] sm:$0xf0]  ;;  %v2537_v26 = vld [vmem:[%s2959_s7 + $0x4] sm:$0xf] }
  0xcb   : > { %1156 = vmatpush.bf16.msra.mxu0 %v2013_v61  ;;  %v1897_v61 = vor.u32 %v2449_v55, %v1894_v56  ;;  %v2540_v55 = vld [vmem:[%s2959_s7 + $0x14] sm:$0xf0]  ;;  %v2346_v56 = vld [vmem:[%s2959_s7 + $0xd0] sm:$0xf]  ;;  %p2432_p11 = scmp.ne.s32.totalorder %s2682_s14, 1 }
  0xcc   : > { %1170 = vmatpush.bf16.msra.mxu1 %v2205_v62  ;;  %1184 = vmatpush.bf16.msra.mxu2 %v2017_v63  ;;  %v1868_v62 = vld [vmem:[%s2961_s8 + $0x10] sm:$0xf]  ;;  %v2446_v63 = vld [vmem:[%s2961_s8 + $0x24] sm:$0xf0]  ;;  %v2251_v57 = vor.u32 %v2540_v55, %v2250_v54 }
  0xcd   : > { %1198 = vmatpush.bf16.msra.mxu3 %v2209_v3  ;;  %v2443_v3 = vld [vmem:[%s2961_s8 + $0x14] sm:$0xf]  ;;  %v1869_v7 = vor.u32 %v2446_v63, %v1868_v62  ;;  %v2260_v62 = vld [vmem:[%s2959_s7 + $0x28] sm:$0xf0] }
  0xcf   : > { %1157 = vmatpush.bf16.msra.mxu0 %v1989_v9  ;;  %v1873_v9 = vor.u32 %v2443_v3, %v1870_v4  ;;  %v2242_v3 = vld [vmem:[%s2959_s7] sm:$0xf]  ;;  %v2538_v4 = vld [vmem:[%s2959_s7 + $0x4] sm:$0xf0] }
  0xd0   : > { %1171 = vmatpush.bf16.msra.mxu1 %v2181_v10  ;;  %1185 = vmatpush.bf16.msra.mxu2 %v1993_v11  ;;  %v2065_v10 = vor.u32 %v2491_v5, %v2062_v6  ;;  %v2298_v11 = vld [vmem:[%s2959_s7 + $0x70] sm:$0xf]  ;;  %v2338_v5 = vld [vmem:[%s2959_s7 + $0xc0] sm:$0xf] }
  0xd1   : > { %1199 = vmatpush.bf16.msra.mxu3 %v2185_v15  ;;  %v2299_v13 = vor.u32 %v2552_v12, %v2298_v11  ;;  %v2550_v15 = vld [vmem:[%s2959_s7 + $0x64] sm:$0xf0] }
  0xd2   : > { %v2291_v16 = vor.u32 %v2550_v15, %v2290_v14  ;;  %v2252_v14 = vld [vmem:[%s2959_s7 + $0x18] sm:$0xf0] }
  0xd3   : > { %1158 = vmatpush.bf16.msra.mxu0 %v1965_v22  ;;  %v2549_v22 = vld [vmem:[%s2959_s7 + $0x64] sm:$0xf] }
  0xd4   : > { %1172 = vmatpush.bf16.msra.mxu1 %v2157_v23  ;;  %1186 = vmatpush.bf16.msra.mxu2 %v1969_v25  ;;  %v2292_v23 = vld [vmem:[%s2959_s7 + $0x68] sm:$0xf0] }
  0xd5   : > { %1200 = vmatpush.bf16.msra.mxu3 %v2161_v29  ;;  %v2295_v25 = vor.u32 %v2549_v22, %v2292_v23  ;;  %v2547_v29 = vld [vmem:[%s2959_s7 + $0x54] sm:$0xf]  ;;  %v2565_v22 = vld [vmem:[%s2959_s7 + $0xe4] sm:$0xf]  ;;  %v2356_v23 = vld [vmem:[%s2959_s7 + $0xe8] sm:$0xf0] }
  0xd6   : > { %v2287_v31 = vor.u32 %v2547_v29, %v2284_v30  ;;  %v2244_v29 = vld [vmem:[%s2959_s7 + $0x8] sm:$0xf0]  ;;  %v2426_v30 = vld [vmem:[%s2959_s7 + $0x170] sm:$0xf] }
  0xd7   : > { %1159 = vmatpush.bf16.msra.mxu0 %v1941_v35  ;;  %v2267_v35 = vor.u32 %v2544_v33, %v2266_v32  ;;  %v2247_v33 = vor.u32 %v2537_v26, %v2244_v29 }
  0xd8   : > { %1173 = vmatpush.bf16.msra.mxu1 %v2133_v36  ;;  %1187 = vmatpush.bf16.msra.mxu2 %v1945_v37  ;;  %v2568_v36 = vld [vmem:[%s2959_s7 + $0xf4] sm:$0xf0] }
  0xd9   : > { %1201 = vmatpush.bf16.msra.mxu3 %v2137_v41  ;;  %v2363_v37 = vor.u32 %v2568_v36, %v2362_v34  ;;  %v2279_v41 = vor.u32 %v2545_v38, %v2276_v39  ;;  %v2322_v34 = vld [vmem:[%s2959_s7 + $0xa0] sm:$0xf]  ;;  %v2563_v39 = vld [vmem:[%s2959_s7 + $0xd4] sm:$0xf] }
  0xdb   : > { %1160 = vmatpush.bf16.msra.mxu0 %v1917_v47  ;;  %v2259_v47 = vor.u32 %v2542_v44, %v2258_v43  ;;  %v2418_v44 = vld [vmem:[%s2959_s7 + $0x160] sm:$0xf] }
  0xdc   : > { %1174 = vmatpush.bf16.msra.mxu1 %v2109_v48  ;;  %1188 = vmatpush.bf16.msra.mxu2 %v1921_v49  ;;  %v2566_v48 = vld [vmem:[%s2959_s7 + $0xe4] sm:$0xf0] }
  0xdd   : > { %1202 = vmatpush.bf16.msra.mxu3 %v2113_v53  ;;  %v2355_v49 = vor.u32 %v2566_v48, %v2354_v45  ;;  %v2271_v53 = vor.u32 %v2543_v50, %v2268_v51  ;;  %v2582_v45 = vld [vmem:[%s2959_s7 + $0x164] sm:$0xf0]  ;;  %v2314_v50 = vld [vmem:[%s2959_s7 + $0x90] sm:$0xf]  ;;  %v2556_v51 = vld [vmem:[%s2959_s7 + $0x94] sm:$0xf0] }
  0xde   : > { %v2315_v55 = vor.u32 %v2556_v51, %v2314_v50  ;;  %v2569_v50 = vld [vmem:[%s2959_s7 + $0x104] sm:$0xf] }
  0xdf   : > { %1161 = vmatpush.bf16.msra.mxu0 %v1893_v59 }
  0xe0   : > { %1175 = vmatpush.bf16.msra.mxu1 %v2085_v60  ;;  %1189 = vmatpush.bf16.msra.mxu2 %v1897_v61  ;;  %v2347_v60 = vor.u32 %v2564_v58, %v2346_v56  ;;  %v2541_v61 = vld [vmem:[%s2959_s7 + $0x24] sm:$0xf]  ;;  %v2410_v56 = vld [vmem:[%s2959_s7 + $0x150] sm:$0xf]  ;;  %v2580_v58 = vld [vmem:[%s2959_s7 + $0x154] sm:$0xf0] }
  0xe1   : > { %1203 = vmatpush.bf16.msra.mxu3 %v2089_v1  ;;  %v2263_v1 = vor.u32 %v2541_v61, %v2260_v62  ;;  %v2554_v61 = vld [vmem:[%s2959_s7 + $0x84] sm:$0xf0]  ;;  %v2559_v62 = vld [vmem:[%s2959_s7 + $0xb4] sm:$0xf] }
  0xe3   : > { %1162 = vmatpush.bf16.msra.mxu0 %v1869_v7  ;;  %v2243_v7 = vor.u32 %v2538_v4, %v2242_v3 }
  0xe4   : > { %1176 = vmatpush.bf16.msra.mxu1 %v2061_v8  ;;  %1190 = vmatpush.bf16.msra.mxu2 %v1873_v9  ;;  %v2562_v8 = vld [vmem:[%s2959_s7 + $0xc4] sm:$0xf0]  ;;  %v2567_v9 = vld [vmem:[%s2959_s7 + $0xf4] sm:$0xf] }
  0xe5   : > { %1204 = vmatpush.bf16.msra.mxu3 %v2065_v10  ;;  %v2364_v10 = vld [vmem:[%s2959_s7 + $0xf8] sm:$0xf0]  ;;  %v2339_v11 = vor.u32 %v2562_v8, %v2338_v5  ;;  %v2402_v8 = vld [vmem:[%s2959_s7 + $0x140] sm:$0xf] }
  0xe6   : > { %1163 = vmatmul.bf16.vlgmr.msra.gmra.mxu0 %v3051_v20  ;;  %v2367_v12 = vor.u32 %v2567_v9, %v2364_v10  ;;  %v2578_v9 = vld [vmem:[%s2959_s7 + $0x144] sm:$0xf0] }
  0xe7   : > { %1177 = vmatmul.bf16.vlgmr.msra.gmra.mxu1 %v3056_v24  ;;  %1191 = vmatmul.bf16.vlgmr.msra.gmra.mxu2 %v3051_v20  ;;  %v2282_v20 = vld [vmem:[%s2959_s7 + $0x50] sm:$0xf] }
  0xe8   : > { %1205 = vmatmul.bf16.vlgmr.msra.gmra.mxu3 %v3056_v24  ;;  %1632 = vmatpush.bf16.msrb.mxu0 %v2299_v13  ;;  %v2548_v24 = vld [vmem:[%s2959_s7 + $0x54] sm:$0xf0]  ;;  %v2539_v13 = vld [vmem:[%s2959_s7 + $0x14] sm:$0xf] }
  0xe9   : > { %1674 = vmatpush.bf16.msrb.mxu3 %v2303_v19  ;;  %v2283_v21 = vor.u32 %v2548_v24, %v2282_v20  ;;  %1646 = vmatpush.bf16.msrb.mxu1 %v2363_v37  ;;  %v2255_v17 = vor.u32 %v2539_v13, %v2252_v14  ;;  %v2330_v19 = vld [vmem:[%s2959_s7 + $0xb0] sm:$0xf]  ;;  %v2560_v20 = vld [vmem:[%s2959_s7 + $0xb4] sm:$0xf0]  ;;  %v2557_v14 = vld [vmem:[%s2959_s7 + $0xa4] sm:$0xf] }
  0xec   : > { %1633 = vmatpush.bf16.msrb.mxu0 %v2291_v16 }
  0xed   : > { %1675 = vmatpush.bf16.msrb.mxu3 %v2295_v25  ;;  %1647 = vmatpush.bf16.msrb.mxu1 %v2355_v49  ;;  %v2419_v49 = vor.u32 %v2582_v45, %v2418_v44  ;;  %v2386_v45 = vld [vmem:[%s2959_s7 + $0x120] sm:$0xf] }
  0xf0   : > { %1634 = vmatpush.bf16.msrb.mxu0 %v2283_v21  ;;  %v2331_v21 = vor.u32 %v2560_v20, %v2330_v19 }
  0xf1   : > { %1676 = vmatpush.bf16.msrb.mxu3 %v2287_v31  ;;  %1648 = vmatpush.bf16.msrb.mxu1 %v2347_v60  ;;  %v2584_v31 = vld [vmem:[%s2959_s7 + $0x174] sm:$0xf0]  ;;  %v2411_v60 = vor.u32 %v2580_v58, %v2410_v56  ;;  %v2553_v58 = vld [vmem:[%s2959_s7 + $0x84] sm:$0xf] }
  0xf2   : > { %v2427_v37 = vor.u32 %v2584_v31, %v2426_v30 }
  0xf4   : > { %1635 = vmatpush.bf16.msrb.mxu0 %v2275_v28  ;;  %v2359_v28 = vor.u32 %v2565_v22, %v2356_v23  ;;  %1660 = vmatpush.bf16.msrb.mxu2 %v2427_v37 }
  0xf5   : > { %1677 = vmatpush.bf16.msrb.mxu3 %v2279_v41  ;;  %1649 = vmatpush.bf16.msrb.mxu1 %v2339_v11  ;;  %v2403_v11 = vor.u32 %v2578_v9, %v2402_v8 }
  0xf8   : > { %1636 = vmatpush.bf16.msrb.mxu0 %v2267_v35  ;;  %v2558_v35 = vld [vmem:[%s2959_s7 + $0xa4] sm:$0xf0]  ;;  %1661 = vmatpush.bf16.msrb.mxu2 %v2419_v49 }
  0xf9   : > { %1678 = vmatpush.bf16.msrb.mxu3 %v2271_v53  ;;  %1650 = vmatpush.bf16.msrb.mxu1 %v2331_v21  ;;  %v2323_v38 = vor.u32 %v2558_v35, %v2322_v34  ;;  %v2340_v53 = vld [vmem:[%s2959_s7 + $0xc8] sm:$0xf0]  ;;  %v2581_v21 = vld [vmem:[%s2959_s7 + $0x164] sm:$0xf]  ;;  %v2574_v49 = vld [vmem:[%s2959_s7 + $0x124] sm:$0xf0] }
  0xfc   : > { %1637 = vmatpush.bf16.msrb.mxu0 %v2259_v47  ;;  %1662 = vmatpush.bf16.msrb.mxu2 %v2411_v60 }
  0xfd   : > { %1679 = vmatpush.bf16.msrb.mxu3 %v2263_v1  ;;  %1651 = vmatpush.bf16.msrb.mxu1 %v2323_v38  ;;  %v2583_v1 = vld [vmem:[%s2959_s7 + $0x174] sm:$0xf] }
  0xfe   : > { %v2555_v38 = vld [vmem:[%s2959_s7 + $0x94] sm:$0xf] }
 0x100   : > { %1638 = vmatpush.bf16.msrb.mxu0 %v2251_v57  ;;  %1663 = vmatpush.bf16.msrb.mxu2 %v2403_v11 }
 0x101   : > { %1680 = vmatpush.bf16.msrb.mxu3 %v2255_v17  ;;  %1652 = vmatpush.bf16.msrb.mxu1 %v2315_v55 }
 0x104   : > { %1639 = vmatpush.bf16.msrb.mxu0 %v2243_v7 }
 0x105   : > { %1681 = vmatpush.bf16.msrb.mxu3 %v2247_v33  ;;  %v2576_v33 = vld [vmem:[%s2959_s7 + $0x134] sm:$0xf0] }
 0x108   : > { %1688 = vmatpush.bf16.msra.mxu0 %v2367_v12 }
 0x10c   : > { %1689 = vmatpush.bf16.msra.mxu0 %v2359_v28  ;;  %v2394_v28 = vld [vmem:[%s2959_s7 + $0x130] sm:$0xf] }
 0x10d   : > { %v2395_v37 = vor.u32 %v2576_v33, %v2394_v28 }
 0x10f   : > { %1664 = vmatpush.bf16.msrb.mxu2 %v2395_v37 }
 0x123   : > { %v1052_v40 = vpop.f32.mrf.mxu0 }
 0x124   : > { %v1066_v42 = vpop.f32.mrf.mxu1 }
 0x125   : > { %v3207_v46 = vadd.f32 %v1066_v42, %v1052_v40  ;;  %v2348_v40 = vld [vmem:[%s2959_s7 + $0xd8] sm:$0xf0] }
 0x126   : > { %v2351_v41 = vor.u32 %v2563_v39, %v2348_v40  ;;  %v2316_v39 = vld [vmem:[%s2959_s7 + $0x98] sm:$0xf0]  ;;  %v2579_v40 = vld [vmem:[%s2959_s7 + $0x154] sm:$0xf] }
 0x127   : > { %v2234_v52 = vmul.f32 -1.442695, %v3207_v46 }
 0x128   : > { %1690 = vmatpush.bf16.msra.mxu0 %v2351_v41  ;;  %v2412_v41 = vld [vmem:[%s2959_s7 + $0x158] sm:$0xf0] }
 0x129   : > { %2628 = vpow2.f32 %v2234_v52  ;;  %v2561_v52 = vld [vmem:[%s2959_s7 + $0xc4] sm:$0xf]  ;;  %v2415_v44 = vor.u32 %v2579_v40, %v2412_v41  ;;  %v2571_v41 = vld [vmem:[%s2959_s7 + $0x114] sm:$0xf] }
 0x12a   : > { %v2343_v57 = vor.u32 %v2561_v52, %v2340_v53 }
 0x12b   : > { %v1054_v0 = vpop.f32.mrf.mxu0 }
 0x12c   : > { %v1080_v59 = vpop.f32.mrf.mxu2  ;;  %v1068_v2 = vpop.f32.mrf.mxu1  ;;  %1691 = vmatpush.bf16.msra.mxu0 %v2343_v57 }
 0x12d   : > { %v1094_v63 = vpop.f32.mrf.mxu3  ;;  %v3222_v6 = vadd.f32 %v1068_v2, %v1054_v0  ;;  %v2332_v0 = vld [vmem:[%s2959_s7 + $0xb8] sm:$0xf0] }
 0x12e   : > { %v3234_v24 = vadd.f32 %v1094_v63, %v1080_v59  ;;  %v2306_v59 = vld [vmem:[%s2959_s7 + $0x80] sm:$0xf]  ;;  %v2428_v2 = vld [vmem:[%s2959_s7 + $0x178] sm:$0xf0]  ;;  %v2335_v5 = vor.u32 %v2559_v62, %v2332_v0 }
 0x12f   : > { %v2629_v15 = vpop.eup %2628  ;;  %v2237_v16 = vmul.f32 -1.442695, %v3222_v6  ;;  %v2307_v63 = vor.u32 %v2554_v61, %v2306_v59  ;;  %v2431_v7 = vor.u32 %v2583_v1, %v2428_v2  ;;  %v2308_v59 = vld [vmem:[%s2959_s7 + $0x88] sm:$0xf0] }
 0x130   : > { %v3230_v18 = vadd.f32 1.0, %v2629_v15  ;;  %v2235_v36 = vmul.f32 -1.442695, %v3234_v24  ;;  %v2324_v15 = vld [vmem:[%s2959_s7 + $0xa8] sm:$0xf0]  ;;  %1692 = vmatpush.bf16.msra.mxu0 %v2335_v5  ;;  %v2311_v2 = vor.u32 %v2553_v58, %v2308_v59 }
 0x131   : > { %2630 = vpow2.f32 %v2237_v16  ;;  %1653 = vmatpush.bf16.msrb.mxu1 %v2307_v63  ;;  %v2327_v30 = vor.u32 %v2557_v14, %v2324_v15  ;;  %v2404_v63 = vld [vmem:[%s2959_s7 + $0x148] sm:$0xf0]  ;;  %v2572_v5 = vld [vmem:[%s2959_s7 + $0x114] sm:$0xf0] }
 0x132   : > { %2632 = vrcp.f32 %v3230_v18  ;;  %vm1240_vm0 = vweird.f32 %v3230_v18  ;;  %v1244_v17 = vand.u32 2147483647, %v3230_v18  ;;  %v1246_v19 = vand.u32 2147483648, %v3230_v18 }
 0x133   : > { %2634 = vpow2.f32 %v2235_v36 }
 0x134   : > { %v1082_v25 = vpop.f32.mrf.mxu2  ;;  %1693 = vmatpush.bf16.msra.mxu0 %v2327_v30  ;;  %vm3318_vm5 = vcmp.eq.f32.partialorder %v1244_v17, 8.507059e+37  ;;  %v1247_v60 = vor.u32 1.1754944e-38, %v1246_v19  ;;  %v2370_v19 = vld [vmem:[%s2959_s7 + $0x100] sm:$0xf]  ;;  %v2573_v30 = vld [vmem:[%s2959_s7 + $0x124] sm:$0xf] }
 0x135   : > { %v1096_v27 = vpop.f32.mrf.mxu3  ;;  %1702 = vmatpush.bf16.msra.mxu1 %v2431_v7 }
 0x136   : > { %v3243_v32 = vadd.f32 %v1096_v27, %v1082_v25  ;;  %v2420_v27 = vld [vmem:[%s2959_s7 + $0x168] sm:$0xf0] }
 0x137   : > { %v2631_v42 = vpop.eup %2630  ;;  %v2423_v31 = vor.u32 %v2581_v21, %v2420_v27 }
 0x138   : > { %v2238_v43 = vmul.f32 -1.442695, %v3243_v32  ;;  %v3253_v47 = vpop.eup %2632  ;;  %v3255_v48 = vadd.f32 1.0, %v2631_v42 }
 0x139   : > { %v1236_v54 = vmul.f32 %v3253_v47, %v3230_v18  ;;  %v2635_v3 = vpop.eup %2634  ;;  %vm1241_vm1 = vweird.f32 %v3253_v47  ;;  %1703 = vmatpush.bf16.msra.mxu1 %v2423_v31  ;;  %v2388_v31 = vld [vmem:[%s2959_s7 + $0x128] sm:$0xf0] }
 0x13a   : > { %2636 = vrcp.f32 %v3255_v48  ;;  %v3285_v23 = vadd.f32 1.0, %v2635_v3  ;;  %v1291_v29 = vand.u32 2147483648, %v3255_v48  ;;  %vm1285_vm2 = vweird.f32 %v3255_v48  ;;  %vm3311_vm4 = vmor %vm1240_vm0, %vm1241_vm1 }
 0x13b   : > { %2638 = vpow2.f32 %v2238_v43  ;;  %v1237_v4 = vsub.f32 1.0, %v1236_v54  ;;  %v2319_v43 = vor.u32 %v2555_v38, %v2316_v39  ;;  %v1289_v52 = vand.u32 2147483647, %v3255_v48 }
 0x13c   : > { %v2387_v54 = vor.u32 %v2574_v49, %v2386_v45  ;;  %v1292_v61 = vor.u32 1.1754944e-38, %v1291_v29  ;;  %v2391_v37 = vor.u32 %v2573_v30, %v2388_v31  ;;  %vm1255_vm8 = vweird.f32 %v3285_v23 }
 0x13d   : > { %v1238_v22 = vmul.f32 %v3253_v47, %v1237_v4  ;;  %1694 = vmatpush.bf16.msra.mxu0 %v2319_v43  ;;  %1704 = vmatpush.bf16.msra.mxu1 %v2415_v44  ;;  %v2378_v4 = vld [vmem:[%s2959_s7 + $0x110] sm:$0xf]  ;;  %vm1290_vm7 = vcmp.eq.f32.partialorder %v1289_v52, 8.507059e+37  ;;  %v1259_v18 = vand.u32 2147483647, %v3285_v23 }
 0x13e   : > { %1665 = vmatpush.bf16.msrb.mxu2 %v2387_v54  ;;  %v2379_v8 = vor.u32 %v2572_v5, %v2378_v4 }
 0x13f   : > { %v1239_v42 = vadd.f32 %v3253_v47, %v1238_v22  ;;  %vm1260_vm14 = vcmp.eq.f32.partialorder %v1259_v18, 8.507059e+37  ;;  %v1337_v18 = vld [vmem:[#allocation2 + $0x10] sm:$0xff] }
 0x140   : > { %v3274_v10 = vpop.eup %2636 }
 0x141   : > { %v1281_v12 = vmul.f32 %v3274_v10, %v3255_v48  ;;  %v2639_v16 = vpop.eup %2638  ;;  %vm1286_vm3 = vweird.f32 %v3274_v10  ;;  %v2577_v48 = vld [vmem:[%s2959_s7 + $0x144] sm:$0xf]  ;;  %v1243_v0 = vsel %vm3311_vm4, %v3253_v47, %v1239_v42  ;;  %v2396_v47 = vld [vmem:[%s2959_s7 + $0x138] sm:$0xf0]  ;;  %1695 = vmatpush.bf16.msra.mxu0 %v2311_v2 }
 0x142   : > { %v3295_v35 = vadd.f32 1.0, %v2639_v16  ;;  %vm3326_vm6 = vmor %vm1285_vm2, %vm1286_vm3  ;;  %v2407_v3 = vor.u32 %v2577_v48, %v2404_v63  ;;  %v1248_v14 = vsel %vm3318_vm5, %v1247_v60, %v1243_v0  ;;  %1666 = vmatpush.bf16.msrb.mxu2 %v2379_v8  ;;  %v2380_v42 = vld [vmem:[%s2959_s7 + $0x118] sm:$0xf0] }
 0x143   : > { %v1108_v13 = vpop.f32.mrf.mxu0  ;;  %v1282_v25 = vsub.f32 1.0, %v1281_v12  ;;  %v2575_v12 = vld [vmem:[%s2959_s7 + $0x134] sm:$0xf]  ;;  %v2383_v49 = vor.u32 %v2571_v41, %v2380_v42 }
 0x144   : > { %v1122_v20 = vpop.f32.mrf.mxu1  ;;  %1705 = vmatpush.bf16.msra.mxu1 %v2407_v3  ;;  %vm1300_vm10 = vweird.f32 %v3295_v35  ;;  %v1306_v58 = vand.u32 2147483648, %v3295_v35  ;;  %v1304_v48 = vand.u32 2147483647, %v3295_v35 }
 0x145   : > { %v3287_v26 = vadd.f32 %v1122_v20, %v1108_v13  ;;  %v1283_v34 = vmul.f32 %v3274_v10, %v1282_v25  ;;  %v2570_v20 = vld [vmem:[%s2959_s7 + $0x104] sm:$0xf0]  ;;  %v1325_v25 = vmul.f32 %v1248_v14, %v3207_v46 }
 0x146   : > { %v2371_v29 = vor.u32 %v2570_v20, %v2370_v19  ;;  %v1307_v5 = vor.u32 1.1754944e-38, %v1306_v58  ;;  %vm1305_vm15 = vcmp.eq.f32.partialorder %v1304_v48, 8.507059e+37 }
 0x147   : > { %v2236_v36 = vmul.f32 -1.442695, %v3287_v26  ;;  %v1284_v51 = vadd.f32 %v3274_v10, %v1283_v34 }
 0x148   : > { %1667 = vmatpush.bf16.msrb.mxu2 %v2371_v29 }
 0x149   : > { %2640 = vpow2.f32 %v2236_v36  ;;  %v1288_v7 = vsel %vm3326_vm6, %v3274_v10, %v1284_v51  ;;  %v2399_v10 = vor.u32 %v2575_v12, %v2396_v47  ;;  %v2372_v51 = vld [vmem:[%s2959_s7 + $0x108] sm:$0xf0] }
 0x14a   : > { %2642 = vrcp.f32 %v3285_v23  ;;  %v1293_v17 = vsel %vm1290_vm7, %v1292_v61, %v1288_v7  ;;  %v2375_v55 = vor.u32 %v2569_v50, %v2372_v51 }
 0x14b   : > { %2644 = vrcp.f32 %v3295_v35  ;;  %v1110_v57 = vpop.f32.mrf.mxu0  ;;  %v1328_v33 = vmul.f32 %v1293_v17, %v3222_v6  ;;  %1706 = vmatpush.bf16.msra.mxu1 %v2399_v10 }
 0x14c   : > { %v1136_v53 = vpop.f32.mrf.mxu2  ;;  %v1124_v62 = vpop.f32.mrf.mxu1 }
 0x14d   : > { %v1150_v56 = vpop.f32.mrf.mxu3  ;;  %v3338_v1 = vadd.f32 %v1124_v62, %v1110_v57 }
 0x14e   : > { %v1151_v21 = vadd.f32 %v1150_v56, %v1136_v53  ;;  %v1261_v56 = vand.u32 2147483648, %v3285_v23 }
 0x14f   : > { %v2641_v9 = vpop.eup %2640  ;;  %v2239_v11 = vmul.f32 -1.442695, %v3338_v1  ;;  %1707 = vmatpush.bf16.msra.mxu1 %v2391_v37 }
 0x150   : > { %v3348_v13 = vpop.eup %2642  ;;  %v3352_v15 = vadd.f32 1.0, %v2641_v9  ;;  %v1331_v46 = vmul.f32 %v1325_v25, %v1151_v21  ;;  %v1262_v3 = vor.u32 1.1754944e-38, %v1261_v56 }
 0x151   : > { %v3354_v16 = vpop.eup %2644  ;;  %2646 = vpow2.f32 %v2239_v11  ;;  %v1251_v27 = vmul.f32 %v3348_v13, %v3285_v23  ;;  %vm1256_vm9 = vweird.f32 %v3348_v13 }
 0x152   : > { %2648 = vrcp.f32 %v3352_v15  ;;  %v1296_v34 = vmul.f32 %v3354_v16, %v3295_v35  ;;  %vm1301_vm11 = vweird.f32 %v3354_v16  ;;  %vm3388_vm12 = vmor %vm1255_vm8, %vm1256_vm9  ;;  %vm1270_vm0 = vweird.f32 %v3352_v15 }
 0x153   : > { %v1252_v40 = vsub.f32 1.0, %v1251_v27  ;;  %1708 = vmatpush.bf16.msra.mxu1 %v2383_v49  ;;  %vm3394_vm13 = vmor %vm1300_vm10, %vm1301_vm11  ;;  %v1276_v10 = vand.u32 2147483648, %v3352_v15 }
 0x154   : > { %v1138_v22 = vpop.f32.mrf.mxu2  ;;  %v1297_v44 = vsub.f32 1.0, %v1296_v34 }
 0x155   : > { %v1152_v28 = vpop.f32.mrf.mxu3  ;;  %v1253_v52 = vmul.f32 %v3348_v13, %v1252_v40  ;;  %v1277_v34 = vor.u32 1.1754944e-38, %v1276_v10 }
 0x156   : > { %v1153_v36 = vadd.f32 %v1152_v28, %v1138_v22  ;;  %v1298_v54 = vmul.f32 %v3354_v16, %v1297_v44  ;;  %v1274_v22 = vand.u32 2147483647, %v3352_v15 }
 0x157   : > { %v2647_v39 = vpop.eup %2646  ;;  %v1254_v57 = vadd.f32 %v3348_v13, %v1253_v52  ;;  %1709 = vmatpush.bf16.msra.mxu1 %v2375_v55 }
 0x158   : > { %v1334_v38 = vmul.f32 %v1328_v33, %v1153_v36  ;;  %v3369_v43 = vpop.eup %2648  ;;  %v3371_v45 = vadd.f32 1.0, %v2647_v39  ;;  %v1299_v62 = vadd.f32 %v3354_v16, %v1298_v54  ;;  %vm1275_vm6 = vcmp.eq.f32.partialorder %v1274_v22, 8.507059e+37 }
 0x159   : > { %v1266_v53 = vmul.f32 %v3369_v43, %v3352_v15  ;;  %v1258_v4 = vsel %vm3388_vm12, %v3348_v13, %v1254_v57  ;;  %vm1271_vm1 = vweird.f32 %v3369_v43 }
 0x15a   : > { %v1341_v6 = vpack.c.bf16 %v1334_v38, %v1331_v46  ;;  %2650 = vrcp.f32 %v3371_v45  ;;  %v1303_v35 = vsel %vm3394_vm13, %v3354_v16, %v1299_v62  ;;  %v1263_v11 = vsel %vm1260_vm14, %v1262_v3, %v1258_v4  ;;  %vm3411_vm3 = vmor %vm1270_vm0, %vm1271_vm1 }
 0x15b   : > { %v1267_v59 = vsub.f32 1.0, %v1266_v53  ;;  %v1308_v12 = vsel %vm1305_vm15, %v1307_v5, %v1303_v35  ;;  %v1321_v17 = vand.u32 2147483648, %v3371_v45  ;;  %vm1315_vm4 = vweird.f32 %v3371_v45  ;;  %v1340_v5 = vld [vmem:[#allocation2 + $0x8] sm:$0xff] }
 0x15c   : > { %1640 = vmatmul.bf16.vlgmr.msrb.gmra.mxu0 %v1341_v6  ;;  %1682 = vmatmul.bf16.vlgmr.msrb.gmra.mxu3 %v1341_v6  ;;  %v1319_v25 = vand.u32 2147483647, %v3371_v45  ;;  %v1326_v28 = vmul.f32 %v1263_v11, %v3234_v24  ;;  %v1329_v29 = vmul.f32 %v1308_v12, %v3243_v32 }
 0x15d   : > { %v1268_v7 = vmul.f32 %v3369_v43, %v1267_v59  ;;  %v1322_v36 = vor.u32 1.1754944e-38, %v1321_v17  ;;  %v1338_v59 = vld [vmem:[#allocation2] sm:$0xff] }
 0x15e   : > { %vm1320_vm7 = vcmp.eq.f32.partialorder %v1319_v25, 8.507059e+37 }
 0x15f   : > { %v1269_v47 = vadd.f32 %v3369_v43, %v1268_v7 }
 0x160   : > { %v2651_v60 = vpop.eup %2650 }
 0x161   : > { %v1311_v0 = vmul.f32 %v2651_v60, %v3371_v45  ;;  %vm1316_vm2 = vweird.f32 %v2651_v60  ;;  %v1273_v31 = vsel %vm3411_vm3, %v3369_v43, %v1269_v47 }
 0x162   : > { %vm1317_vm5 = vmor %vm1315_vm4, %vm1316_vm2  ;;  %v1278_v46 = vsel %vm1275_vm6, %v1277_v34, %v1273_v31 }
 0x163   : > { %v1164_v63 = vpop.f32.mrf.mxu0  ;;  %v1312_v8 = vsub.f32 1.0, %v1311_v0  ;;  %v1327_v32 = vmul.f32 %v1278_v46, %v3287_v26 }
 0x164   : > { %v1178_v2 = vpop.f32.mrf.mxu1 }
 0x165   : > { %v1313_v9 = vmul.f32 %v2651_v60, %v1312_v8  ;;  %v1179_v19 = vadd.f32 %v1178_v2, %v1164_v63  ;;  %v1339_v63 = vld [vmem:[#allocation2 + $0x18] sm:$0xff] }
 0x167   : > { %v1314_v14 = vadd.f32 %v2651_v60, %v1313_v9  ;;  %v1332_v37 = vmul.f32 %v1326_v28, %v1179_v19 }
 0x169   : > { %v1318_v33 = vsel %vm1317_vm5, %v2651_v60, %v1314_v14 }
 0x16a   : > { %v1192_v13 = vpop.f32.mrf.mxu2  ;;  %v1323_v38 = vsel %vm1320_vm7, %v1322_v36, %v1318_v33 }
 0x16b   : > { %v1206_v20 = vpop.f32.mrf.mxu3  ;;  %v1166_v16 = vpop.f32.mrf.mxu0  ;;  %v1330_v42 = vmul.f32 %v1323_v38, %v3338_v1 }
 0x16c   : > { %v1180_v27 = vpop.f32.mrf.mxu1  ;;  %v1207_v40 = vadd.f32 %v1206_v20, %v1192_v13 }
 0x16d   : > { %v1181_v30 = vadd.f32 %v1180_v27, %v1166_v16 }
 0x16e   : > { %v1333_v44 = vmul.f32 %v1327_v32, %v1207_v40 }
 0x16f   : > { %v1335_v15 = vmul.f32 %v1329_v29, %v1181_v30 }
 0x171   : > { %v1342_v39 = vpack.c.bf16 %v1335_v15, %v1332_v37 }
 0x172   : > { %v1194_v24 = vpop.f32.mrf.mxu2 }
 0x173   : > { %v1208_v41 = vpop.f32.mrf.mxu3  ;;  %1654 = vmatmul.bf16.vlgmr.msrb.gmra.mxu1 %v1342_v39  ;;  %1696 = vmatmul.bf16.vlgmr.msra.gmra.mxu0 %v1342_v39 }
 0x174   : > { %v1209_v43 = vadd.f32 %v1208_v41, %v1194_v24 }
 0x176   : > { %v1336_v45 = vmul.f32 %v1330_v42, %v1209_v43 }
 0x178   : > { %v1343_v6 = vpack.c.bf16 %v1336_v45, %v1333_v44 }
 0x17a   : > { %1668 = vmatmul.bf16.vlgmr.msrb.gmra.mxu2 %v1343_v6 }
 0x183   : > { %1710 = vmatmul.bf16.vlgmr.msra.gmra.mxu1 %v1343_v6 }
 0x1d9   : > { %v1641_v49 = vpop.f32.mrf.mxu0 }
 0x1df   : > { %v1683_v54 = vpop.f32.mrf.mxu3 }
 0x1e1   : > { %v1643_v51 = vpop.f32.mrf.mxu0 }
 0x1e7   : > { %v1685_v0 = vpop.f32.mrf.mxu3 }
 0x1f0   : > { %v1655_v50 = vpop.f32.mrf.mxu1  ;;  %v1697_v53 = vpop.f32.mrf.mxu0 }
 0x1f1   : > { %v1656_v55 = vadd.f32 %v1655_v50, %v1641_v49  ;;  %v1698_v58 = vadd.f32 %v1697_v53, %v1683_v54 }
 0x1f8   : > { %v1657_v52 = vpop.f32.mrf.mxu1  ;;  %v1699_v48 = vpop.f32.mrf.mxu0 }
 0x1f9   : > { %v1658_v62 = vadd.f32 %v1657_v52, %v1643_v51  ;;  %v1700_v3 = vadd.f32 %v1699_v48, %v1685_v0 }
 0x1fd   : > { %v1669_v56 = vpop.f32.mrf.mxu2 }
 0x1fe   : > { %v1670_v57 = vadd.f32 %v1669_v56, %v1656_v55 }
 0x200   : > { %v1716_v26 = vadd.f32 %v1670_v57, %v1337_v18  ;;  %v1711_v1 = vpop.f32.mrf.mxu1 }
 0x201   : > { %v1712_v60 = vadd.f32 %v1711_v1, %v1698_v58 }
 0x202   : > { %1720 = vst [vmem:[#allocation2 + $0x10] sm:$0xff] %v1716_v26 }
 0x203   : > { %v1717_v61 = vadd.f32 %v1712_v60, %v1338_v59 }
 0x205   : > { %1721 = vst [vmem:[#allocation2] sm:$0xff] %v1717_v61  ;;  %v1671_v23 = vpop.f32.mrf.mxu2 }
 0x206   : > { %v1672_v2 = vadd.f32 %v1671_v23, %v1658_v62 }
 0x208   : > { %v1718_v4 = vadd.f32 %v1672_v2, %v1339_v63  ;;  %v1713_v7 = vpop.f32.mrf.mxu1 }
 0x209   : > { %v1714_v8 = vadd.f32 %v1713_v7, %v1700_v3  ;;  %1727 = sbr.rel (%p2432_p11) target bundleno = 536 (0x218), region = 63 }
 0x20a   : > { %1722 = vst [vmem:[#allocation2 + $0x18] sm:$0xff] %v1718_v4 }
 0x20b   : > { %v1719_v35 = vadd.f32 %v1714_v8, %v1340_v5 }
 0x20d   : > { %1723 = vst [vmem:[#allocation2 + $0x8] sm:$0xff] %v1719_v35 }
 0x20e   : > { %v1728_v9 = vld [vmem:[#allocation2 + $0x10] sm:$0xff]  ;;  %v1729_v11 = vld [vmem:[#allocation2] sm:$0xff] }
 0x20f   : > { %v1732_v47 = vpack.c.bf16 %v1729_v11, %v1728_v9 }
 0x211   : > { %v1730_v12 = vld [vmem:[#allocation2 + $0x18] sm:$0xff]  ;;  %1734 = vst [vmem:[%s3450_s3] sm:$0xff] %v1732_v47 }
 0x214   : > { %v1731_v14 = vld [vmem:[#allocation2 + $0x8] sm:$0xff] }
 0x215   : > { %v1733_v13 = vpack.c.bf16 %v1731_v14, %v1730_v12 }
 0x217   : > { %1735 = vst [vmem:[%s3450_s3 + $0x8] sm:$0xff] %v1733_v13 }
 0x218 PF: > { %s13_s16 = sadd.s32 1, %s2690_s16   ;;  %s3463_s12 = smov %s2678_s13 }
 0x219   : > { %p10_p12 = scmp.ge.s32.totalorder %s13_s16, 4   ;;  %s3464_s13 = smov %s2748_s20 }
 0x21a   : > { %s3465_s14 = smov %s2686_s15  ;;  %s3466_s15 = smov %s3468_s17 }
 0x21b   :  { %12 = sbr.rel (!%p10_p12) target bundleno = 3 (0x3), region = 104 }

// kernel: transformer_block.5
= control target key start
LH: loop header
LB: loop body
LE: loop exit
PB: predicated region body
PF: predicated region fallthrough
CT: control target
= control target key end

     0   :  { %s3179_s12 = smov 0   ;;  %s4434_s0 = inlined_call_operand.vmem [shape: bf16[2,8,8,32], index: 0, kind: input, shape index: {}]   ;;  %s4435_s1 = inlined_call_operand.vmem [shape: bf16[2,8,4,32], index: 1, kind: input, shape index: {}]   ;;  %s4436_s2 = inlined_call_operand.vmem [shape: bf16[2,8,4,32], index: 2, kind: input, shape index: {}]   ;;  %s4437_s3 = inlined_call_operand.vmem [shape: bf16[2,8,8,32], index: 3, kind: output, shape index: {}]  }
   0x1 LB: > { %s2976_s13 = sadd.s32 4294967295, %s3155_s12   ;;  %p2980_p0 = scmp.ge.s32.totalorder %s3155_s12, 1  ;;  %s3155_s12 = sphi %s3179_s12, %s13_s12  }
   0x2   : > { %p157_p1 = scmp.lt.s32.totalorder %s3155_s12, 3 }
   0x4   : > { %p158_p2 = pnand %p2980_p0, %p157_p1 }
   0x6   : > { %161 = sbr.rel (%p158_p2) target bundleno = 1061 (0x425), region = 32 }
   0xb   : > { %p191_p3 = scmp.lt.s32.totalorder %s2976_s13, 1  ;;  %vm275_vm0 = vcmask 1041409   ;;  %vm278_vm1 = vcmask 1042434   ;;  %vm281_vm2 = vcmask 1043459   ;;  %vm284_vm3 = vcmask 1044484  }
   0xc   : > { %vm287_vm4 = vcmask 1045509   ;;  %vm290_vm5 = vcmask 1046534   ;;  %vm293_vm6 = vcmask 1047559   ;;  %vm352_vm7 = vcmask 261120  }
   0xd   : > { %s4497_s13 = smov (!%p191_p3, %s2976_s13), 1  ;;  %vm374_vm9 = vcmask 64512   ;;  %vm446_vm10 = vcmask 1043456   ;;  %vm466_vm11 = vcmask 1040384   ;;  %vm536_vm12 = vcmask 253952  }
   0xe   : > { %s3104_s14 = sshll.u32 %s4497_s13, 4  ;;  %s3103_s18 = sshll.u32 %s4497_s13, 5  ;;  %vm537_vm13 = vsmask.f32 256  ;;  %vm870_vm15 = vsmask.f32 7938 }
   0xf   : > { %s3195_s17 = scalar_lea.vmem %s4435_s1, %s3104_s14  ;;  %s3205_s21 = scalar_lea.vmem %s4434_s0, %s3103_s18  ;;  %vm3810_vm14 = vmand %vm536_vm12, %vm537_vm13 }
  0x10   : > { %v226_v0 = vld [vmem:[%s3195_s17] sm:$0x1]  ;;  %v227_v1 = vld [vmem:[%s3195_s17 + $0x2] sm:$0x1]  ;;  %v228_v2 = vld [vmem:[%s3195_s17 + $0x4] sm:$0x1]  ;;  %s3230_s24 = scalar_lea.vmem %s4436_s2, %s3104_s14  ;;  %s3802_s27 = scalar_lea.vmem %s4437_s3, %s3103_s18 }
  0x11   : > { %297 = vst [vmem:[#allocation1] ss:$4 sm:$0xff] %v226_v0  ;;  %v229_v3 = vld [vmem:[%s3195_s17 + $0x6] sm:$0x1]  ;;  %v219_v5 = vld [vmem:[%s3205_s21 + $0x4] sm:$0x1] }
  0x12   : > { %302 = vst [vmem:[#allocation1 + $0x20] ss:$4 sm:$0xff] %v227_v1  ;;  %v220_v7 = vld [vmem:[%s3205_s21 + $0x8] sm:$0x1]  ;;  %v251_v8 = vunpack.c.l.b16 %v219_v5  ;;  %v218_v9 = vld [vmem:[%s3205_s21] sm:$0x1] }
  0x13   : > { %v230_v10 = vld [vmem:[%s3195_s17 + $0x8] sm:$0x1]  ;;  %v231_v12 = vld [vmem:[%s3195_s17 + $0xa] sm:$0x1]  ;;  %v221_v13 = vld [vmem:[%s3205_s21 + $0xc] sm:$0x1]  ;;  %v252_v14 = vunpack.c.l.b16 %v220_v7  ;;  %v250_v16 = vunpack.c.l.b16 %v218_v9 }
  0x14   : > { %v2990_v17 = vunpack.i.l.s16 %v251_v8  ;;  %v222_v22 = vld [vmem:[%s3205_s21 + $0x10] sm:$0x1]  ;;  %v253_v23 = vunpack.c.l.b16 %v221_v13  ;;  %v223_v29 = vld [vmem:[%s3205_s21 + $0x14] sm:$0x1]  ;;  %v232_v31 = vld [vmem:[%s3195_s17 + $0xc] sm:$0x1] }
  0x15   : > { %v2991_v24 = vunpack.i.l.s16 %v252_v14  ;;  %v2989_v26 = vunpack.i.l.s16 %v250_v16  ;;  %v254_v30 = vunpack.c.l.b16 %v222_v22  ;;  %v233_v34 = vld [vmem:[%s3195_s17 + $0xe] sm:$0x1]  ;;  %v224_v38 = vld [vmem:[%s3205_s21 + $0x18] sm:$0x1]  ;;  %v255_v39 = vunpack.c.l.b16 %v223_v29  ;;  %v225_v48 = vld [vmem:[%s3205_s21 + $0x1c] sm:$0x1] }
  0x16   : > { %v274_v27 = vrot.slane %v2990_v17, 7  ;;  %v2992_v33 = vunpack.i.l.s16 %v253_v23  ;;  %v256_v49 = vunpack.c.l.b16 %v224_v38  ;;  %v257_v55 = vunpack.c.l.b16 %v225_v48  ;;  %v234_v57 = vld [vmem:[%s3230_s24] sm:$0x1]  ;;  %v235_v60 = vld [vmem:[%s3230_s24 + $0x2] sm:$0x1] }
  0x17   : > { %v277_v35 = vrot.slane %v2991_v24, 6  ;;  %v2993_v44 = vunpack.i.l.s16 %v254_v30  ;;  %v2994_v52 = vunpack.i.l.s16 %v255_v39  ;;  %v239_v22 = vld [vmem:[%s3230_s24 + $0xa] sm:$0x1]  ;;  %v571_v29 = vld [vmem:[%s3195_s17] sm:$0x1] }
  0x18   : > { %v298_v4 = vld.sshfl [vmem:[#allocation1] sm:$0xff pattern:$0x73625140]  ;;  %v276_v40 = vsel %vm275_vm0, %v274_v27, %v2989_v26  ;;  %v280_v46 = vrot.slane %v2992_v33, 5  ;;  %v2995_v59 = vunpack.i.l.s16 %v256_v49  ;;  %v241_v26 = vld [vmem:[%s3230_s24 + $0xe] sm:$0x1] }
  0x19   : > { %v303_v6 = vld.sshfl [vmem:[#allocation1 + $0x20] sm:$0xff pattern:$0x73625140]  ;;  %306 = vst [vmem:[#allocation1] ss:$4 sm:$0xff] %v228_v2  ;;  %v329_v20 = vunpack.c.l.b16 %v298_v4  ;;  %v279_v50 = vsel %vm278_vm1, %v277_v35, %v276_v40  ;;  %v283_v53 = vrot.slane %v2993_v44, 4  ;;  %v2996_v4 = vunpack.i.l.s16 %v257_v55 }
  0x1a   : > { %310 = vst [vmem:[#allocation1 + $0x20] ss:$4 sm:$0xff] %v229_v3  ;;  %v330_v11 = vunpack.c.l.b16 %v303_v6  ;;  %v282_v56 = vsel %vm281_vm2, %v280_v46, %v279_v50  ;;  %v286_v62 = vrot.slane %v2994_v52, 3  ;;  %v289_v6 = vrot.slane %v2995_v59, 2  ;;  %v573_v33 = vld [vmem:[%s3195_s17 + $0x4] sm:$0x1] }
  0x1b   : > { %v285_v1 = vsel %vm284_vm3, %v283_v53, %v282_v56  ;;  %v576_v38 = vld [vmem:[%s3195_s17 + $0xa] sm:$0x1]  ;;  %v580_v46 = vld [vmem:[%s3230_s24 + $0x2] sm:$0x1]  ;;  %v581_v49 = vld [vmem:[%s3230_s24 + $0x4] sm:$0x1] }
  0x1c   : > { %v337_v21 = vrot.slane %v330_v11, 7  ;;  %v288_v8 = vsel %vm287_vm4, %v286_v62, %v285_v1  ;;  %v292_v11 = vrot.slane %v2996_v4, 1  ;;  %v582_v50 = vld [vmem:[%s3230_s24 + $0x6] sm:$0x1]  ;;  %v583_v53 = vld [vmem:[%s3230_s24 + $0x8] sm:$0x1] }
  0x1d   : > { %v291_v14 = vsel %vm290_vm5, %v289_v6, %v288_v8  ;;  %v906_v1 = vld [vmem:[%s3195_s17 + $0x4] sm:$0x1]  ;;  %v909_v6 = vld [vmem:[%s3195_s17 + $0xa] sm:$0x1] }
  0x1e   : > { %v338_v32 = vsel %vm275_vm0, %v337_v21, %v329_v20  ;;  %v238_v21 = vld [vmem:[%s3230_s24 + $0x8] sm:$0x1] }
  0x20   : > { %v307_v15 = vld.sshfl [vmem:[#allocation1] sm:$0xff pattern:$0x73625140] }
  0x21   : > { %v311_v18 = vld.sshfl [vmem:[#allocation1 + $0x20] sm:$0xff pattern:$0x73625140]  ;;  %314 = vst [vmem:[#allocation1] ss:$4 sm:$0xff] %v230_v10  ;;  %v331_v19 = vunpack.c.l.b16 %v307_v15 }
  0x22   : > { %318 = vst [vmem:[#allocation1 + $0x20] ss:$4 sm:$0xff] %v231_v12  ;;  %v332_v25 = vunpack.c.l.b16 %v311_v18  ;;  %v236_v12 = vld [vmem:[%s3230_s24 + $0x4] sm:$0x1]  ;;  %v237_v15 = vld [vmem:[%s3230_s24 + $0x6] sm:$0x1] }
  0x23   : > { %v339_v28 = vrot.slane %v331_v19, 6  ;;  %v294_v19 = vsel %vm293_vm6, %v292_v11, %v291_v14  ;;  %v913_v14 = vld [vmem:[%s3230_s24 + $0x2] sm:$0x1] }
  0x24   : > { %v341_v37 = vrot.slane %v332_v25, 5  ;;  %v295_v20 = vpack.c.b16 %v294_v19, %v294_v19  ;;  %v240_v25 = vld [vmem:[%s3230_s24 + $0xc] sm:$0x1] }
  0x25   : > { %v340_v43 = vsel %vm278_vm1, %v339_v28, %v338_v32 }
  0x26   : > { %v342_v51 = vsel %vm281_vm2, %v341_v37, %v340_v43  ;;  %v575_v37 = vld [vmem:[%s3195_s17 + $0x8] sm:$0x1] }
  0x28   : > { %v315_v36 = vld.sshfl [vmem:[#allocation1] sm:$0xff pattern:$0x73625140] }
  0x29   : > { %v319_v41 = vld.sshfl [vmem:[#allocation1 + $0x20] sm:$0xff pattern:$0x73625140]  ;;  %322 = vst [vmem:[#allocation1] ss:$4 sm:$0xff] %v232_v31  ;;  %v333_v42 = vunpack.c.l.b16 %v315_v36 }
  0x2a   : > { %326 = vst [vmem:[#allocation1 + $0x20] ss:$4 sm:$0xff] %v233_v34  ;;  %v334_v45 = vunpack.c.l.b16 %v319_v41  ;;  %v572_v31 = vld [vmem:[%s3195_s17 + $0x2] sm:$0x1]  ;;  %v574_v34 = vld [vmem:[%s3195_s17 + $0x6] sm:$0x1] }
  0x2b   : > { %v343_v47 = vrot.slane %v333_v42, 4  ;;  %v577_v41 = vld [vmem:[%s3195_s17 + $0xc] sm:$0x1]  ;;  %v578_v42 = vld [vmem:[%s3195_s17 + $0xe] sm:$0x1] }
  0x2c   : > { %v345_v54 = vrot.slane %v334_v45, 3  ;;  %v579_v45 = vld [vmem:[%s3230_s24] sm:$0x1] }
  0x2d   : > { %v344_v58 = vsel %vm284_vm3, %v343_v47, %v342_v51 }
  0x2e   : > { %v346_v3 = vsel %vm287_vm4, %v345_v54, %v344_v58  ;;  %v584_v54 = vld [vmem:[%s3230_s24 + $0xa] sm:$0x1]  ;;  %v586_v58 = vld [vmem:[%s3230_s24 + $0xe] sm:$0x1] }
  0x30   : > { %v323_v61 = vld.sshfl [vmem:[#allocation1] sm:$0xff pattern:$0x73625140] }
  0x31   : > { %v327_v63 = vld.sshfl [vmem:[#allocation1 + $0x20] sm:$0xff pattern:$0x73625140]  ;;  %v335_v0 = vunpack.c.l.b16 %v323_v61  ;;  %388 = vst [vmem:[#allocation1] ss:$4 sm:$0xff] %v234_v57 }
  0x32   : > { %v336_v2 = vunpack.c.l.b16 %v327_v63  ;;  %393 = vst [vmem:[#allocation1 + $0x20] ss:$4 sm:$0xff] %v235_v60  ;;  %v585_v57 = vld [vmem:[%s3230_s24 + $0xc] sm:$0x1]  ;;  %v904_v61 = vld [vmem:[%s3195_s17] sm:$0x1] }
  0x33   : > { %v347_v5 = vrot.slane %v335_v0, 2  ;;  %v905_v63 = vld [vmem:[%s3195_s17 + $0x2] sm:$0x1] }
  0x34   : > { %v349_v7 = vrot.slane %v336_v2, 1  ;;  %v907_v2 = vld [vmem:[%s3195_s17 + $0x6] sm:$0x1] }
  0x35   : > { %v348_v9 = vsel %vm290_vm5, %v347_v5, %v346_v3  ;;  %v908_v5 = vld [vmem:[%s3195_s17 + $0x8] sm:$0x1] }
  0x36   : > { %v350_v10 = vsel %vm293_vm6, %v349_v7, %v348_v9  ;;  %v910_v9 = vld [vmem:[%s3195_s17 + $0xc] sm:$0x1] }
  0x37   : > { %v351_v13 = vpack.c.b16 %v350_v10, %v350_v10  ;;  %v911_v10 = vld [vmem:[%s3195_s17 + $0xe] sm:$0x1] }
  0x38   : > { %v3245_v16 = vld.sshfl [vmem:[#allocation1] sm:$0xff pattern:$0x73625140] }
  0x39   : > { %v357_v17 = vsel %vm352_vm7, %v351_v13, 0  ;;  %v3248_v18 = vld.sshfl [vmem:[#allocation1 + $0x20] sm:$0xff pattern:$0x73625140]  ;;  %397 = vst [vmem:[#allocation1] ss:$4 sm:$0xff] %v236_v12 }
  0x3a   : > { %366 = vmatpush.bf16.xpose.msra.mxu0 %v357_v17  ;;  %401 = vst [vmem:[#allocation1 + $0x20] ss:$4 sm:$0xff] %v237_v15  ;;  %v912_v13 = vld [vmem:[%s3230_s24] sm:$0x1]  ;;  %v212_v17 = vlaneseq }
  0x40   : > { %v3253_v23 = vld.sshfl [vmem:[#allocation1] sm:$0xff pattern:$0x73625140] }
  0x41   : > { %2997 = vmatmul.msk.bf16.vlgmr.msra.gmra.mxu0 %vm352_vm7, %v295_v20  ;;  %v3256_v24 = vld.sshfl [vmem:[#allocation1 + $0x20] sm:$0xff pattern:$0x73625140]  ;;  %405 = vst [vmem:[#allocation1] ss:$4 sm:$0xff] %v238_v21  ;;  %v213_v20 = vshrl.u32 %v212_v17, 7 }
  0x42   : > { %409 = vst [vmem:[#allocation1 + $0x20] ss:$4 sm:$0xff] %v239_v22  ;;  %v215_v21 = vand.u32 127, %v212_v17  ;;  %v914_v22 = vld [vmem:[%s3230_s24 + $0x4] sm:$0x1] }
  0x44   : > { %vm216_vm8 = vcmp.le.s32.totalorder %v215_v21, %v213_v20  ;;  %v1244_v21 = vld [vmem:[%s3195_s17 + $0xc] sm:$0x1] }
  0x48   : > { %v3260_v27 = vld.sshfl [vmem:[#allocation1] sm:$0xff pattern:$0x73625140] }
  0x49   : > { %v3262_v28 = vld.sshfl [vmem:[#allocation1 + $0x20] sm:$0xff pattern:$0x73625140]  ;;  %413 = vst [vmem:[#allocation1] ss:$4 sm:$0xff] %v240_v25 }
  0x4a   : > { %417 = vst [vmem:[#allocation1 + $0x20] ss:$4 sm:$0xff] %v241_v26  ;;  %v915_v25 = vld [vmem:[%s3230_s24 + $0x6] sm:$0x1] }
  0x50   : > { %v3265_v30 = vld.sshfl [vmem:[#allocation1] sm:$0xff pattern:$0x73625140] }
  0x51   : > { %v3268_v32 = vld.sshfl [vmem:[#allocation1 + $0x20] sm:$0xff pattern:$0x73625140]  ;;  %635 = vst [vmem:[#allocation1] ss:$4 sm:$0xff] %v571_v29 }
  0x52   : > { %640 = vst [vmem:[#allocation1 + $0x20] ss:$4 sm:$0xff] %v572_v31 }
  0x58   : > { %v3272_v35 = vld.sshfl [vmem:[#allocation1] sm:$0xff pattern:$0x73625140] }
  0x59   : > { %v3274_v36 = vld.sshfl [vmem:[#allocation1 + $0x20] sm:$0xff pattern:$0x73625140]  ;;  %644 = vst [vmem:[#allocation1] ss:$4 sm:$0xff] %v573_v33 }
  0x5a   : > { %648 = vst [vmem:[#allocation1 + $0x20] ss:$4 sm:$0xff] %v574_v34  ;;  %v3157_v33 = vmov -1e+30  }
  0x5b   : > { %v3348_v34 = vsel %vm216_vm8, 0.0, %v3157_v33  ;;  %v1246_v33 = vld [vmem:[%s3230_s24] sm:$0x1] }
  0x60   : > { %v3278_v39 = vld.sshfl [vmem:[#allocation1] sm:$0xff pattern:$0x73625140] }
  0x61   : > { %v3280_v40 = vld.sshfl [vmem:[#allocation1 + $0x20] sm:$0xff pattern:$0x73625140]  ;;  %652 = vst [vmem:[#allocation1] ss:$4 sm:$0xff] %v575_v37 }
  0x62   : > { %656 = vst [vmem:[#allocation1 + $0x20] ss:$4 sm:$0xff] %v576_v38  ;;  %v916_v38 = vld [vmem:[%s3230_s24 + $0x8] sm:$0x1] }
  0x68   : > { %v3284_v43 = vld.sshfl [vmem:[#allocation1] sm:$0xff pattern:$0x73625140] }
  0x69   : > { %v3286_v44 = vld.sshfl [vmem:[#allocation1 + $0x20] sm:$0xff pattern:$0x73625140]  ;;  %660 = vst [vmem:[#allocation1] ss:$4 sm:$0xff] %v577_v41 }
  0x6a   : > { %664 = vst [vmem:[#allocation1 + $0x20] ss:$4 sm:$0xff] %v578_v42  ;;  %v917_v42 = vld [vmem:[%s3230_s24 + $0xa] sm:$0x1] }
  0x70   : > { %v3290_v47 = vld.sshfl [vmem:[#allocation1] sm:$0xff pattern:$0x73625140] }
  0x71   : > { %v3292_v48 = vld.sshfl [vmem:[#allocation1 + $0x20] sm:$0xff pattern:$0x73625140]  ;;  %724 = vst [vmem:[#allocation1] ss:$4 sm:$0xff] %v579_v45 }
  0x72   : > { %729 = vst [vmem:[#allocation1 + $0x20] ss:$4 sm:$0xff] %v580_v46 }
  0x78   : > { %v3296_v51 = vld.sshfl [vmem:[#allocation1] sm:$0xff pattern:$0x73625140] }
  0x79   : > { %v3298_v52 = vld.sshfl [vmem:[#allocation1 + $0x20] sm:$0xff pattern:$0x73625140]  ;;  %733 = vst [vmem:[#allocation1] ss:$4 sm:$0xff] %v581_v49 }
  0x7a   : > { %737 = vst [vmem:[#allocation1 + $0x20] ss:$4 sm:$0xff] %v582_v50 }
  0x80   : > { %v3302_v55 = vld.sshfl [vmem:[#allocation1] sm:$0xff pattern:$0x73625140] }
  0x81   : > { %v3304_v56 = vld.sshfl [vmem:[#allocation1 + $0x20] sm:$0xff pattern:$0x73625140]  ;;  %741 = vst [vmem:[#allocation1] ss:$4 sm:$0xff] %v583_v53 }
  0x82   : > { %745 = vst [vmem:[#allocation1 + $0x20] ss:$4 sm:$0xff] %v584_v54  ;;  %v918_v53 = vld [vmem:[%s3230_s24 + $0xc] sm:$0x1]  ;;  %v919_v54 = vld [vmem:[%s3230_s24 + $0xe] sm:$0x1] }
  0x88   : > { %v3308_v59 = vld.sshfl [vmem:[#allocation1] sm:$0xff pattern:$0x73625140] }
  0x89   : > { %v3310_v60 = vld.sshfl [vmem:[#allocation1 + $0x20] sm:$0xff pattern:$0x73625140]  ;;  %749 = vst [vmem:[#allocation1] ss:$4 sm:$0xff] %v585_v57 }
  0x8a   : > { %753 = vst [vmem:[#allocation1 + $0x20] ss:$4 sm:$0xff] %v586_v58 }
  0x90   : > { %v3313_v62 = vld.sshfl [vmem:[#allocation1] sm:$0xff pattern:$0x73625140] }
  0x91   : > { %v3316_v0 = vld.sshfl [vmem:[#allocation1 + $0x20] sm:$0xff pattern:$0x73625140]  ;;  %968 = vst [vmem:[#allocation1] ss:$4 sm:$0xff] %v904_v61 }
  0x92   : > { %4438 = vst [vmem:[#allocation2_spill] sm:$0xff] %v3316_v0  ;;  %v1238_v61 = vld [vmem:[%s3195_s17] sm:$0x1] }
  0x93   : > { %973 = vst [vmem:[#allocation1 + $0x20] ss:$4 sm:$0xff] %v905_v63 }
  0x98   : > { %v3320_v3 = vld.sshfl [vmem:[#allocation1] sm:$0xff pattern:$0x73625140] }
  0x99   : > { %977 = vst [vmem:[#allocation1] ss:$4 sm:$0xff] %v906_v1  ;;  %v1239_v1 = vld [vmem:[%s3195_s17 + $0x2] sm:$0x1] }
  0x9a   : > { %v3322_v4 = vld.sshfl [vmem:[#allocation1 + $0x20] sm:$0xff pattern:$0x73625140] }
  0x9b   : > { %981 = vst [vmem:[#allocation1 + $0x20] ss:$4 sm:$0xff] %v907_v2 }
  0xa0   : > { %v3326_v7 = vld.sshfl [vmem:[#allocation1] sm:$0xff pattern:$0x73625140] }
  0xa1   : > { %985 = vst [vmem:[#allocation1] ss:$4 sm:$0xff] %v908_v5  ;;  %v1240_v5 = vld [vmem:[%s3195_s17 + $0x4] sm:$0x1] }
  0xa2   : > { %v3328_v8 = vld.sshfl [vmem:[#allocation1 + $0x20] sm:$0xff pattern:$0x73625140] }
  0xa3   : > { %989 = vst [vmem:[#allocation1 + $0x20] ss:$4 sm:$0xff] %v909_v6  ;;  %v1241_v6 = vld [vmem:[%s3195_s17 + $0x6] sm:$0x1] }
  0xa8   : > { %v3332_v11 = vld.sshfl [vmem:[#allocation1] sm:$0xff pattern:$0x73625140] }
  0xa9   : > { %993 = vst [vmem:[#allocation1] ss:$4 sm:$0xff] %v910_v9 }
  0xaa   : > { %v3334_v12 = vld.sshfl [vmem:[#allocation1 + $0x20] sm:$0xff pattern:$0x73625140] }
  0xab   : > { %997 = vst [vmem:[#allocation1 + $0x20] ss:$4 sm:$0xff] %v911_v10 }
  0xb0   : > { %v3338_v15 = vld.sshfl [vmem:[#allocation1] sm:$0xff pattern:$0x73625140] }
  0xb1   : > { %1057 = vst [vmem:[#allocation1] ss:$4 sm:$0xff] %v912_v13  ;;  %v1242_v13 = vld [vmem:[%s3195_s17 + $0x8] sm:$0x1] }
  0xb2   : > { %v3340_v19 = vld.sshfl [vmem:[#allocation1 + $0x20] sm:$0xff pattern:$0x73625140] }
  0xb3   : > { %1062 = vst [vmem:[#allocation1 + $0x20] ss:$4 sm:$0xff] %v913_v14  ;;  %v1243_v14 = vld [vmem:[%s3195_s17 + $0xa] sm:$0x1] }
  0xb8   : > { %v3344_v26 = vld.sshfl [vmem:[#allocation1] sm:$0xff pattern:$0x73625140] }
  0xb9   : > { %4439 = vst [vmem:[#allocation3_spill] sm:$0xff] %v3344_v26  ;;  %v564_v26 = vld [vmem:[%s3205_s21 + $0x4] sm:$0x1] }
  0xba   : > { %v3346_v29 = vld.sshfl [vmem:[#allocation1 + $0x20] sm:$0xff pattern:$0x73625140]  ;;  %1066 = vst [vmem:[#allocation1] ss:$4 sm:$0xff] %v914_v22 }
  0xbb   : > { %4440 = vst [vmem:[#allocation4_spill] sm:$0xff] %v3346_v29  ;;  %v1245_v22 = vld [vmem:[%s3195_s17 + $0xe] sm:$0x1] }
  0xbc   : > { %1070 = vst [vmem:[#allocation1 + $0x20] ss:$4 sm:$0xff] %v915_v25 }
  0xbe   : > { %v368_v31 = vpop.f32.mrf.mxu0 }
  0xbf   : > { %v372_v37 = vmul.f32 0.17677669, %v368_v31 }
  0xc1   : > { %v3352_v41 = vadd.f32 %v372_v37, %v3348_v34  ;;  %v3355_v45 = vld.sshfl [vmem:[#allocation1] sm:$0xff pattern:$0x73625140] }
  0xc2   : > { %4441 = vst [vmem:[#allocation5_spill] sm:$0xff] %v3355_v45  ;;  %v1247_v37 = vld [vmem:[%s3230_s24 + $0x2] sm:$0x1] }
  0xc3   : > { %v375_v46 = vsel %vm374_vm9, %v3352_v41, -inf  ;;  %v3359_v49 = vld.sshfl [vmem:[#allocation1 + $0x20] sm:$0xff pattern:$0x73625140]  ;;  %1074 = vst [vmem:[#allocation1] ss:$4 sm:$0xff] %v916_v38 }
  0xc4   : > { %4442 = vst [vmem:[#allocation6_spill] sm:$0xff] %v3359_v49  ;;  %376 = vmax.xlane.f32.xlu0 %v375_v46  ;;  %v1248_v46 = vld [vmem:[%s3230_s24 + $0x4] sm:$0x1] }
  0xc5   : > { %1078 = vst [vmem:[#allocation1 + $0x20] ss:$4 sm:$0xff] %v917_v42 }
  0xc6   : > { %v370_v50 = vpop.f32.mrf.mxu0 }
  0xc7   : > { %v1249_v50 = vld [vmem:[%s3230_s24 + $0x6] sm:$0x1] }
  0xca   : > { %v3363_v57 = vld.sshfl [vmem:[#allocation1] sm:$0xff pattern:$0x73625140] }
  0xcb   : > { %4443 = vst [vmem:[#allocation7_spill] sm:$0xff] %v3363_v57  ;;  %v671_v57 = vunpack.c.l.b16 %v3284_v43 }
  0xcc   : > { %v3365_v58 = vld.sshfl [vmem:[#allocation1 + $0x20] sm:$0xff pattern:$0x73625140]  ;;  %1082 = vst [vmem:[#allocation1] ss:$4 sm:$0xff] %v918_v53 }
  0xcd   : > { %4444 = vst [vmem:[#allocation8_spill] sm:$0xff] %v3365_v58  ;;  %v670_v58 = vunpack.c.l.b16 %v3280_v40  ;;  %v681_v43 = vrot.slane %v671_v57, 4 }
  0xce   : > { %1086 = vst [vmem:[#allocation1 + $0x20] ss:$4 sm:$0xff] %v919_v54 }
  0xd3   : > { %v3368_v63 = vld.sshfl [vmem:[#allocation1] sm:$0xff pattern:$0x73625140] }
  0xd4   : > { %4445 = vst [vmem:[#allocation9_spill] sm:$0xff] %v3368_v63  ;;  %v667_v63 = vunpack.c.l.b16 %v3272_v35  ;;  %v673_v35 = vunpack.c.l.b16 %v3290_v47  ;;  %v566_v47 = vld [vmem:[%s3205_s21 + $0xc] sm:$0x1] }
  0xd5   : > { %v3371_v2 = vld.sshfl [vmem:[#allocation1 + $0x20] sm:$0xff pattern:$0x73625140]  ;;  %1302 = vst [vmem:[#allocation1] ss:$4 sm:$0xff] %v1238_v61 }
  0xd6   : > { %4446 = vst [vmem:[#allocation10_spill] sm:$0xff] %v3371_v2  ;;  %v1250_v61 = vld [vmem:[%s3230_s24 + $0x8] sm:$0x1]  ;;  %v1573_v2 = vld [vmem:[%s3195_s17 + $0x4] sm:$0x2] }
  0xd7   : > { %1307 = vst [vmem:[#allocation1 + $0x20] ss:$4 sm:$0xff] %v1239_v1  ;;  %v1251_v1 = vld [vmem:[%s3230_s24 + $0xa] sm:$0x1] }
  0xdc   : > { %v3375_v9 = vld.sshfl [vmem:[#allocation1] sm:$0xff pattern:$0x73625140] }
  0xdd   : > { %1311 = vst [vmem:[#allocation1] ss:$4 sm:$0xff] %v1240_v5 }
  0xde   : > { %v3377_v10 = vld.sshfl [vmem:[#allocation1 + $0x20] sm:$0xff pattern:$0x73625140] }
  0xdf   : > { %1315 = vst [vmem:[#allocation1 + $0x20] ss:$4 sm:$0xff] %v1241_v6 }
  0xe4   : > { %v3381_v17 = vld.sshfl [vmem:[#allocation1] sm:$0xff pattern:$0x73625140] }
  0xe5   : > { %1319 = vst [vmem:[#allocation1] ss:$4 sm:$0xff] %v1242_v13  ;;  %v1252_v13 = vld [vmem:[%s3230_s24 + $0xc] sm:$0x1] }
  0xe6   : > { %v3383_v20 = vld.sshfl [vmem:[#allocation1 + $0x20] sm:$0xff pattern:$0x73625140] }
  0xe7   : > { %1323 = vst [vmem:[#allocation1 + $0x20] ss:$4 sm:$0xff] %v1243_v14  ;;  %v1253_v14 = vld [vmem:[%s3230_s24 + $0xe] sm:$0x1] }
  0xec   : > { %v3387_v25 = vld.sshfl [vmem:[#allocation1] sm:$0xff pattern:$0x73625140] }
  0xed   : > { %1327 = vst [vmem:[#allocation1] ss:$4 sm:$0xff] %v1244_v21 }
  0xee   : > { %v3389_v31 = vld.sshfl [vmem:[#allocation1 + $0x20] sm:$0xff pattern:$0x73625140] }
  0xef   : > { %1331 = vst [vmem:[#allocation1 + $0x20] ss:$4 sm:$0xff] %v1245_v22 }
  0xf4   : > { %v3393_v38 = vld.sshfl [vmem:[#allocation1] sm:$0xff pattern:$0x73625140] }
  0xf5   : > { %1391 = vst [vmem:[#allocation1] ss:$4 sm:$0xff] %v1246_v33  ;;  %v1571_v33 = vld [vmem:[%s3195_s17] sm:$0x2] }
  0xf6   : > { %v3395_v42 = vld.sshfl [vmem:[#allocation1 + $0x20] sm:$0xff pattern:$0x73625140] }
  0xf7   : > { %1396 = vst [vmem:[#allocation1 + $0x20] ss:$4 sm:$0xff] %v1247_v37 }
  0xfc   : > { %v3399_v53 = vld.sshfl [vmem:[#allocation1] sm:$0xff pattern:$0x73625140] }
  0xfd   : > { %4447 = vst [vmem:[#allocation11_spill] sm:$0xff] %v3399_v53 }
  0xfe   : > { %v3401_v54 = vld.sshfl [vmem:[#allocation1 + $0x20] sm:$0xff pattern:$0x73625140]  ;;  %1400 = vst [vmem:[#allocation1] ss:$4 sm:$0xff] %v1248_v46 }
  0xff   : > { %4448 = vst [vmem:[#allocation12_spill] sm:$0xff] %v3401_v54  ;;  %v1572_v46 = vld [vmem:[%s3195_s17 + $0x2] sm:$0x2] }
 0x100   : > { %1404 = vst [vmem:[#allocation1 + $0x20] ss:$4 sm:$0xff] %v1249_v50 }
 0x105   : > { %v3405_v5 = vld.sshfl [vmem:[#allocation1] sm:$0xff pattern:$0x73625140] }
 0x106   : > { %4449 = vst [vmem:[#allocation13_spill] sm:$0xff] %v3405_v5 }
 0x107   : > { %v3407_v6 = vld.sshfl [vmem:[#allocation1 + $0x20] sm:$0xff pattern:$0x73625140]  ;;  %1408 = vst [vmem:[#allocation1] ss:$4 sm:$0xff] %v1250_v61  ;;  %v668_v61 = vunpack.c.l.b16 %v3274_v36 }
 0x108   : > { %4450 = vst [vmem:[#allocation14_spill] sm:$0xff] %v3407_v6  ;;  %v570_v6 = vld [vmem:[%s3205_s21 + $0x1c] sm:$0x1] }
 0x109   : > { %1412 = vst [vmem:[#allocation1 + $0x20] ss:$4 sm:$0xff] %v1251_v1  ;;  %v669_v1 = vunpack.c.l.b16 %v3278_v39  ;;  %v679_v39 = vrot.slane %v670_v58, 5 }
 0x10b   : > { %v677_v49 = vrot.slane %v669_v1, 6  ;;  %v674_v1 = vunpack.c.l.b16 %v3292_v48  ;;  %v598_v48 = vunpack.c.l.b16 %v566_v47 }
 0x10d   : > { %v687_v57 = vrot.slane %v674_v1, 1 }
 0x10e   : > { %v3411_v21 = vld.sshfl [vmem:[#allocation1] sm:$0xff pattern:$0x73625140] }
 0x10f   : > { %4451 = vst [vmem:[#allocation15_spill] sm:$0xff] %v3411_v21  ;;  %v3006_v21 = vunpack.i.l.s16 %v598_v48  ;;  %v1575_v48 = vld [vmem:[%s3195_s17 + $0x8] sm:$0x2] }
 0x110   : > { %v3413_v22 = vld.sshfl [vmem:[#allocation1 + $0x20] sm:$0xff pattern:$0x73625140]  ;;  %1416 = vst [vmem:[#allocation1] ss:$4 sm:$0xff] %v1252_v13  ;;  %v675_v13 = vrot.slane %v668_v61, 7 }
 0x111   : > { %4452 = vst [vmem:[#allocation16_spill] sm:$0xff] %v3413_v22  ;;  %v563_v61 = vld [vmem:[%s3205_s21] sm:$0x1] }
 0x112   : > { %1420 = vst [vmem:[#allocation1 + $0x20] ss:$4 sm:$0xff] %v1253_v14  ;;  %v1574_v14 = vld [vmem:[%s3195_s17 + $0x6] sm:$0x2]  ;;  %v676_v36 = vsel %vm275_vm0, %v675_v13, %v667_v63  ;;  %v565_v13 = vld [vmem:[%s3205_s21 + $0x8] sm:$0x1]  ;;  %v595_v58 = vunpack.c.l.b16 %v563_v61 }
 0x113   : > { %v678_v40 = vsel %vm278_vm1, %v677_v49, %v676_v36  ;;  %v596_v36 = vunpack.c.l.b16 %v564_v26  ;;  %v602_v26 = vunpack.c.l.b16 %v570_v6  ;;  %v1334_v6 = vunpack.c.l.b16 %v3375_v9 }
 0x114   : > { %v1338_v9 = vunpack.c.l.b16 %v3387_v25 }
 0x115   : > { %v3004_v22 = vunpack.i.l.s16 %v596_v36 }
 0x117   : > { %v3416_v37 = vld.sshfl [vmem:[#allocation1] sm:$0xff pattern:$0x73625140] }
 0x118   : > { %4453 = vst [vmem:[#allocation17_spill] sm:$0xff] %v3416_v37 }
 0x119   : > { %v3419_v50 = vld.sshfl [vmem:[#allocation1 + $0x20] sm:$0xff pattern:$0x73625140]  ;;  %1635 = vst [vmem:[#allocation1] ss:$4 sm:$0xff] %v1571_v33  ;;  %v672_v33 = vunpack.c.l.b16 %v3286_v44  ;;  %v680_v44 = vsel %vm281_vm2, %v679_v39, %v678_v40  ;;  %v3003_v40 = vunpack.i.l.s16 %v595_v58 }
 0x11a   : > { %4454 = vst [vmem:[#allocation18_spill] sm:$0xff] %v3419_v50  ;;  %v682_v45 = vsel %vm284_vm3, %v681_v43, %v680_v44  ;;  %v597_v50 = vunpack.c.l.b16 %v565_v13  ;;  %v568_v39 = vld [vmem:[%s3205_s21 + $0x14] sm:$0x1]  ;;  %v569_v44 = vld [vmem:[%s3205_s21 + $0x18] sm:$0x1] }
 0x11b   : > { %1640 = vst [vmem:[#allocation1 + $0x20] ss:$4 sm:$0xff] %v1572_v46  ;;  %v683_v63 = vrot.slane %v672_v33, 3 }
 0x11c   : > { %v3005_v61 = vunpack.i.l.s16 %v597_v50 }
 0x11d   : > { %v684_v49 = vsel %vm287_vm4, %v683_v63, %v682_v45  ;;  %v601_v45 = vunpack.c.l.b16 %v569_v44  ;;  %v619_v63 = vrot.slane %v3003_v40, 1  ;;  %v1230_v40 = vld [vmem:[%s3205_s21] sm:$0x2]  ;;  %v1337_v44 = vunpack.c.l.b16 %v3383_v20 }
 0x11e   : > { %v621_v5 = vrot.slane %v3005_v61, 7  ;;  %v1576_v61 = vld [vmem:[%s3195_s17 + $0xa] sm:$0x2]  ;;  %v1262_v54 = vunpack.c.l.b16 %v1230_v40 }
 0x11f   : > { %v3009_v58 = vunpack.i.l.s16 %v601_v45  ;;  %v1233_v45 = vld [vmem:[%s3205_s21 + $0xc] sm:$0x2] }
 0x120   : > { %v3428_v29 = vld.sshfl [vmem:[#allocation1] sm:$0xff pattern:$0x73625140] }
 0x121   : > { %1644 = vst [vmem:[#allocation1] ss:$4 sm:$0xff] %v1573_v2  ;;  %v685_v2 = vrot.slane %v673_v35, 2  ;;  %v600_v35 = vunpack.c.l.b16 %v568_v39  ;;  %v629_v39 = vrot.slane %v3009_v58, 3  ;;  %v1342_v58 = vrot.slane %v1334_v6, 1 }
 0x122   : > { %v3432_v46 = vld.sshfl [vmem:[#allocation1 + $0x20] sm:$0xff pattern:$0x73625140] }
 0x123   : > { %1648 = vst [vmem:[#allocation1 + $0x20] ss:$4 sm:$0xff] %v1574_v14  ;;  %v567_v14 = vld [vmem:[%s3205_s21 + $0x10] sm:$0x1]  ;;  %v686_v37 = vsel %vm290_vm5, %v685_v2, %v684_v49  ;;  %v3008_v47 = vunpack.i.l.s16 %v600_v35  ;;  %v623_v2 = vrot.slane %v3006_v21, 6 }
 0x124   : > { %v599_v33 = vunpack.c.l.b16 %v567_v14  ;;  %v688_v43 = vsel %vm293_vm6, %v687_v57, %v686_v37  ;;  %v620_v37 = vsel %vm275_vm0, %v3004_v22, %v619_v63  ;;  %v3010_v57 = vunpack.i.l.s16 %v602_v26  ;;  %v1231_v35 = vld [vmem:[%s3205_s21 + $0x4] sm:$0x2]  ;;  %v1234_v26 = vld [vmem:[%s3205_s21 + $0x10] sm:$0x2] }
 0x125   : > { %v689_v13 = vpack.c.b16 %v688_v43, %v688_v43  ;;  %v622_v14 = vsel %vm278_vm1, %v621_v5, %v620_v37  ;;  %v627_v36 = vrot.slane %v3008_v47, 4  ;;  %v1336_v22 = vunpack.c.l.b16 %v3381_v17  ;;  %v1235_v47 = vld [vmem:[%s3205_s21 + $0x14] sm:$0x2] }
 0x126   : > { %v3007_v1 = vunpack.i.l.s16 %v599_v33  ;;  %v624_v21 = vsel %vm281_vm2, %v623_v2, %v622_v14  ;;  %v1335_v33 = vunpack.c.l.b16 %v3377_v10  ;;  %v631_v5 = vrot.slane %v3010_v57, 2  ;;  %v1236_v2 = vld [vmem:[%s3205_s21 + $0x18] sm:$0x2] }
 0x127   : > { %v694_v50 = vsel %vm352_vm7, %v689_v13, 0  ;;  %v1232_v13 = vld [vmem:[%s3205_s21 + $0x8] sm:$0x2]  ;;  %v1339_v10 = vunpack.c.l.b16 %v3389_v31  ;;  %v1340_v63 = vunpack.c.l.b16 %v3393_v38  ;;  %v1341_v17 = vunpack.c.l.b16 %v3395_v42 }
 0x128   : > { %v625_v49 = vrot.slane %v3007_v1, 5  ;;  %703 = vmatpush.bf16.xpose.msra.mxu2 %v694_v50  ;;  %v3473_v50 = vld.sshfl [vmem:[#allocation1] sm:$0xff pattern:$0x73625140]  ;;  %v1344_v37 = vrot.slane %v1336_v22, 7  ;;  %v1348_v57 = vrot.slane %v1338_v9, 5  ;;  %v1263_v0 = vunpack.c.l.b16 %v1231_v35 }
 0x129   : > { %1652 = vst [vmem:[#allocation1] ss:$4 sm:$0xff] %v1575_v48  ;;  %v1350_v38 = vrot.slane %v1339_v10, 4  ;;  %v1352_v14 = vrot.slane %v1340_v63, 3  ;;  %v1264_v6 = vunpack.c.l.b16 %v1232_v13  ;;  %v1266_v22 = vunpack.c.l.b16 %v1234_v26  ;;  %v1577_v13 = vld [vmem:[%s3195_s17 + $0xc] sm:$0x2] }
 0x12a   : > { %v626_v43 = vsel %vm284_vm3, %v625_v49, %v624_v21  ;;  %v3475_v20 = vld.sshfl [vmem:[#allocation1 + $0x20] sm:$0xff pattern:$0x73625140]  ;;  %v1346_v49 = vrot.slane %v1337_v44, 6  ;;  %v1354_v21 = vrot.slane %v1341_v17, 2  ;;  %v3031_v9 = vunpack.i.l.s16 %v1262_v54 }
 0x12b   : > { %v628_v1 = vsel %vm287_vm4, %v627_v36, %v626_v43  ;;  %1656 = vst [vmem:[#allocation1 + $0x20] ss:$4 sm:$0xff] %v1576_v61  ;;  %v1343_v36 = vsel %vm275_vm0, %v1335_v33, %v1342_v58  ;;  %v1237_v43 = vld [vmem:[%s3205_s21 + $0x1c] sm:$0x2]  ;;  %v1268_v61 = vunpack.c.l.b16 %v1236_v2  ;;  %v3033_v10 = vunpack.i.l.s16 %v1264_v6  ;;  %v1578_v26 = vld [vmem:[%s3195_s17 + $0xe] sm:$0x2] }
 0x12c   : > { %v630_v25 = vsel %vm290_vm5, %v629_v39, %v628_v1  ;;  %v1345_v53 = vsel %vm278_vm1, %v1344_v37, %v1343_v36  ;;  %v1265_v39 = vunpack.c.l.b16 %v1233_v45  ;;  %v1269_v33 = vunpack.c.l.b16 %v1237_v43 }
 0x12d   : > { %v632_v31 = vsel %vm293_vm6, %v631_v5, %v630_v25  ;;  %v1347_v48 = vsel %vm281_vm2, %v1346_v49, %v1345_v53  ;;  %v1267_v5 = vunpack.c.l.b16 %v1235_v47  ;;  %v3032_v1 = vunpack.i.l.s16 %v1263_v0 }
 0x12e   : > { %v633_v42 = vpack.c.b16 %v632_v31, %v632_v31  ;;  %v1349_v44 = vsel %vm284_vm3, %v1348_v57, %v1347_v48  ;;  %v3034_v35 = vunpack.i.l.s16 %v1265_v39  ;;  %v3035_v63 = vunpack.i.l.s16 %v1266_v22 }
 0x12f   : > { %v1351_v40 = vsel %vm287_vm4, %v1350_v38, %v1349_v44  ;;  %v3036_v17 = vunpack.i.l.s16 %v1267_v5  ;;  %v3037_v25 = vunpack.i.l.s16 %v1268_v61  ;;  %v3038_v53 = vunpack.i.l.s16 %v1269_v33  ;;  %v1579_v5 = vld [vmem:[%s3230_s24] sm:$0x2]  ;;  %v1580_v33 = vld [vmem:[%s3230_s24 + $0x2] sm:$0x2] }
 0x130   : > { %3011 = vmatmul.msk.bf16.vlgmr.msra.gmra.mxu2 %vm352_vm7, %v633_v42  ;;  %v1353_v45 = vsel %vm290_vm5, %v1352_v14, %v1351_v40  ;;  %v3489_v58 = vld.sshfl [vmem:[#allocation1] sm:$0xff pattern:$0x73625140]  ;;  %v1286_v2 = vrot.slane %v3031_v9, 3  ;;  %v1287_v37 = vrot.slane %v3032_v1, 2  ;;  %v1289_v54 = vrot.slane %v3033_v10, 1 }
 0x131   : > { %v1355_v47 = vsel %vm293_vm6, %v1354_v21, %v1353_v45  ;;  %v1292_v31 = vrot.slane %v3035_v63, 7  ;;  %1660 = vst [vmem:[#allocation1] ss:$4 sm:$0xff] %v1577_v13  ;;  %v1294_v38 = vrot.slane %v3036_v17, 6  ;;  %v1296_v36 = vrot.slane %v3037_v25, 5 }
 0x132   : > { %v3492_v0 = vld.sshfl [vmem:[#allocation1 + $0x20] sm:$0xff pattern:$0x73625140]  ;;  %v1356_v49 = vpack.c.b16 %v1355_v47, %v1355_v47  ;;  %v1288_v57 = vsel %vm275_vm0, %v1287_v37, %v1286_v2  ;;  %v1298_v6 = vrot.slane %v3038_v53, 4  ;;  %v1583_v25 = vld [vmem:[%s3230_s24 + $0x8] sm:$0x2] }
 0x133   : > { %1664 = vst [vmem:[#allocation1 + $0x20] ss:$4 sm:$0xff] %v1578_v26  ;;  %v1290_v42 = vsel %vm278_vm1, %v1289_v54, %v1288_v57  ;;  %v1582_v63 = vld [vmem:[%s3230_s24 + $0x6] sm:$0x2]  ;;  %v1584_v53 = vld [vmem:[%s3230_s24 + $0xa] sm:$0x2] }
 0x134   : > { %v1361_v14 = vsel %vm352_vm7, %v1356_v49, 0  ;;  %v1291_v43 = vsel %vm281_vm2, %v3034_v35, %v1290_v42  ;;  %v1585_v2 = vld [vmem:[%s3230_s24 + $0xc] sm:$0x2]  ;;  %v1586_v37 = vld [vmem:[%s3230_s24 + $0xe] sm:$0x2] }
 0x135   : > { %1370 = vmatpush.bf16.xpose.msrb.mxu0 %v1361_v14  ;;  %v1293_v48 = vsel %vm284_vm3, %v1292_v31, %v1291_v43  ;;  %v1905_v31 = vld [vmem:[%s3195_s17] sm:$0x2]  ;;  %v1906_v57 = vld [vmem:[%s3195_s17 + $0x2] sm:$0x2]  ;;  %v1907_v42 = vld [vmem:[%s3195_s17 + $0x4] sm:$0x2] }
 0x136   : > { %v1295_v22 = vsel %vm287_vm4, %v1294_v38, %v1293_v48  ;;  %v1899_v48 = vld [vmem:[%s3205_s21 + $0x8] sm:$0x4] }
 0x137   : > { %v377_v21 = vpop.xlane.xlu0 %376  ;;  %v1297_v44 = vsel %vm290_vm5, %v1296_v36, %v1295_v22  ;;  %v1908_v36 = vld [vmem:[%s3195_s17 + $0x6] sm:$0x2] }
 0x138   : > { %v378_v39 = vsub.f32 %v3352_v41, %v377_v21  ;;  %v1299_v9 = vsel %vm293_vm6, %v1298_v6, %v1297_v44  ;;  %v3505_v1 = vld.sshfl [vmem:[#allocation1] sm:$0xff pattern:$0x73625140] }
 0x139   : > { %v1300_v40 = vpack.c.b16 %v1299_v9, %v1299_v9  ;;  %1724 = vst [vmem:[#allocation1] ss:$4 sm:$0xff] %v1579_v5  ;;  %v1581_v41 = vld [vmem:[%s3230_s24 + $0x4] sm:$0x2]  ;;  %v1897_v21 = vld [vmem:[%s3205_s21] sm:$0x4] }
 0x13a   : > { %v379_v61 = vmul.f32 1.442695, %v378_v39  ;;  %v3507_v10 = vld.sshfl [vmem:[#allocation1 + $0x20] sm:$0xff pattern:$0x73625140]  ;;  %v1929_v22 = vunpack.c.l.b16 %v1897_v21 }
 0x13b   : > { %1729 = vst [vmem:[#allocation1 + $0x20] ss:$4 sm:$0xff] %v1580_v33  ;;  %v1898_v6 = vld [vmem:[%s3205_s21 + $0x4] sm:$0x4]  ;;  %v1910_v9 = vld [vmem:[%s3195_s17 + $0xa] sm:$0x2] }
 0x13c   : > { %3117 = vpow2.f32 %v379_v61  ;;  %3039 = vmatmul.msk.bf16.vlgmr.msrb.gmra.mxu0 %vm352_vm7, %v1300_v40  ;;  %v1930_v5 = vunpack.c.l.b16 %v1898_v6  ;;  %v1909_v61 = vld [vmem:[%s3195_s17 + $0x8] sm:$0x2]  ;;  %v1900_v40 = vld [vmem:[%s3205_s21 + $0xc] sm:$0x4] }
 0x140   : > { %v3516_v45 = vld.sshfl [vmem:[#allocation1] sm:$0xff pattern:$0x73625140] }
 0x141   : > { %1733 = vst [vmem:[#allocation1] ss:$4 sm:$0xff] %v1581_v41  ;;  %v1931_v41 = vunpack.c.l.b16 %v1899_v48  ;;  %v1911_v48 = vld [vmem:[%s3195_s17 + $0xc] sm:$0x2] }
 0x142   : > { %v3511_v35 = vpop.eup %3117  ;;  %v3518_v17 = vld.sshfl [vmem:[#allocation1 + $0x20] sm:$0xff pattern:$0x73625140] }
 0x143   : > { %v381_v13 = vsel %vm374_vm9, %v3511_v35, 0.0  ;;  %1737 = vst [vmem:[#allocation1 + $0x20] ss:$4 sm:$0xff] %v1582_v63 }
 0x144   : > { %382 = vadd.xlane.f32.xlu0 %v381_v13  ;;  %v3059_v13 = vunpack.i.l.s16 %v1929_v22 }
 0x146   : > { %v1953_v21 = vrot.slane %v3059_v13, 5 }
 0x148   : > { %v3522_v26 = vld.sshfl [vmem:[#allocation1] sm:$0xff pattern:$0x73625140] }
 0x149   : > { %1741 = vst [vmem:[#allocation1] ss:$4 sm:$0xff] %v1583_v25  ;;  %v3060_v25 = vunpack.i.l.s16 %v1930_v5 }
 0x14a   : > { %v3524_v47 = vld.sshfl [vmem:[#allocation1 + $0x20] sm:$0xff pattern:$0x73625140] }
 0x14b   : > { %1745 = vst [vmem:[#allocation1 + $0x20] ss:$4 sm:$0xff] %v1584_v53 }
 0x150   : > { %v3528_v54 = vld.sshfl [vmem:[#allocation1] sm:$0xff pattern:$0x73625140] }
 0x151   : > { %4455 = vst [vmem:[#allocation19_spill] sm:$0xff] %v3528_v54 }
 0x152   : > { %v3530_v49 = vld.sshfl [vmem:[#allocation1 + $0x20] sm:$0xff pattern:$0x73625140]  ;;  %1749 = vst [vmem:[#allocation1] ss:$4 sm:$0xff] %v1585_v2 }
 0x153   : > { %4456 = vst [vmem:[#allocation20_spill] sm:$0xff] %v3530_v49 }
 0x154   : > { %1753 = vst [vmem:[#allocation1 + $0x20] ss:$4 sm:$0xff] %v1586_v37 }
 0x159   : > { %v3534_v38 = vld.sshfl [vmem:[#allocation1] sm:$0xff pattern:$0x73625140] }
 0x15a   : > { %4457 = vst [vmem:[#allocation21_spill] sm:$0xff] %v3534_v38 }
 0x15b   : > { %v3536_v14 = vld.sshfl [vmem:[#allocation1 + $0x20] sm:$0xff pattern:$0x73625140]  ;;  %1969 = vst [vmem:[#allocation1] ss:$4 sm:$0xff] %v1905_v31 }
 0x15c   : > { %4458 = vst [vmem:[#allocation22_spill] sm:$0xff] %v3536_v14  ;;  %v1901_v31 = vld [vmem:[%s3205_s21 + $0x10] sm:$0x4]  ;;  %v1912_v14 = vld [vmem:[%s3195_s17 + $0xe] sm:$0x2] }
 0x15d   : > { %1974 = vst [vmem:[#allocation1 + $0x20] ss:$4 sm:$0xff] %v1906_v57  ;;  %v1932_v57 = vunpack.c.l.b16 %v1900_v40 }
 0x15f   : > { %v3062_v5 = vunpack.i.l.s16 %v1932_v57 }
 0x162   : > { %v1970_v43 = vld.sshfl [vmem:[#allocation1] sm:$0xff pattern:$0x73625140] }
 0x163   : > { %1978 = vst [vmem:[#allocation1] ss:$4 sm:$0xff] %v1907_v42  ;;  %v2001_v44 = vunpack.c.l.b16 %v1970_v43  ;;  %v3061_v42 = vunpack.i.l.s16 %v1931_v41  ;;  %v1954_v43 = vrot.slane %v3060_v25, 4 }
 0x164   : > { %v1975_v39 = vld.sshfl [vmem:[#allocation1 + $0x20] sm:$0xff pattern:$0x73625140] }
 0x165   : > { %1982 = vst [vmem:[#allocation1 + $0x20] ss:$4 sm:$0xff] %v1908_v36  ;;  %v2002_v33 = vunpack.c.l.b16 %v1975_v39  ;;  %v2009_v2 = vrot.slane %v2001_v44, 2  ;;  %v1933_v39 = vunpack.c.l.b16 %v1901_v31  ;;  %v1956_v38 = vrot.slane %v3061_v42, 3 }
 0x166   : > { %v1955_v49 = vsel %vm275_vm0, %v1954_v43, %v1953_v21  ;;  %v1913_v43 = vld [vmem:[%s3230_s24] sm:$0x2] }
 0x167   : > { %v2010_v37 = vrot.slane %v2002_v33, 1  ;;  %v1902_v33 = vld [vmem:[%s3205_s21 + $0x14] sm:$0x4]  ;;  %v3063_v13 = vunpack.i.l.s16 %v1933_v39  ;;  %v1957_v57 = vsel %vm278_vm1, %v1956_v38, %v1955_v49 }
 0x169   : > { %v2011_v22 = vsel %vm275_vm0, %v2010_v37, %v2009_v2  ;;  %v1904_v37 = vld [vmem:[%s3205_s21 + $0x1c] sm:$0x4]  ;;  %v1960_v21 = vrot.slane %v3063_v13, 1 }
 0x16a   : > { %v1979_v63 = vld.sshfl [vmem:[#allocation1] sm:$0xff pattern:$0x73625140] }
 0x16b   : > { %1986 = vst [vmem:[#allocation1] ss:$4 sm:$0xff] %v1909_v61  ;;  %v2003_v6 = vunpack.c.l.b16 %v1979_v63  ;;  %v1903_v61 = vld [vmem:[%s3205_s21 + $0x18] sm:$0x4] }
 0x16c   : > { %v1983_v53 = vld.sshfl [vmem:[#allocation1 + $0x20] sm:$0xff pattern:$0x73625140]  ;;  %v1935_v31 = vunpack.c.l.b16 %v1903_v61 }
 0x16d   : > { %1990 = vst [vmem:[#allocation1 + $0x20] ss:$4 sm:$0xff] %v1910_v9  ;;  %v2004_v36 = vunpack.c.l.b16 %v1983_v53  ;;  %v2012_v63 = vsel %vm278_vm1, %v2003_v6, %v2011_v22  ;;  %v1958_v53 = vrot.slane %v3062_v5, 2  ;;  %v1914_v6 = vld [vmem:[%s3230_s24 + $0x2] sm:$0x2] }
 0x16f   : > { %v2013_v44 = vrot.slane %v2004_v36, 7  ;;  %v1934_v36 = vunpack.c.l.b16 %v1902_v33 }
 0x171   : > { %v2014_v42 = vsel %vm281_vm2, %v2013_v44, %v2012_v63  ;;  %v3064_v5 = vunpack.i.l.s16 %v1934_v36 }
 0x172   : > { %v1987_v9 = vld.sshfl [vmem:[#allocation1] sm:$0xff pattern:$0x73625140] }
 0x173   : > { %1994 = vst [vmem:[#allocation1] ss:$4 sm:$0xff] %v1911_v48  ;;  %v2005_v41 = vunpack.c.l.b16 %v1987_v9  ;;  %v1936_v48 = vunpack.c.l.b16 %v1904_v37  ;;  %v1959_v9 = vsel %vm281_vm2, %v1958_v53, %v1957_v57  ;;  %v1916_v57 = vld [vmem:[%s3230_s24 + $0x6] sm:$0x2] }
 0x174   : > { %v1991_v40 = vld.sshfl [vmem:[#allocation1 + $0x20] sm:$0xff pattern:$0x73625140]  ;;  %v1961_v49 = vsel %vm284_vm3, %v1960_v21, %v1959_v9 }
 0x175   : > { %1998 = vst [vmem:[#allocation1 + $0x20] ss:$4 sm:$0xff] %v1912_v14  ;;  %v2006_v25 = vunpack.c.l.b16 %v1991_v40  ;;  %v2015_v2 = vrot.slane %v2005_v41, 6  ;;  %v3065_v14 = vunpack.i.l.s16 %v1935_v31  ;;  %v3066_v33 = vunpack.i.l.s16 %v1936_v48 }
 0x177   : > { %v2017_v54 = vrot.slane %v2006_v25, 5  ;;  %v2016_v39 = vsel %vm284_vm3, %v2015_v2, %v2014_v42  ;;  %v1963_v63 = vrot.slane %v3065_v14, 7  ;;  %v1962_v25 = vsel %vm287_vm4, %v3064_v5, %v1961_v49  ;;  %v1915_v2 = vld [vmem:[%s3230_s24 + $0x4] sm:$0x2]  ;;  %v1919_v5 = vld [vmem:[%s3230_s24 + $0xc] sm:$0x2] }
 0x178   : > { %v1965_v31 = vrot.slane %v3066_v33, 6  ;;  %v422_v33 = vunpack.c.l.b16 %v3253_v23 }
 0x179   : > { %v2018_v44 = vsel %vm287_vm4, %v2017_v54, %v2016_v39  ;;  %v1964_v36 = vsel %vm290_vm5, %v1963_v63, %v1962_v25  ;;  %v1918_v39 = vld [vmem:[%s3230_s24 + $0xa] sm:$0x2]  ;;  %v424_v63 = vunpack.c.l.b16 %v3260_v27  ;;  %v426_v25 = vunpack.c.l.b16 %v3265_v30 }
 0x17a   : > { %v1995_v22 = vld.sshfl [vmem:[#allocation1] sm:$0xff pattern:$0x73625140]  ;;  %v1966_v48 = vsel %vm293_vm6, %v1965_v31, %v1964_v36 }
 0x17b   : > { %v2007_v61 = vunpack.c.l.b16 %v1995_v22  ;;  %2058 = vst [vmem:[#allocation1] ss:$4 sm:$0xff] %v1913_v43  ;;  %v1967_v9 = vpack.c.b16 %v1966_v48, %v1966_v48  ;;  %v2239_v36 = vld [vmem:[%s3195_s17 + $0x2] sm:$0x2] }
 0x17c   : > { %v1999_v40 = vld.sshfl [vmem:[#allocation1 + $0x20] sm:$0xff pattern:$0x73625140] }
 0x17d   : > { %v2008_v38 = vunpack.c.l.b16 %v1999_v40  ;;  %2063 = vst [vmem:[#allocation1 + $0x20] ss:$4 sm:$0xff] %v1914_v6  ;;  %v2019_v41 = vrot.slane %v2007_v61, 4  ;;  %v1917_v6 = vld [vmem:[%s3230_s24 + $0x8] sm:$0x2] }
 0x17e   : > { %v1920_v40 = vld [vmem:[%s3230_s24 + $0xe] sm:$0x2] }
 0x17f   : > { %v2021_v13 = vrot.slane %v2008_v38, 3  ;;  %v2020_v53 = vsel %vm290_vm5, %v2019_v41, %v2018_v44  ;;  %v420_v38 = vunpack.c.l.b16 %v3245_v16  ;;  %v421_v44 = vunpack.c.l.b16 %v3248_v18 }
 0x180   : > { %v423_v41 = vunpack.c.l.b16 %v3256_v24 }
 0x181   : > { %v2022_v37 = vsel %vm293_vm6, %v2021_v13, %v2020_v53  ;;  %v425_v13 = vunpack.c.l.b16 %v3262_v28  ;;  %v427_v53 = vunpack.c.l.b16 %v3268_v32  ;;  %v438_v28 = vrot.slane %v426_v25, 2 }
 0x182   : > { %v2023_v42 = vpack.c.b16 %v2022_v37, %v2022_v37  ;;  %v3569_v54 = vld.sshfl [vmem:[#allocation1] sm:$0xff pattern:$0x73625140]  ;;  %v430_v37 = vrot.slane %v422_v33, 6  ;;  %v432_v31 = vrot.slane %v423_v41, 5  ;;  %v1004_v33 = vunpack.c.l.b16 %v3332_v11 }
 0x183   : > { %2067 = vst [vmem:[#allocation1] ss:$4 sm:$0xff] %v1915_v2  ;;  %v428_v2 = vrot.slane %v421_v44, 7  ;;  %v436_v16 = vrot.slane %v425_v13, 3  ;;  %v440_v32 = vrot.slane %v427_v53, 1  ;;  %v1003_v44 = vunpack.c.l.b16 %v3328_v8 }
 0x184   : > { %v2028_v21 = vsel %vm352_vm7, %v2023_v42, 0  ;;  %v3572_v43 = vld.sshfl [vmem:[#allocation1 + $0x20] sm:$0xff pattern:$0x73625140]  ;;  %v434_v42 = vrot.slane %v424_v63, 4  ;;  %v1005_v41 = vunpack.c.l.b16 %v3334_v12  ;;  %v1006_v63 = vunpack.c.l.b16 %v3338_v15 }
 0x185   : > { %2037 = vmatpush.bf16.xpose.msra.mxu0 %v2028_v21  ;;  %2071 = vst [vmem:[#allocation1 + $0x20] ss:$4 sm:$0xff] %v1916_v57  ;;  %v2238_v57 = vld [vmem:[%s3195_s17] sm:$0x2]  ;;  %v429_v18 = vsel %vm275_vm0, %v428_v2, %v420_v38  ;;  %v1002_v38 = vunpack.c.l.b16 %v3326_v7  ;;  %v1007_v25 = vunpack.c.l.b16 %v3340_v19  ;;  %v1014_v2 = vrot.slane %v1004_v33, 5 }
 0x186   : > { %v431_v27 = vsel %vm278_vm1, %v430_v37, %v429_v18  ;;  %v2240_v7 = vld [vmem:[%s3195_s17 + $0x4] sm:$0x2]  ;;  %v2241_v8 = vld [vmem:[%s3195_s17 + $0x6] sm:$0x2]  ;;  %v1016_v11 = vrot.slane %v1005_v41, 4 }
 0x187   : > { %v433_v30 = vsel %vm281_vm2, %v432_v31, %v431_v27  ;;  %v1018_v31 = vrot.slane %v1006_v63, 3  ;;  %v897_v12 = vld [vmem:[%s3205_s21 + $0x4] sm:$0x2]  ;;  %v2243_v33 = vld [vmem:[%s3195_s17 + $0xa] sm:$0x2] }
 0x188   : > { %v435_v21 = vsel %vm284_vm3, %v434_v42, %v433_v30  ;;  %v901_v63 = vld [vmem:[%s3205_s21 + $0x14] sm:$0x2] }
 0x189   : > { %v437_v48 = vsel %vm287_vm4, %v436_v16, %v435_v21 }
 0x18a   : > { %v3577_v14 = vld.sshfl [vmem:[#allocation1] sm:$0xff pattern:$0x73625140] }
 0x18b   : > { %2075 = vst [vmem:[#allocation1] ss:$4 sm:$0xff] %v1917_v6 }
 0x18c   : > { %v3579_v22 = vld.sshfl [vmem:[#allocation1 + $0x20] sm:$0xff pattern:$0x73625140]  ;;  %3067 = vmatmul.msk.bf16.vlgmr.msra.gmra.mxu0 %vm352_vm7, %v1967_v9  ;;  %v439_v9 = vsel %vm290_vm5, %v438_v28, %v437_v48  ;;  %v899_v28 = vld [vmem:[%s3205_s21 + $0xc] sm:$0x2] }
 0x18d   : > { %2079 = vst [vmem:[#allocation1 + $0x20] ss:$4 sm:$0xff] %v1918_v39  ;;  %v441_v6 = vsel %vm293_vm6, %v440_v32, %v439_v9  ;;  %v929_v32 = vunpack.c.l.b16 %v897_v12  ;;  %v1670_v12 = vunpack.c.l.b16 %v3475_v20 }
 0x18e   : > { %v442_v39 = vpack.c.b16 %v441_v6, %v441_v6  ;;  %v898_v6 = vld [vmem:[%s3205_s21 + $0x8] sm:$0x2] }
 0x190   : > { %v448_v13 = vsel %vm446_vm10, %v442_v39, 0  ;;  %v931_v39 = vunpack.c.l.b16 %v899_v28  ;;  %v2244_v28 = vld [vmem:[%s3195_s17 + $0xc] sm:$0x2] }
 0x191   : > { %457 = vmatpush.bf16.msra.mxu1 %v448_v13 }
 0x192   : > { %v3584_v61 = vld.sshfl [vmem:[#allocation1] sm:$0xff pattern:$0x73625140] }
 0x193   : > { %2083 = vst [vmem:[#allocation1] ss:$4 sm:$0xff] %v1919_v5  ;;  %v1000_v5 = vunpack.c.l.b16 %v3320_v3  ;;  %v1010_v3 = vrot.slane %v1002_v38, 7 }
 0x194   : > { %v3586_v49 = vld.sshfl [vmem:[#allocation1 + $0x20] sm:$0xff pattern:$0x73625140] }
 0x195   : > { %2087 = vst [vmem:[#allocation1 + $0x20] ss:$4 sm:$0xff] %v1920_v40  ;;  %v1001_v40 = vunpack.c.l.b16 %v3322_v4  ;;  %v1008_v53 = vrot.slane %v1000_v5, 1  ;;  %v1012_v4 = vrot.slane %v1003_v44, 6  ;;  %v2242_v5 = vld [vmem:[%s3195_s17 + $0x8] sm:$0x2]  ;;  %v3018_v44 = vunpack.i.l.s16 %v929_v32 }
 0x197   : > { %v1009_v37 = vsel %vm275_vm0, %v1001_v40, %v1008_v53  ;;  %v900_v40 = vld [vmem:[%s3205_s21 + $0x10] sm:$0x2] }
 0x198   : > { %v1011_v15 = vsel %vm278_vm1, %v1010_v3, %v1009_v37  ;;  %v932_v3 = vunpack.c.l.b16 %v900_v40  ;;  %v1667_v37 = vunpack.c.l.b16 %v3428_v29  ;;  %v1674_v29 = vunpack.c.l.b16 %v3507_v10  ;;  %v1563_v10 = vld [vmem:[%s3205_s21] sm:$0x4] }
 0x199   : > { %v1013_v16 = vsel %vm281_vm2, %v1012_v4, %v1011_v15  ;;  %v3020_v4 = vunpack.i.l.s16 %v931_v39  ;;  %v1671_v15 = vunpack.c.l.b16 %v3489_v58  ;;  %v2245_v39 = vld [vmem:[%s3195_s17 + $0xe] sm:$0x2] }
 0x19a   : > { %v3599_v23 = vld.sshfl [vmem:[#allocation1] sm:$0xff pattern:$0x73625140]  ;;  %v1015_v18 = vsel %vm284_vm3, %v1014_v2, %v1013_v16  ;;  %v3021_v20 = vunpack.i.l.s16 %v932_v3 }
 0x19b   : > { %2302 = vst [vmem:[#allocation1] ss:$4 sm:$0xff] %v2238_v57  ;;  %v896_v57 = vld [vmem:[%s3205_s21] sm:$0x2]  ;;  %v1017_v27 = vsel %vm287_vm4, %v1016_v11, %v1015_v18  ;;  %v1668_v11 = vunpack.c.l.b16 %v3432_v46  ;;  %v1672_v18 = vunpack.c.l.b16 %v3492_v0  ;;  %v1675_v46 = vrot.slane %v1667_v37, 2 }
 0x19c   : > { %v3601_v24 = vld.sshfl [vmem:[#allocation1 + $0x20] sm:$0xff pattern:$0x73625140]  ;;  %v928_v30 = vunpack.c.l.b16 %v896_v57  ;;  %v1019_v21 = vsel %vm290_vm5, %v1018_v31, %v1017_v27  ;;  %v933_v31 = vunpack.c.l.b16 %v901_v63  ;;  %v1673_v27 = vunpack.c.l.b16 %v3505_v1 }
 0x19d   : > { %2307 = vst [vmem:[#allocation1 + $0x20] ss:$4 sm:$0xff] %v2239_v36  ;;  %v1020_v36 = vrot.slane %v1007_v25, 2  ;;  %v930_v25 = vunpack.c.l.b16 %v898_v6  ;;  %v1676_v32 = vrot.slane %v1668_v11, 1  ;;  %v1681_v6 = vrot.slane %v1671_v15, 6 }
 0x19e   : > { %v3017_v38 = vunpack.i.l.s16 %v928_v30  ;;  %v902_v30 = vld [vmem:[%s3205_s21 + $0x18] sm:$0x2]  ;;  %v1683_v0 = vrot.slane %v1672_v18, 5  ;;  %v958_v11 = vrot.slane %v3021_v20, 6 }
 0x19f   : > { %v1021_v48 = vsel %vm293_vm6, %v1020_v36, %v1019_v21  ;;  %v3019_v16 = vunpack.i.l.s16 %v930_v25  ;;  %v1669_v36 = vunpack.c.l.b16 %v3473_v50  ;;  %v1679_v21 = vrot.slane %v1670_v12, 7 }
 0x1a0   : > { %v1022_v9 = vpack.c.b16 %v1021_v48, %v1021_v48  ;;  %v952_v2 = vrot.slane %v3017_v38, 2  ;;  %v1677_v50 = vsel %vm275_vm0, %v1676_v32, %v1675_v46  ;;  %v934_v40 = vunpack.c.l.b16 %v902_v30 }
 0x1a1   : > { %v1678_v38 = vsel %vm278_vm1, %v1669_v36, %v1677_v50  ;;  %v1687_v25 = vrot.slane %v1674_v29, 3  ;;  %v1595_v36 = vunpack.c.l.b16 %v1563_v10  ;;  %v2246_v29 = vld [vmem:[%s3230_s24] sm:$0x2] }
 0x1a2   : > { %v3624_v42 = vld.sshfl [vmem:[#allocation1] sm:$0xff pattern:$0x73625140]  ;;  %v1027_v41 = vsel %vm352_vm7, %v1022_v9, 0  ;;  %v956_v9 = vrot.slane %v3020_v4, 7  ;;  %v1680_v63 = vsel %vm281_vm2, %v1679_v21, %v1678_v38  ;;  %v3023_v30 = vunpack.i.l.s16 %v934_v40 }
 0x1a3   : > { %2311 = vst [vmem:[#allocation1] ss:$4 sm:$0xff] %v2240_v7  ;;  %1036 = vmatpush.bf16.xpose.msrb.mxu1 %v1027_v41  ;;  %v953_v7 = vrot.slane %v3018_v44, 1  ;;  %v1685_v44 = vrot.slane %v1673_v27, 4  ;;  %v1564_v4 = vld [vmem:[%s3205_s21 + $0x4] sm:$0x4] }
 0x1a4   : > { %v3626_v19 = vld.sshfl [vmem:[#allocation1 + $0x20] sm:$0xff pattern:$0x73625140]  ;;  %v1596_v18 = vunpack.c.l.b16 %v1564_v4 }
 0x1a5   : > { %2315 = vst [vmem:[#allocation1 + $0x20] ss:$4 sm:$0xff] %v2241_v8  ;;  %v954_v58 = vsel %vm275_vm0, %v953_v7, %v952_v2  ;;  %v903_v2 = vld [vmem:[%s3205_s21 + $0x1c] sm:$0x2]  ;;  %v3022_v7 = vunpack.i.l.s16 %v933_v31 }
 0x1a6   : > { %v955_v41 = vsel %vm278_vm1, %v3019_v16, %v954_v58  ;;  %v1565_v16 = vld [vmem:[%s3205_s21 + $0x8] sm:$0x4]  ;;  %v1566_v58 = vld [vmem:[%s3205_s21 + $0xc] sm:$0x4]  ;;  %v3046_v10 = vunpack.i.l.s16 %v1596_v18 }
 0x1a7   : > { %v957_v12 = vsel %vm281_vm2, %v956_v9, %v955_v41  ;;  %v960_v32 = vrot.slane %v3022_v7, 5  ;;  %v1597_v9 = vunpack.c.l.b16 %v1565_v16  ;;  %v2334_v41 = vunpack.c.l.b16 %v3624_v42  ;;  %v2249_v42 = vld [vmem:[%s3230_s24 + $0x6] sm:$0x2] }
 0x1a8   : > { %v959_v20 = vsel %vm284_vm3, %v958_v11, %v957_v12  ;;  %v1598_v4 = vunpack.c.l.b16 %v1566_v58  ;;  %v1620_v11 = vrot.slane %v3046_v10, 3  ;;  %v2230_v10 = vld [vmem:[%s3205_s21] sm:$0x8] }
 0x1a9   : > { %v2342_v12 = vrot.slane %v2334_v41, 3 }
 0x1aa   : > { %v3640_v13 = vld.sshfl [vmem:[#allocation1] sm:$0xff pattern:$0x73625140] }
 0x1ab   : > { %2319 = vst [vmem:[#allocation1] ss:$4 sm:$0xff] %v2242_v5 }
 0x1ac   : > { %v3642_v53 = vld.sshfl [vmem:[#allocation1 + $0x20] sm:$0xff pattern:$0x73625140] }
 0x1ad   : > { %2323 = vst [vmem:[#allocation1 + $0x20] ss:$4 sm:$0xff] %v2243_v33 }
 0x1b2   : > { %v3661_v5 = vld.sshfl [vmem:[#allocation1] sm:$0xff pattern:$0x73625140] }
 0x1b3   : > { %v705_v8 = vpop.f32.mrf.mxu2  ;;  %2327 = vst [vmem:[#allocation1] ss:$4 sm:$0xff] %v2244_v28  ;;  %v935_v28 = vunpack.c.l.b16 %v903_v2  ;;  %v3047_v2 = vunpack.i.l.s16 %v1597_v9  ;;  %v2338_v7 = vunpack.c.l.b16 %v3661_v5 }
 0x1b4   : > { %v709_v57 = vmul.f32 0.17677669, %v705_v8  ;;  %v3664_v33 = vld.sshfl [vmem:[#allocation1 + $0x20] sm:$0xff pattern:$0x73625140]  ;;  %v1682_v8 = vsel %vm284_vm3, %v1681_v6, %v1680_v63  ;;  %v2335_v63 = vunpack.c.l.b16 %v3626_v19  ;;  %v2337_v19 = vunpack.c.l.b16 %v3642_v53 }
 0x1b5   : > { %2331 = vst [vmem:[#allocation1 + $0x20] ss:$4 sm:$0xff] %v2245_v39  ;;  %v3024_v40 = vunpack.i.l.s16 %v935_v28  ;;  %v1568_v28 = vld [vmem:[%s3205_s21 + $0x14] sm:$0x4]  ;;  %v1622_v5 = vrot.slane %v3047_v2, 2 }
 0x1b6   : > { %v3658_v1 = vadd.f32 %v709_v57, %v3348_v34  ;;  %v1684_v57 = vsel %vm287_vm4, %v1683_v0, %v1682_v8  ;;  %v3045_v0 = vunpack.i.l.s16 %v1595_v36  ;;  %v2339_v8 = vunpack.c.l.b16 %v3664_v33 }
 0x1b7   : > { %v383_v48 = vpop.xlane.xlu0 %382  ;;  %v1686_v15 = vsel %vm290_vm5, %v1685_v44, %v1684_v57  ;;  %v962_v44 = vrot.slane %v3023_v30, 4  ;;  %v964_v18 = vrot.slane %v3024_v40, 3  ;;  %v2348_v30 = vrot.slane %v2338_v7, 7 }
 0x1b8   : > { %3119 = vrcp.f32 %v383_v48  ;;  %v711_v3 = vsel %vm374_vm9, %v3658_v1, -inf  ;;  %v1688_v31 = vsel %vm293_vm6, %v1687_v25, %v1686_v15  ;;  %v2247_v48 = vld [vmem:[%s3230_s24 + $0x2] sm:$0x2]  ;;  %v2336_v25 = vunpack.c.l.b16 %v3640_v13  ;;  %v2248_v15 = vld [vmem:[%s3230_s24 + $0x4] sm:$0x2] }
 0x1b9   : > { %712 = vmax.xlane.f32.xlu1 %v711_v3  ;;  %v1689_v21 = vpack.c.b16 %v1688_v31, %v1688_v31  ;;  %v1372_v3 = vpop.f32.mrf.mxu0  ;;  %v2343_v13 = vrot.slane %v2335_v63, 2  ;;  %v3048_v31 = vunpack.i.l.s16 %v1598_v4  ;;  %v1600_v58 = vunpack.c.l.b16 %v1568_v28  ;;  %v1570_v63 = vld [vmem:[%s3205_s21 + $0x1c] sm:$0x4]  ;;  %v2233_v28 = vld [vmem:[%s3205_s21 + $0xc] sm:$0x8] }
 0x1ba   : > { %v2328_v6 = vld.sshfl [vmem:[#allocation1] sm:$0xff pattern:$0x73625140]  ;;  %v2345_v36 = vrot.slane %v2336_v25, 1 }
 0x1bb   : > { %v707_v37 = vpop.f32.mrf.mxu2  ;;  %v1694_v50 = vsel %vm352_vm7, %v1689_v21, 0  ;;  %2391 = vst [vmem:[#allocation1] ss:$4 sm:$0xff] %v2246_v29  ;;  %v2340_v57 = vunpack.c.l.b16 %v2328_v6  ;;  %v2344_v33 = vsel %vm275_vm0, %v2343_v13, %v2342_v12  ;;  %v2350_v29 = vrot.slane %v2339_v8, 6  ;;  %v2250_v8 = vld [vmem:[%s3230_s24 + $0x8] sm:$0x2] }
 0x1bc   : > { %v2332_v38 = vld.sshfl [vmem:[#allocation1 + $0x20] sm:$0xff pattern:$0x73625140]  ;;  %v1619_v37 = vrot.slane %v3045_v0, 4  ;;  %v2346_v53 = vsel %vm278_vm1, %v2345_v36, %v2344_v33  ;;  %v3050_v7 = vunpack.i.l.s16 %v1600_v58  ;;  %v1376_v13 = vmul.f32 0.17677669, %v1372_v3 }
 0x1bd   : > { %2396 = vst [vmem:[#allocation1 + $0x20] ss:$4 sm:$0xff] %v2247_v48  ;;  %v2341_v16 = vunpack.c.l.b16 %v2332_v38  ;;  %v2352_v21 = vrot.slane %v2340_v57, 5  ;;  %v2347_v6 = vsel %vm281_vm2, %v2337_v19, %v2346_v53  ;;  %v2231_v38 = vld [vmem:[%s3205_s21 + $0x4] sm:$0x8]  ;;  %v2262_v57 = vunpack.c.l.b16 %v2230_v10 }
 0x1be   : > { %v3120_v27 = vpop.eup %3119  ;;  %v1621_v9 = vsel %vm275_vm0, %v1620_v11, %v1619_v37  ;;  %v2349_v0 = vsel %vm284_vm3, %v2348_v30, %v2347_v6  ;;  %v2232_v11 = vld [vmem:[%s3205_s21 + $0x8] sm:$0x8]  ;;  %v2263_v12 = vunpack.c.l.b16 %v2231_v38  ;;  %v1602_v36 = vunpack.c.l.b16 %v1570_v63  ;;  %v2234_v58 = vld [vmem:[%s3205_s21 + $0x10] sm:$0x8]  ;;  %v2252_v10 = vld [vmem:[%s3230_s24 + $0xc] sm:$0x2] }
 0x1bf   : > { %v385_v46 = vmul.f32 %v3120_v27, %v3511_v35  ;;  %v961_v35 = vsel %vm287_vm4, %v960_v32, %v959_v20  ;;  %v1567_v27 = vld [vmem:[%s3205_s21 + $0x10] sm:$0x4]  ;;  %v1569_v20 = vld [vmem:[%s3205_s21 + $0x18] sm:$0x4]  ;;  %v2351_v41 = vsel %vm287_vm4, %v2350_v29, %v2349_v0  ;;  %v1623_v4 = vsel %vm278_vm1, %v1622_v5, %v1621_v9  ;;  %v2251_v19 = vld [vmem:[%s3230_s24 + $0xa] sm:$0x2] }
 0x1c0   : > { %v963_v32 = vsel %vm290_vm5, %v962_v44, %v961_v35  ;;  %v1624_v35 = vrot.slane %v3048_v31, 1  ;;  %v1601_v25 = vunpack.c.l.b16 %v1569_v20  ;;  %v2353_v2 = vsel %vm290_vm5, %v2352_v21, %v2351_v41 }
 0x1c1   : > { %v386_v39 = vpack.c.bf16 %v385_v46, %v385_v46  ;;  %v1374_v40 = vpop.f32.mrf.mxu0  ;;  %v965_v44 = vsel %vm293_vm6, %v964_v18, %v963_v32  ;;  %v2264_v33 = vunpack.c.l.b16 %v2232_v11  ;;  %v1627_v29 = vrot.slane %v3050_v7, 7 }
 0x1c2   : > { %v3697_v46 = vld.sshfl [vmem:[#allocation1] sm:$0xff pattern:$0x73625140]  ;;  %v1625_v18 = vsel %vm281_vm2, %v1624_v35, %v1623_v4  ;;  %v3051_v30 = vunpack.i.l.s16 %v1601_v25  ;;  %v3073_v32 = vunpack.i.l.s16 %v2262_v57  ;;  %v3074_v53 = vunpack.i.l.s16 %v2263_v12  ;;  %v2235_v35 = vld [vmem:[%s3205_s21 + $0x14] sm:$0x8] }
 0x1c3   : > { %2998 = vmatmul.msk.bf16.vlgmr.msra.gmra.mxu1 %vm374_vm9, %v386_v39  ;;  %2400 = vst [vmem:[#allocation1] ss:$4 sm:$0xff] %v2248_v15  ;;  %v2354_v39 = vrot.slane %v2341_v16, 4  ;;  %v966_v15 = vpack.c.b16 %v965_v44, %v965_v44  ;;  %v3728_v21 = vadd.f32 %v1376_v13, %v3348_v34  ;;  %v3052_v20 = vunpack.i.l.s16 %v1602_v36  ;;  %v2253_v44 = vld [vmem:[%s3230_s24 + $0xe] sm:$0x2] }
 0x1c4   : > { %1703 = vmatpush.bf16.xpose.msra.mxu1 %v1694_v50  ;;  %v3701_v48 = vld.sshfl [vmem:[#allocation1 + $0x20] sm:$0xff pattern:$0x73625140]  ;;  %v1599_v50 = vunpack.c.l.b16 %v1567_v27  ;;  %v2265_v9 = vunpack.c.l.b16 %v2233_v28  ;;  %v1629_v6 = vrot.slane %v3051_v30, 6  ;;  %v2286_v38 = vrot.slane %v3073_v32, 6 }
 0x1c5   : > { %2404 = vst [vmem:[#allocation1 + $0x20] ss:$4 sm:$0xff] %v2249_v42  ;;  %v2355_v37 = vsel %vm293_vm6, %v2354_v39, %v2353_v2  ;;  %v3075_v39 = vunpack.i.l.s16 %v2264_v33  ;;  %v2287_v40 = vrot.slane %v3074_v53, 5  ;;  %v2266_v41 = vunpack.c.l.b16 %v2234_v58  ;;  %v2572_v36 = vld [vmem:[%s3195_s17] sm:$0x2] }
 0x1c6   : > { %v3049_v42 = vunpack.i.l.s16 %v1599_v50  ;;  %v2356_v16 = vpack.c.b16 %v2355_v37, %v2355_v37  ;;  %v1378_v50 = vsel %vm374_vm9, %v3728_v21, -inf  ;;  %v1631_v63 = vrot.slane %v3052_v20, 5  ;;  %v2573_v30 = vld [vmem:[%s3195_s17 + $0x2] sm:$0x2] }
 0x1c7   : > { %1379 = vmax.xlane.f32.xlu2 %v1378_v50  ;;  %v3076_v4 = vunpack.i.l.s16 %v2265_v9  ;;  %v2267_v37 = vunpack.c.l.b16 %v2235_v35  ;;  %v2288_v11 = vsel %vm275_vm0, %v2287_v40, %v2286_v38  ;;  %v3077_v57 = vunpack.i.l.s16 %v2266_v41  ;;  %v2575_v50 = vld [vmem:[%s3195_s17 + $0x6] sm:$0x2] }
 0x1c8   : > { %v2361_v31 = vsel %vm352_vm7, %v2356_v16, 0  ;;  %v1626_v3 = vsel %vm284_vm3, %v3049_v42, %v1625_v18  ;;  %v2237_v42 = vld [vmem:[%s3205_s21 + $0x1c] sm:$0x8]  ;;  %v2236_v16 = vld [vmem:[%s3205_s21 + $0x18] sm:$0x8] }
 0x1c9   : > { %v1628_v0 = vsel %vm287_vm4, %v1627_v29, %v1626_v3  ;;  %v3078_v13 = vunpack.i.l.s16 %v2267_v37  ;;  %v2293_v28 = vrot.slane %v3077_v57, 2  ;;  %v2269_v33 = vunpack.c.l.b16 %v2237_v42  ;;  %v2565_v40 = vld [vmem:[%s3205_s21 + $0x4] sm:$0x8] }
 0x1ca   : > { %v3719_v27 = vld.sshfl [vmem:[#allocation1] sm:$0xff pattern:$0x73625140]  ;;  %v1630_v2 = vsel %vm290_vm5, %v1629_v6, %v1628_v0  ;;  %v2268_v53 = vunpack.c.l.b16 %v2236_v16 }
 0x1cb   : > { %2408 = vst [vmem:[#allocation1] ss:$4 sm:$0xff] %v2250_v8  ;;  %v2289_v8 = vrot.slane %v3075_v39, 4  ;;  %v1632_v12 = vsel %vm293_vm6, %v1631_v63, %v1630_v2  ;;  %v2295_v3 = vrot.slane %v3078_v13, 1  ;;  %v3080_v58 = vunpack.i.l.s16 %v2269_v33  ;;  %v2574_v39 = vld [vmem:[%s3195_s17 + $0x4] sm:$0x2] }
 0x1cc   : > { %v3723_v5 = vld.sshfl [vmem:[#allocation1 + $0x20] sm:$0xff pattern:$0x73625140]  ;;  %v1633_v18 = vpack.c.b16 %v1632_v12, %v1632_v12  ;;  %v3079_v9 = vunpack.i.l.s16 %v2268_v53  ;;  %v2566_v63 = vld [vmem:[%s3205_s21 + $0x8] sm:$0x8]  ;;  %v2597_v2 = vunpack.c.l.b16 %v2565_v40 }
 0x1cd   : > { %2412 = vst [vmem:[#allocation1 + $0x20] ss:$4 sm:$0xff] %v2251_v19  ;;  %v2290_v19 = vsel %vm278_vm1, %v2289_v8, %v2288_v11  ;;  %v2564_v0 = vld [vmem:[%s3205_s21] sm:$0x8]  ;;  %v2576_v8 = vld [vmem:[%s3195_s17 + $0x8] sm:$0x2]  ;;  %v2598_v42 = vunpack.c.l.b16 %v2566_v63 }
 0x1ce   : > { %v2577_v12 = vld [vmem:[%s3195_s17 + $0xa] sm:$0x2]  ;;  %v3088_v13 = vunpack.i.l.s16 %v2597_v2  ;;  %v2568_v33 = vld [vmem:[%s3205_s21 + $0x10] sm:$0x8] }
 0x1cf   : > { %v3089_v53 = vunpack.i.l.s16 %v2598_v42 }
 0x1d2   : > { %v3737_v25 = vld.sshfl [vmem:[#allocation1] sm:$0xff pattern:$0x73625140] }
 0x1d3   : > { %3025 = vmatmul.msk.bf16.vlgmr.msrb.gmra.mxu1 %vm352_vm7, %v966_v15  ;;  %2416 = vst [vmem:[#allocation1] ss:$4 sm:$0xff] %v2252_v10  ;;  %v2291_v15 = vrot.slane %v3076_v4, 3  ;;  %v2298_v10 = vrot.slane %v3080_v58, 7  ;;  %v2596_v4 = vunpack.c.l.b16 %v2564_v0 }
 0x1d4   : > { %2370 = vmatpush.bf16.xpose.msrb.mxu1 %v2361_v31  ;;  %v3740_v7 = vld.sshfl [vmem:[#allocation1 + $0x20] sm:$0xff pattern:$0x73625140] }
 0x1d5   : > { %2420 = vst [vmem:[#allocation1 + $0x20] ss:$4 sm:$0xff] %v2253_v44  ;;  %v2292_v29 = vsel %vm281_vm2, %v2291_v15, %v2290_v19  ;;  %v2567_v15 = vld [vmem:[%s3205_s21 + $0xc] sm:$0x8]  ;;  %v3087_v16 = vunpack.i.l.s16 %v2596_v4 }
 0x1d6   : > { %v2294_v20 = vsel %vm284_vm3, %v2293_v28, %v2292_v29  ;;  %v2599_v29 = vunpack.c.l.b16 %v2567_v15 }
 0x1d7   : > { %v2296_v6 = vsel %vm287_vm4, %v2295_v3, %v2294_v20  ;;  %v2620_v3 = vrot.slane %v3087_v16, 7  ;;  %v2621_v20 = vrot.slane %v3088_v13, 6 }
 0x1d8   : > { %v2297_v44 = vsel %vm290_vm5, %v3079_v9, %v2296_v6  ;;  %v2569_v9 = vld [vmem:[%s3205_s21 + $0x14] sm:$0x8]  ;;  %v2600_v6 = vunpack.c.l.b16 %v2568_v33  ;;  %v3090_v0 = vunpack.i.l.s16 %v2599_v29 }
 0x1d9   : > { %v2299_v41 = vsel %vm293_vm6, %v2298_v10, %v2297_v44  ;;  %v2579_v10 = vld [vmem:[%s3195_s17 + $0xe] sm:$0x2]  ;;  %v2622_v63 = vsel %vm275_vm0, %v2621_v20, %v2620_v3 }
 0x1da   : > { %v3749_v31 = vld.sshfl [vmem:[#allocation1] sm:$0xff pattern:$0x73625140]  ;;  %v2300_v57 = vpack.c.b16 %v2299_v41, %v2299_v41  ;;  %v2601_v41 = vunpack.c.l.b16 %v2569_v9 }
 0x1db   : > { %2636 = vst [vmem:[#allocation1] ss:$4 sm:$0xff] %v2572_v36 }
 0x1dc   : > { %v3752_v32 = vld.sshfl [vmem:[#allocation1 + $0x20] sm:$0xff pattern:$0x73625140]  ;;  %v3092_v16 = vunpack.i.l.s16 %v2601_v41 }
 0x1dd   : > { %2641 = vst [vmem:[#allocation1 + $0x20] ss:$4 sm:$0xff] %v2573_v30 }
 0x1e2   : > { %v2637_v38 = vld.sshfl [vmem:[#allocation1] sm:$0xff pattern:$0x73625140] }
 0x1e3   : > { %3053 = vmatmul.msk.bf16.vlgmr.msra.gmra.mxu1 %vm352_vm7, %v1633_v18  ;;  %2645 = vst [vmem:[#allocation1] ss:$4 sm:$0xff] %v2574_v39  ;;  %v2668_v37 = vunpack.c.l.b16 %v2637_v38  ;;  %v2578_v39 = vld [vmem:[%s3195_s17 + $0xc] sm:$0x2]  ;;  %v2623_v38 = vrot.slane %v3089_v53, 5  ;;  %v2629_v53 = vrot.slane %v3092_v16, 2 }
 0x1e4   : > { %v2642_v35 = vld.sshfl [vmem:[#allocation1 + $0x20] sm:$0xff pattern:$0x73625140] }
 0x1e5   : > { %2649 = vst [vmem:[#allocation1 + $0x20] ss:$4 sm:$0xff] %v2575_v50  ;;  %v2669_v11 = vunpack.c.l.b16 %v2642_v35  ;;  %v2676_v28 = vrot.slane %v2668_v37, 3  ;;  %v2570_v35 = vld [vmem:[%s3205_s21 + $0x18] sm:$0x8]  ;;  %v3091_v37 = vunpack.i.l.s16 %v2600_v6  ;;  %v2624_v42 = vsel %vm278_vm1, %v2623_v38, %v2622_v63 }
 0x1e6   : > { %v2602_v15 = vunpack.c.l.b16 %v2570_v35 }
 0x1e7   : > { %v2677_v30 = vrot.slane %v2669_v11, 2  ;;  %v2627_v13 = vrot.slane %v3091_v37, 3 }
 0x1e8   : > { %v3093_v33 = vunpack.i.l.s16 %v2602_v15 }
 0x1e9   : > { %v2678_v50 = vsel %vm275_vm0, %v2677_v30, %v2676_v28  ;;  %v2571_v30 = vld [vmem:[%s3205_s21 + $0x1c] sm:$0x8] }
 0x1ea   : > { %v2646_v19 = vld.sshfl [vmem:[#allocation1] sm:$0xff pattern:$0x73625140] }
 0x1eb   : > { %2653 = vst [vmem:[#allocation1] ss:$4 sm:$0xff] %v2576_v8  ;;  %v2670_v18 = vunpack.c.l.b16 %v2646_v19 }
 0x1ec   : > { %v2650_v36 = vld.sshfl [vmem:[#allocation1 + $0x20] sm:$0xff pattern:$0x73625140] }
 0x1ed   : > { %2657 = vst [vmem:[#allocation1 + $0x20] ss:$4 sm:$0xff] %v2577_v12  ;;  %v2679_v58 = vrot.slane %v2670_v18, 1  ;;  %v2671_v44 = vunpack.c.l.b16 %v2650_v36 }
 0x1ef   : > { %v2680_v8 = vsel %vm278_vm1, %v2679_v58, %v2678_v50 }
 0x1f0   : > { %v2681_v19 = vsel %vm281_vm2, %v2671_v44, %v2680_v8 }
 0x1f2   : > { %v2654_v40 = vld.sshfl [vmem:[#allocation1] sm:$0xff pattern:$0x73625140] }
 0x1f3   : > { %3081 = vmatmul.msk.bf16.vlgmr.msrb.gmra.mxu1 %vm352_vm7, %v2300_v57  ;;  %2661 = vst [vmem:[#allocation1] ss:$4 sm:$0xff] %v2578_v39  ;;  %v2672_v2 = vunpack.c.l.b16 %v2654_v40  ;;  %v2625_v57 = vrot.slane %v3090_v0, 4  ;;  %v2603_v39 = vunpack.c.l.b16 %v2571_v30  ;;  %v2631_v0 = vrot.slane %v3093_v33, 1 }
 0x1f4   : > { %v2658_v4 = vld.sshfl [vmem:[#allocation1 + $0x20] sm:$0xff pattern:$0x73625140] }
 0x1f5   : > { %2665 = vst [vmem:[#allocation1 + $0x20] ss:$4 sm:$0xff] %v2579_v10  ;;  %v2673_v11 = vunpack.c.l.b16 %v2658_v4  ;;  %v2682_v12 = vrot.slane %v2672_v2, 7  ;;  %v2626_v18 = vsel %vm281_vm2, %v2625_v57, %v2624_v42  ;;  %v3094_v35 = vunpack.i.l.s16 %v2603_v39 }
 0x1f6   : > { %v2628_v58 = vsel %vm284_vm3, %v2627_v13, %v2626_v18 }
 0x1f7   : > { %v2684_v36 = vrot.slane %v2673_v11, 6  ;;  %v2683_v28 = vsel %vm284_vm3, %v2682_v12, %v2681_v19  ;;  %v2630_v38 = vsel %vm287_vm4, %v2629_v53, %v2628_v58  ;;  %v3158_v19 = vmov 286326784  }
 0x1f8   : > { %v2632_v63 = vsel %vm290_vm5, %v2631_v0, %v2630_v38  ;;  %v497_v16 = vunpack.c.l.s4 %v3158_v19  ;;  %v539_v38 = vld [vmem:[%s3802_s27] sm:$0x1] }
 0x1f9   : > { %v2685_v6 = vsel %vm287_vm4, %v2684_v36, %v2683_v28  ;;  %v2633_v8 = vsel %vm293_vm6, %v3094_v35, %v2632_v63 }
 0x1fa   : > { %v2662_v29 = vld.sshfl [vmem:[#allocation1] sm:$0xff pattern:$0x73625140]  ;;  %v2634_v57 = vpack.c.b16 %v2633_v8, %v2633_v8  ;;  %v3795_v18 = vunpack.c.0.s8 %v497_v16 }
 0x1fb   : > { %v2674_v20 = vunpack.c.l.b16 %v2662_v29 }
 0x1fc   : > { %v2666_v3 = vld.sshfl [vmem:[#allocation1 + $0x20] sm:$0xff pattern:$0x73625140] }
 0x1fd   : > { %v2675_v9 = vunpack.c.l.b16 %v2666_v3  ;;  %v2686_v50 = vrot.slane %v2674_v20, 5 }
 0x1ff   : > { %v2688_v10 = vrot.slane %v2675_v9, 4  ;;  %v2687_v40 = vsel %vm290_vm5, %v2686_v50, %v2685_v6 }
 0x201   : > { %v2689_v44 = vsel %vm293_vm6, %v2688_v10, %v2687_v40 }
 0x202   : > { %v2690_v41 = vpack.c.b16 %v2689_v44, %v2689_v44 }
 0x204   : > { %v2695_v4 = vsel %vm352_vm7, %v2690_v41, 0 }
 0x205   : > { %2704 = vmatpush.bf16.xpose.msrb.mxu0 %v2695_v4  ;;  %v542_v4 = vld [vmem:[%s3802_s27 + $0x4] sm:$0x1] }
 0x209   : > { %v2039_v2 = vpop.f32.mrf.mxu0 }
 0x20a   : > { %v2043_v37 = vmul.f32 0.17677669, %v2039_v2 }
 0x20c   : > { %v3790_v11 = vadd.f32 %v2043_v37, %v3348_v34  ;;  %3095 = vmatmul.msk.bf16.vlgmr.msrb.gmra.mxu0 %vm352_vm7, %v2634_v57  ;;  %vm1537_vm7 = vsmask.f32 7942 }
 0x20e   : > { %v2045_v12 = vsel %vm374_vm9, %v3790_v11, -inf }
 0x20f   : > { %2046 = vmax.xlane.f32.xlu0 %v2045_v12  ;;  %v545_v12 = vld [vmem:[%s3802_s27 + $0x8] sm:$0x1] }
 0x211   : > { %v2041_v15 = vpop.f32.mrf.mxu0 }
 0x212   : > { %v551_v15 = vld [vmem:[%s3802_s27 + $0x10] sm:$0x1] }
 0x240   : > { %v459_v42 = vpop.f32.mrf.mxu1 }
 0x241   : > { %v463_v13 = vpack.c.bf16 %v459_v42, %v459_v42 }
 0x243   : > { %v465_v36 = vrot.slane %v463_v13, 3 }
 0x245   : > { %v469_v28 = vsel %vm466_vm11, %v463_v13, %v465_v36  ;;  %v471_v30 = vsel %vm275_vm0, %v463_v13, %v465_v36  ;;  %v474_v33 = vsel %vm278_vm1, %v463_v13, %v465_v36  ;;  %v477_v29 = vsel %vm281_vm2, %v463_v13, %v465_v36  ;;  %v548_v36 = vld [vmem:[%s3802_s27 + $0xc] sm:$0x1] }
 0x246   : > { %v473_v53 = vrot.slane %v471_v30, 1  ;;  %v476_v3 = vrot.slane %v474_v33, 2  ;;  %v479_v20 = vrot.slane %v477_v29, 3  ;;  %v481_v58 = vunpack.i.h.s16 %v469_v28 }
 0x247   : > { %v2999_v9 = vpack.i.b16 %v469_v28, %v469_v28  ;;  %v554_v28 = vld [vmem:[%s3802_s27 + $0x14] sm:$0x1] }
 0x248   : > { %v483_v6 = vunpack.i.h.s16 %v473_v53  ;;  %v485_v39 = vunpack.i.h.s16 %v476_v3  ;;  %v487_v50 = vunpack.i.h.s16 %v479_v20  ;;  %v489_v0 = vpack.i.b16 %v481_v58, %v481_v58  ;;  %v461_v40 = vpop.f32.mrf.mxu1 }
 0x249   : > { %v3000_v44 = vpack.i.b16 %v473_v53, %v473_v53  ;;  %v3001_v35 = vpack.i.b16 %v476_v3, %v476_v3  ;;  %v3002_v41 = vpack.i.b16 %v479_v20, %v479_v20  ;;  %v499_v63 = vperm.slane %v2999_v9, %v3795_v18  ;;  %v557_v3 = vld [vmem:[%s3802_s27 + $0x18] sm:$0x1]  ;;  %v560_v9 = vld [vmem:[%s3802_s27 + $0x1c] sm:$0x1] }
 0x24a   : > { %v491_v2 = vpack.i.b16 %v483_v6, %v483_v6  ;;  %v493_v8 = vpack.i.b16 %v485_v39, %v485_v39  ;;  %v495_v37 = vpack.i.b16 %v487_v50, %v487_v50  ;;  %v503_v57 = vperm.slane %v489_v0, %v3795_v18 }
 0x24b   : > { %v507_v42 = vperm.slane %v3000_v44, %v3795_v18  ;;  %v515_v19 = vperm.slane %v3001_v35, %v3795_v18  ;;  %v523_v16 = vperm.slane %v3002_v41, %v3795_v18  ;;  %v540_v13 = vsel %vm3810_vm14, %v499_v63, %v539_v38  ;;  %v713_v63 = vpop.xlane.xlu1 %712 }
 0x24c   : > { %v511_v30 = vperm.slane %v491_v2, %v3795_v18  ;;  %v519_v33 = vperm.slane %v493_v8, %v3795_v18  ;;  %v527_v29 = vperm.slane %v495_v37, %v3795_v18  ;;  %541 = vst [vmem:[%s3802_s27] sm:$0x1] %v540_v13  ;;  %v543_v53 = vsel %vm3810_vm14, %v503_v57, %v542_v4  ;;  %v1380_v57 = vpop.xlane.xlu2 %1379 }
 0x24d   : > { %544 = vst [vmem:[%s3802_s27 + $0x4] sm:$0x1] %v543_v53  ;;  %v546_v20 = vsel %vm3810_vm14, %v507_v42, %v545_v12  ;;  %v552_v58 = vsel %vm3810_vm14, %v515_v19, %v551_v15  ;;  %v558_v50 = vsel %vm3810_vm14, %v523_v16, %v557_v3  ;;  %v714_v4 = vsub.f32 %v3658_v1, %v713_v63 }
 0x24e   : > { %547 = vst [vmem:[%s3802_s27 + $0x8] sm:$0x1] %v546_v20  ;;  %v549_v6 = vsel %vm3810_vm14, %v511_v30, %v548_v36  ;;  %v555_v39 = vsel %vm3810_vm14, %v519_v33, %v554_v28  ;;  %v561_v0 = vsel %vm3810_vm14, %v527_v29, %v560_v9  ;;  %v1381_v12 = vsub.f32 %v3728_v21, %v1380_v57 }
 0x24f   : > { %550 = vst [vmem:[%s3802_s27 + $0xc] sm:$0x1] %v549_v6  ;;  %v715_v2 = vmul.f32 1.442695, %v714_v4  ;;  %v759_v63 = vunpack.c.l.b16 %v3304_v56  ;;  %v762_v57 = vunpack.c.l.b16 %v3313_v62  ;;  %vm2537_vm14 = vcmask 257027  }
 0x250   : > { %553 = vst [vmem:[%s3802_s27 + $0x10] sm:$0x1] %v552_v58  ;;  %v1038_v38 = vpop.f32.mrf.mxu1  ;;  %v1382_v19 = vmul.f32 1.442695, %v1381_v12 }
 0x251   : > { %556 = vst [vmem:[%s3802_s27 + $0x14] sm:$0x1] %v555_v39  ;;  %v1042_v40 = vmul.f32 0.17677669, %v1038_v38  ;;  %3121 = vpow2.f32 %v715_v2  ;;  %v760_v2 = vunpack.c.l.b16 %v3308_v59  ;;  %v4463_v59 = vld [vmem:[#allocation12_spill] sm:$0xff] }
 0x252   : > { %559 = vst [vmem:[%s3802_s27 + $0x18] sm:$0x1] %v558_v50  ;;  %3123 = vpow2.f32 %v1382_v19 }
 0x253   : > { %562 = vst [vmem:[%s3802_s27 + $0x1c] sm:$0x1] %v561_v0  ;;  %v1043_v44 = vadd.f32 %v1042_v40, %v3348_v34 }
 0x255   : > { %v1044_v35 = vsel %vm374_vm9, %v1043_v44, -inf }
 0x256   : > { %1045 = vmax.xlane.f32.xlu1 %v1044_v35  ;;  %v757_v35 = vunpack.c.l.b16 %v3298_v52  ;;  %v4461_v52 = vld [vmem:[#allocation2_spill] sm:$0xff] }
 0x257   : > { %v3863_v16 = vpop.eup %3121  ;;  %v763_v12 = vunpack.c.l.b16 %v4461_v52 }
 0x258   : > { %v1040_v41 = vpop.f32.mrf.mxu1  ;;  %v717_v1 = vsel %vm374_vm9, %v3863_v16, 0.0  ;;  %v3867_v28 = vpop.eup %3123  ;;  %v764_v4 = vrot.slane %v757_v35, 7  ;;  %v4469_v35 = vld [vmem:[#allocation18_spill] sm:$0xff] }
 0x259   : > { %v1384_v33 = vsel %vm374_vm9, %v3867_v28, 0.0  ;;  %v758_v41 = vunpack.c.l.b16 %v3302_v55 }
 0x260   : > { %v1705_v8 = vpop.f32.mrf.mxu1 }
 0x261   : > { %v1709_v37 = vmul.f32 0.17677669, %v1705_v8  ;;  %v766_v8 = vrot.slane %v758_v41, 6  ;;  %v1430_v41 = vunpack.c.l.b16 %v4469_v35 }
 0x263   : > { %v3858_v10 = vadd.f32 %v1709_v37, %v3348_v34  ;;  %v768_v37 = vrot.slane %v759_v63, 5 }
 0x265   : > { %v1711_v15 = vsel %vm374_vm9, %v3858_v10, -inf }
 0x266   : > { %1712 = vmax.xlane.f32.xlu2 %v1711_v15  ;;  %v770_v15 = vrot.slane %v760_v2, 4 }
 0x268   : > { %v1707_v42 = vpop.f32.mrf.mxu1 }
 0x269   : > { %v4462_v42 = vld [vmem:[#allocation11_spill] sm:$0xff] }
 0x26a   : > { %v1423_v19 = vunpack.c.l.b16 %v4462_v42  ;;  %v1443_v42 = vrot.slane %v1430_v41, 2 }
 0x26e   : > { %718 = vadd.xlane.f32.xlu2 %v717_v1  ;;  %v1424_v1 = vunpack.c.l.b16 %v4463_v59 }
 0x270   : > { %v2372_v13 = vpop.f32.mrf.mxu1 }
 0x271   : > { %v2376_v36 = vmul.f32 0.17677669, %v2372_v13 }
 0x273   : > { %v3870_v30 = vadd.f32 %v2376_v36, %v3348_v34  ;;  %v776_v36 = vrot.slane %v763_v12, 1 }
 0x275   : > { %v2378_v21 = vsel %vm374_vm9, %v3870_v30, -inf }
 0x276   : > { %2379 = vmax.xlane.f32.xlu1 %v2378_v21  ;;  %1385 = vadd.xlane.f32.xlu2 %v1384_v33  ;;  %v4464_v21 = vld [vmem:[#allocation13_spill] sm:$0xff] }
 0x277   : > { %v1425_v33 = vunpack.c.l.b16 %v4464_v21 }
 0x278   : > { %v2374_v29 = vpop.f32.mrf.mxu1 }
 0x279   : > { %v1433_v2 = vrot.slane %v1425_v33, 7 }
 0x282   : > { %v2047_v6 = vpop.xlane.xlu0 %2046 }
 0x283   : > { %v2048_v39 = vsub.f32 %v3790_v11, %v2047_v6  ;;  %v761_v11 = vunpack.c.l.b16 %v3310_v60  ;;  %v774_v60 = vrot.slane %v762_v57, 2  ;;  %v4467_v6 = vld [vmem:[#allocation16_spill] sm:$0xff] }
 0x285   : > { %v2049_v38 = vmul.f32 1.442695, %v2048_v39  ;;  %v772_v56 = vrot.slane %v761_v11, 3  ;;  %v1428_v39 = vunpack.c.l.b16 %v4467_v6 }
 0x287   : > { %v1439_v57 = vrot.slane %v1428_v39, 4 }
 0x289   : > { %v2706_v53 = vpop.f32.mrf.mxu0 }
 0x28a   : > { %v2710_v3 = vmul.f32 0.17677669, %v2706_v53  ;;  %v4465_v53 = vld [vmem:[#allocation14_spill] sm:$0xff] }
 0x28c   : > { %v3877_v20 = vadd.f32 %v2710_v3, %v3348_v34  ;;  %v756_v34 = vunpack.c.l.b16 %v3296_v51  ;;  %v1426_v3 = vunpack.c.l.b16 %v4465_v53 }
 0x28e   : > { %v2712_v58 = vsel %vm374_vm9, %v3877_v20, -inf }
 0x28f   : > { %2713 = vmax.xlane.f32.xlu0 %v2712_v58  ;;  %v4466_v58 = vld [vmem:[#allocation15_spill] sm:$0xff] }
 0x291   : > { %v2708_v9 = vpop.f32.mrf.mxu0 }
 0x292   : > { %v1427_v9 = vunpack.c.l.b16 %v4466_v58 }
 0x2c9   : > { %v1046_v50 = vpop.xlane.xlu1 %1045 }
 0x2ca   : > { %v1047_v0 = vsub.f32 %v1043_v44, %v1046_v50  ;;  %v765_v44 = vsel %vm275_vm0, %v764_v4, %v756_v34  ;;  %v1431_v4 = vrot.slane %v1423_v19, 1 }
 0x2cb   : > { %v767_v55 = vsel %vm278_vm1, %v766_v8, %v765_v44  ;;  %v1435_v8 = vrot.slane %v1426_v3, 6  ;;  %v1437_v44 = vrot.slane %v1427_v9, 5 }
 0x2cc   : > { %v1048_v40 = vmul.f32 1.442695, %v1047_v0  ;;  %v769_v51 = vsel %vm281_vm2, %v768_v37, %v767_v55  ;;  %v1432_v37 = vsel %vm275_vm0, %v1424_v1, %v1431_v4 }
 0x2cd   : > { %v771_v13 = vsel %vm284_vm3, %v770_v15, %v769_v51  ;;  %v1434_v55 = vsel %vm278_vm1, %v1433_v2, %v1432_v37 }
 0x2ce   : > { %3125 = vpow2.f32 %v1048_v40  ;;  %v773_v62 = vsel %vm287_vm4, %v772_v56, %v771_v13  ;;  %v1436_v56 = vsel %vm281_vm2, %v1435_v8, %v1434_v55 }
 0x2cf   : > { %3127 = vpow2.f32 %v2049_v38  ;;  %v775_v0 = vsel %vm290_vm5, %v774_v60, %v773_v62  ;;  %v4468_v38 = vld [vmem:[#allocation17_spill] sm:$0xff]  ;;  %v1438_v19 = vsel %vm284_vm3, %v1437_v44, %v1436_v56 }
 0x2d0   : > { %v1429_v40 = vunpack.c.l.b16 %v4468_v38  ;;  %v777_v63 = vsel %vm293_vm6, %v776_v36, %v775_v0  ;;  %v1440_v13 = vsel %vm287_vm4, %v1439_v57, %v1438_v19  ;;  %v4471_v44 = vld [vmem:[#allocation5_spill] sm:$0xff]  ;;  %v4472_v57 = vld [vmem:[#allocation4_spill] sm:$0xff] }
 0x2d1   : > { %v778_v11 = vpack.c.b16 %v777_v63, %v777_v63  ;;  %v1091_v37 = vunpack.c.l.b16 %v4471_v44  ;;  %v2096_v44 = vunpack.c.l.b16 %v3599_v23 }
 0x2d2   : > { %v1441_v15 = vrot.slane %v1429_v40, 3 }
 0x2d3   : > { %v783_v12 = vsel %vm446_vm10, %v778_v11, 0 }
 0x2d4   : > { %v3897_v29 = vpop.eup %3125  ;;  %792 = vmatpush.bf16.msra.mxu3 %v783_v12  ;;  %v1442_v60 = vsel %vm290_vm5, %v1441_v15, %v1440_v13  ;;  %v4473_v12 = vld [vmem:[#allocation6_spill] sm:$0xff] }
 0x2d5   : > { %v1050_v50 = vsel %vm374_vm9, %v3897_v29, 0.0  ;;  %v3908_v34 = vpop.eup %3127  ;;  %v1444_v36 = vsel %vm293_vm6, %v1443_v42, %v1442_v60  ;;  %v1092_v55 = vunpack.c.l.b16 %v4473_v12  ;;  %v4475_v42 = vld [vmem:[#allocation8_spill] sm:$0xff]  ;;  %v1756_v12 = vunpack.c.l.b16 %v3516_v45 }
 0x2d6   : > { %1051 = vadd.xlane.f32.xlu1 %v1050_v50  ;;  %v2051_v1 = vsel %vm374_vm9, %v3908_v34, 0.0  ;;  %v1445_v21 = vpack.c.b16 %v1444_v36, %v1444_v36  ;;  %v1094_v19 = vunpack.c.l.b16 %v4475_v42 }
 0x2d7   : > { %v1101_v13 = vrot.slane %v1092_v55, 6  ;;  %v1757_v55 = vunpack.c.l.b16 %v3518_v17 }
 0x2d8   : > { %v1450_v33 = vsel %vm446_vm10, %v1445_v21, 0 }
 0x2d9   : > { %v1713_v52 = vpop.xlane.xlu2 %1712  ;;  %1459 = vmatpush.bf16.msrb.mxu2 %v1450_v33 }
 0x2da   : > { %v1714_v51 = vsub.f32 %v3858_v10, %v1713_v52  ;;  %v1090_v52 = vunpack.c.l.b16 %v4472_v57 }
 0x2dc   : > { %v1715_v59 = vmul.f32 1.442695, %v1714_v51  ;;  %v4474_v51 = vld [vmem:[#allocation7_spill] sm:$0xff] }
 0x2dd   : > { %v1093_v56 = vunpack.c.l.b16 %v4474_v51  ;;  %v1758_v51 = vunpack.c.l.b16 %v3522_v26 }
 0x2de   : > { %3129 = vpow2.f32 %v1715_v59  ;;  %2052 = vadd.xlane.f32.xlu1 %v2051_v1  ;;  %v4476_v1 = vld [vmem:[#allocation9_spill] sm:$0xff] }
 0x2df   : > { %v1095_v60 = vunpack.c.l.b16 %v4476_v1  ;;  %v1103_v21 = vrot.slane %v1093_v56, 5  ;;  %v1759_v56 = vunpack.c.l.b16 %v3524_v47 }
 0x2e1   : > { %v719_v10 = vpop.xlane.xlu2 %718 }
 0x2e2   : > { %3131 = vrcp.f32 %v719_v10  ;;  %v4477_v10 = vld [vmem:[#allocation10_spill] sm:$0xff] }
 0x2e3   : > { %v1096_v33 = vunpack.c.l.b16 %v4477_v10  ;;  %v2580_v10 = vld [vmem:[%s3230_s24] sm:$0x2] }
 0x2e4   : > { %v3923_v62 = vpop.eup %3129  ;;  %2725 = vst [vmem:[#allocation1] ss:$4 sm:$0xff] %v2580_v10  ;;  %v2587_v10 = vld [vmem:[%s3230_s24 + $0xe] sm:$0x2] }
 0x2e5   : > { %v1717_v53 = vsel %vm374_vm9, %v3923_v62, 0.0 }
 0x2e6   : > { %1718 = vadd.xlane.f32.xlu0 %v1717_v53 }
 0x2e8   : > { %v3132_v3 = vpop.eup %3131 }
 0x2e9   : > { %v2380_v58 = vpop.xlane.xlu1 %2379  ;;  %v1386_v9 = vpop.xlane.xlu2 %1385  ;;  %v721_v6 = vmul.f32 %v3132_v3, %v3863_v16  ;;  %v1105_v3 = vrot.slane %v1094_v19, 4  ;;  %v4479_v19 = vld [vmem:[#allocation20_spill] sm:$0xff] }
 0x2ea   : > { %v2381_v39 = vsub.f32 %v3870_v30, %v2380_v58  ;;  %3133 = vrcp.f32 %v1386_v9  ;;  %v1107_v9 = vrot.slane %v1095_v60, 3  ;;  %v4481_v60 = vld [vmem:[#allocation22_spill] sm:$0xff] }
 0x2eb   : > { %v722_v50 = vpack.c.bf16 %v721_v6, %v721_v6  ;;  %v1763_v17 = vunpack.c.l.b16 %v4481_v60 }
 0x2ec   : > { %v2382_v0 = vmul.f32 1.442695, %v2381_v39  ;;  %v1109_v39 = vrot.slane %v1096_v33, 2 }
 0x2ed   : > { %3012 = vmatmul.msk.bf16.vlgmr.msra.gmra.mxu3 %vm374_vm9, %v722_v50  ;;  %v2090_v50 = vunpack.c.l.b16 %v3569_v54 }
 0x2ee   : > { %3135 = vpow2.f32 %v2382_v0  ;;  %v2091_v0 = vunpack.c.l.b16 %v3572_v43 }
 0x2f0   : > { %v3134_v38 = vpop.eup %3133 }
 0x2f1   : > { %v1388_v40 = vmul.f32 %v3134_v38, %v3867_v28  ;;  %v4470_v28 = vld [vmem:[#allocation3_spill] sm:$0xff] }
 0x2f2   : > { %v1089_v11 = vunpack.c.l.b16 %v4470_v28  ;;  %v2095_v28 = vunpack.c.l.b16 %v3586_v49  ;;  %v2108_v49 = vrot.slane %v2096_v44, 4 }
 0x2f3   : > { %v1389_v35 = vpack.c.bf16 %v1388_v40, %v1388_v40 }
 0x2f4   : > { %v3931_v41 = vpop.eup %3135  ;;  %v1097_v15 = vrot.slane %v1089_v11, 1 }
 0x2f5   : > { %3040 = vmatmul.msk.bf16.vlgmr.msrb.gmra.mxu2 %vm374_vm9, %v1389_v35  ;;  %v2384_v63 = vsel %vm374_vm9, %v3931_v41, 0.0  ;;  %v2093_v35 = vunpack.c.l.b16 %v3579_v22  ;;  %v2097_v22 = vunpack.c.l.b16 %v3601_v24 }
 0x2f6   : > { %2385 = vadd.xlane.f32.xlu2 %v2384_v63  ;;  %v1098_v59 = vsel %vm275_vm0, %v1090_v52, %v1097_v15  ;;  %v2098_v63 = vrot.slane %v2090_v50, 2 }
 0x2f7   : > { %v2102_v54 = vrot.slane %v2093_v35, 7  ;;  %v2110_v23 = vrot.slane %v2097_v22, 3  ;;  %v2423_v22 = vunpack.c.l.b16 %v3697_v46 }
 0x302   : > { %v2714_v16 = vpop.xlane.xlu0 %2713 }
 0x303   : > { %v2715_v30 = vsub.f32 %v3877_v20, %v2714_v16  ;;  %v1099_v20 = vrot.slane %v1091_v37, 7  ;;  %v2099_v16 = vrot.slane %v2091_v0, 1 }
 0x305   : > { %v2716_v4 = vmul.f32 1.442695, %v2715_v30  ;;  %v1100_v36 = vsel %vm278_vm1, %v1099_v20, %v1098_v59  ;;  %v2100_v11 = vsel %vm275_vm0, %v2099_v16, %v2098_v63  ;;  %v4478_v20 = vld [vmem:[#allocation19_spill] sm:$0xff]  ;;  %v1761_v59 = vunpack.c.l.b16 %v4479_v19 }
 0x306   : > { %v1102_v53 = vsel %vm281_vm2, %v1101_v13, %v1100_v36  ;;  %v1760_v42 = vunpack.c.l.b16 %v4478_v20  ;;  %v4480_v13 = vld [vmem:[#allocation21_spill] sm:$0xff]  ;;  %v1764_v36 = vrot.slane %v1756_v12, 2  ;;  %v2584_v12 = vld [vmem:[%s3230_s24 + $0x8] sm:$0x2] }
 0x307   : > { %3137 = vpow2.f32 %v2716_v4  ;;  %v1104_v58 = vsel %vm284_vm3, %v1103_v21, %v1102_v53  ;;  %v2092_v4 = vunpack.c.l.b16 %v3577_v14  ;;  %v2106_v14 = vrot.slane %v2095_v28, 5  ;;  %v2726_v28 = vld.sshfl [vmem:[#allocation1] sm:$0xff pattern:$0x73625140] }
 0x308   : > { %v1106_v6 = vsel %vm287_vm4, %v1105_v3, %v1104_v58  ;;  %v1762_v1 = vunpack.c.l.b16 %v4480_v13  ;;  %v1765_v21 = vrot.slane %v1757_v55, 1  ;;  %v1768_v53 = vrot.slane %v1759_v56, 7  ;;  %v2581_v3 = vld [vmem:[%s3230_s24 + $0x2] sm:$0x2] }
 0x309   : > { %v1108_v38 = vsel %vm290_vm5, %v1107_v9, %v1106_v6  ;;  %v2101_v37 = vsel %vm278_vm1, %v2092_v4, %v2100_v11  ;;  %v1770_v26 = vrot.slane %v1760_v42, 6  ;;  %v1772_v58 = vrot.slane %v1761_v59, 5  ;;  %2730 = vst [vmem:[#allocation1 + $0x20] ss:$4 sm:$0xff] %v2581_v3 }
 0x30a   : > { %v1110_v40 = vsel %vm293_vm6, %v1109_v39, %v1108_v38  ;;  %v2103_v52 = vsel %vm281_vm2, %v2102_v54, %v2101_v37  ;;  %v1766_v47 = vsel %vm275_vm0, %v1765_v21, %v1764_v36  ;;  %v1774_v50 = vrot.slane %v1762_v1, 4  ;;  %v2586_v36 = vld [vmem:[%s3230_s24 + $0xc] sm:$0x2] }
 0x30b   : > { %v1111_v30 = vpack.c.b16 %v1110_v40, %v1110_v40  ;;  %v1767_v39 = vsel %vm278_vm1, %v1758_v51, %v1766_v47  ;;  %v1776_v38 = vrot.slane %v1763_v17, 3  ;;  %v2426_v56 = vunpack.c.l.b16 %v3723_v5 }
 0x30c   : > { %v1769_v0 = vsel %vm281_vm2, %v1768_v53, %v1767_v39  ;;  %v2429_v42 = vunpack.c.l.b16 %v3749_v31  ;;  %v2430_v5 = vunpack.c.l.b16 %v3752_v32  ;;  %v2757_v47 = vunpack.c.l.b16 %v2726_v28 }
 0x30d   : > { %v3937_v2 = vpop.eup %3137  ;;  %v1116_v43 = vsel %vm446_vm10, %v1111_v30, 0  ;;  %v1771_v40 = vsel %vm284_vm3, %v1770_v26, %v1769_v0  ;;  %v2582_v30 = vld [vmem:[%s3230_s24 + $0x4] sm:$0x2] }
 0x30e   : > { %v2718_v8 = vsel %vm374_vm9, %v3937_v2, 0.0  ;;  %1125 = vmatpush.bf16.msrb.mxu3 %v1116_v43  ;;  %v1773_v35 = vsel %vm287_vm4, %v1772_v58, %v1771_v40  ;;  %2734 = vst [vmem:[#allocation1] ss:$4 sm:$0xff] %v2582_v30  ;;  %v2443_v60 = vrot.slane %v2430_v5, 4  ;;  %v2765_v39 = vrot.slane %v2757_v47, 3 }
 0x30f   : > { %2719 = vadd.xlane.f32.xlu0 %v2718_v8  ;;  %v2094_v8 = vunpack.c.l.b16 %v3584_v61  ;;  %v1775_v63 = vsel %vm290_vm5, %v1774_v50, %v1773_v35 }
 0x310   : > { %v1777_v16 = vsel %vm293_vm6, %v1776_v38, %v1775_v63  ;;  %v2731_v54 = vld.sshfl [vmem:[#allocation1 + $0x20] sm:$0xff pattern:$0x73625140] }
 0x311   : > { %v2104_v57 = vrot.slane %v2094_v8, 6  ;;  %v1778_v4 = vpack.c.b16 %v1777_v16, %v1777_v16  ;;  %v2583_v8 = vld [vmem:[%s3230_s24 + $0x6] sm:$0x2]  ;;  %v2758_v58 = vunpack.c.l.b16 %v2731_v54 }
 0x312   : > { %2738 = vst [vmem:[#allocation1 + $0x20] ss:$4 sm:$0xff] %v2583_v8 }
 0x313   : > { %v2105_v61 = vsel %vm284_vm3, %v2104_v57, %v2103_v52  ;;  %v1783_v37 = vsel %vm446_vm10, %v1778_v4, 0  ;;  %v2424_v52 = vunpack.c.l.b16 %v3701_v48  ;;  %v2766_v50 = vrot.slane %v2758_v58, 2  ;;  %v875_v58 = vld [vmem:[%s3802_s27 + $0x4] sm:$0x1] }
 0x314   : > { %v2107_v15 = vsel %vm287_vm4, %v2106_v14, %v2105_v61  ;;  %1792 = vmatpush.bf16.msra.mxu3 %v1783_v37  ;;  %v2425_v14 = vunpack.c.l.b16 %v3719_v27  ;;  %v2431_v61 = vrot.slane %v2423_v22, 3 }
 0x315   : > { %v2109_v24 = vsel %vm290_vm5, %v2108_v49, %v2107_v15  ;;  %v2432_v49 = vrot.slane %v2424_v52, 2  ;;  %v2585_v15 = vld [vmem:[%s3230_s24 + $0xa] sm:$0x2]  ;;  %v2767_v63 = vsel %vm275_vm0, %v2766_v50, %v2765_v39 }
 0x316   : > { %v2111_v45 = vsel %vm293_vm6, %v2110_v23, %v2109_v24  ;;  %v2434_v55 = vrot.slane %v2425_v14, 1  ;;  %v2735_v23 = vld.sshfl [vmem:[#allocation1] sm:$0xff pattern:$0x73625140]  ;;  %v2428_v24 = vunpack.c.l.b16 %v3740_v7 }
 0x317   : > { %v2112_v33 = vpack.c.b16 %v2111_v45, %v2111_v45  ;;  %v2433_v46 = vsel %vm275_vm0, %v2432_v49, %v2431_v61  ;;  %2742 = vst [vmem:[#allocation1] ss:$4 sm:$0xff] %v2584_v12  ;;  %v2441_v45 = vrot.slane %v2429_v42, 5 }
 0x318   : > { %v2439_v59 = vrot.slane %v2428_v24, 6 }
 0x319   : > { %v2117_v6 = vsel %vm446_vm10, %v2112_v33, 0  ;;  %v2739_v48 = vld.sshfl [vmem:[#allocation1 + $0x20] sm:$0xff pattern:$0x73625140] }
 0x31a   : > { %2126 = vmatpush.bf16.msra.mxu2 %v2117_v6  ;;  %2746 = vst [vmem:[#allocation1 + $0x20] ss:$4 sm:$0xff] %v2585_v15  ;;  %v2759_v6 = vunpack.c.l.b16 %v2735_v23  ;;  %v2760_v40 = vunpack.c.l.b16 %v2739_v48 }
 0x31c   : > { %v2768_v38 = vrot.slane %v2759_v6, 1 }
 0x31e   : > { %v2743_v32 = vld.sshfl [vmem:[#allocation1] sm:$0xff pattern:$0x73625140] }
 0x31f   : > { %2750 = vst [vmem:[#allocation1] ss:$4 sm:$0xff] %v2586_v36  ;;  %v2761_v0 = vunpack.c.l.b16 %v2743_v32 }
 0x321   : > { %v2747_v53 = vld.sshfl [vmem:[#allocation1 + $0x20] sm:$0xff pattern:$0x73625140]  ;;  %v2771_v30 = vrot.slane %v2761_v0, 7  ;;  %v878_v0 = vld [vmem:[%s3802_s27 + $0x8] sm:$0x1] }
 0x322   : > { %2754 = vst [vmem:[#allocation1 + $0x20] ss:$4 sm:$0xff] %v2587_v10  ;;  %v2762_v35 = vunpack.c.l.b16 %v2747_v53 }
 0x326   : > { %v2751_v16 = vld.sshfl [vmem:[#allocation1] sm:$0xff pattern:$0x73625140] }
 0x327   : > { %v2763_v8 = vunpack.c.l.b16 %v2751_v16  ;;  %v887_v16 = vld [vmem:[%s3802_s27 + $0x14] sm:$0x1] }
 0x329   : > { %v2755_v4 = vld.sshfl [vmem:[#allocation1 + $0x20] sm:$0xff pattern:$0x73625140] }
 0x349   : > { %v1052_v9 = vpop.xlane.xlu1 %1051 }
 0x34a   : > { %3139 = vrcp.f32 %v1052_v9 }
 0x350   : > { %v3140_v11 = vpop.eup %3139 }
 0x351   : > { %v1054_v43 = vmul.f32 %v3140_v11, %v3897_v29  ;;  %v2053_v44 = vpop.xlane.xlu1 %2052  ;;  %v2427_v29 = vunpack.c.l.b16 %v3737_v25  ;;  %v2435_v25 = vsel %vm278_vm1, %v2434_v55, %v2433_v46  ;;  %v2773_v11 = vrot.slane %v2762_v35, 6  ;;  %v881_v35 = vld [vmem:[%s3802_s27 + $0xc] sm:$0x1] }
 0x352   : > { %3141 = vrcp.f32 %v2053_v44  ;;  %v2436_v7 = vsel %vm281_vm2, %v2426_v56, %v2435_v25 }
 0x353   : > { %v1055_v57 = vpack.c.bf16 %v1054_v43, %v1054_v43  ;;  %v2437_v19 = vrot.slane %v2427_v29, 7  ;;  %v2764_v43 = vunpack.c.l.b16 %v2755_v4  ;;  %v890_v4 = vld [vmem:[%s3802_s27 + $0x18] sm:$0x1] }
 0x355   : > { %3026 = vmatmul.msk.bf16.vlgmr.msrb.gmra.mxu3 %vm374_vm9, %v1055_v57  ;;  %v2438_v1 = vsel %vm284_vm3, %v2437_v19, %v2436_v7  ;;  %v2775_v57 = vrot.slane %v2763_v8, 5  ;;  %v2777_v22 = vrot.slane %v2764_v43, 4 }
 0x358   : > { %v3142_v51 = vpop.eup %3141 }
 0x359   : > { %v2055_v20 = vmul.f32 %v3142_v51, %v3908_v34  ;;  %v1719_v27 = vpop.xlane.xlu0 %1718  ;;  %v2440_v34 = vsel %vm287_vm4, %v2439_v59, %v2438_v1 }
 0x35a   : > { %3143 = vrcp.f32 %v1719_v27  ;;  %v2442_v31 = vsel %vm290_vm5, %v2441_v45, %v2440_v34 }
 0x35b   : > { %v2056_v13 = vpack.c.bf16 %v2055_v20, %v2055_v20  ;;  %v2444_v17 = vsel %vm293_vm6, %v2443_v60, %v2442_v31 }
 0x35c   : > { %v2445_v21 = vpack.c.b16 %v2444_v17, %v2444_v17 }
 0x35d   : > { %3068 = vmatmul.msk.bf16.vlgmr.msra.gmra.mxu2 %vm374_vm9, %v2056_v13 }
 0x35e   : > { %v2450_v3 = vsel %vm446_vm10, %v2445_v21, 0 }
 0x35f   : > { %2459 = vmatpush.bf16.msrb.mxu3 %v2450_v3 }
 0x360   : > { %v3144_v33 = vpop.eup %3143 }
 0x361   : > { %v1721_v26 = vmul.f32 %v3144_v33, %v3923_v62  ;;  %v2769_v62 = vsel %vm278_vm1, %v2768_v38, %v2767_v63  ;;  %v872_v33 = vld [vmem:[%s3802_s27] sm:$0x1]  ;;  %v884_v38 = vld [vmem:[%s3802_s27 + $0x10] sm:$0x1] }
 0x362   : > { %v2770_v28 = vsel %vm281_vm2, %v2760_v40, %v2769_v62 }
 0x363   : > { %v1722_v9 = vpack.c.bf16 %v1721_v26, %v1721_v26  ;;  %v2772_v44 = vsel %vm284_vm3, %v2771_v30, %v2770_v28  ;;  %vm4035_vm3 = vmand %vm536_vm12, %vm870_vm15  ;;  %v893_v28 = vld [vmem:[%s3802_s27 + $0x1c] sm:$0x1]  ;;  %vm2204_vm12 = vsmask.f32 7946 }
 0x364   : > { %v2774_v37 = vsel %vm287_vm4, %v2773_v11, %v2772_v44  ;;  %vm1203_vm4 = vcmask 254977  }
 0x365   : > { %3054 = vmatmul.msk.bf16.vlgmr.msra.gmra.mxu3 %vm374_vm9, %v1722_v9  ;;  %v2776_v52 = vsel %vm290_vm5, %v2775_v57, %v2774_v37  ;;  %vm1204_vm5 = vsmask.f32 1280  ;;  %vm4152_vm8 = vmand %vm1203_vm4, %vm1537_vm7 }
 0x366   : > { %v2778_v14 = vsel %vm293_vm6, %v2777_v22, %v2776_v52  ;;  %vm4102_vm6 = vmand %vm1203_vm4, %vm1204_vm5  ;;  %vm2871_vm5 = vsmask.f32 7950 }
 0x367   : > { %v2779_v61 = vpack.c.b16 %v2778_v14, %v2778_v14 }
 0x369   : > { %v2386_v54 = vpop.xlane.xlu2 %2385  ;;  %v2784_v29 = vsel %vm446_vm10, %v2779_v61, 0  ;;  %vm1871_vm10 = vsmask.f32 2304 }
 0x36a   : > { %3145 = vrcp.f32 %v2386_v54  ;;  %2793 = vmatpush.bf16.msrb.mxu2 %v2784_v29 }
 0x370   : > { %v3146_v49 = vpop.eup %3145  ;;  %v794_v12 = vpop.f32.mrf.mxu3 }
 0x371   : > { %v2388_v55 = vmul.f32 %v3146_v49, %v3931_v41  ;;  %v798_v15 = vpack.c.bf16 %v794_v12, %v794_v12 }
 0x373   : > { %v2389_v23 = vpack.c.bf16 %v2388_v55, %v2388_v55  ;;  %v800_v51 = vrot.slane %v798_v15, 3 }
 0x375   : > { %v803_v56 = vsel %vm466_vm11, %v798_v15, %v800_v51  ;;  %v805_v24 = vsel %vm275_vm0, %v798_v15, %v800_v51  ;;  %v808_v46 = vsel %vm278_vm1, %v798_v15, %v800_v51  ;;  %v811_v48 = vsel %vm281_vm2, %v798_v15, %v800_v51  ;;  %3082 = vmatmul.msk.bf16.vlgmr.msrb.gmra.mxu3 %vm374_vm9, %v2389_v23 }
 0x376   : > { %v807_v20 = vrot.slane %v805_v24, 1  ;;  %v810_v27 = vrot.slane %v808_v46, 2  ;;  %v813_v42 = vrot.slane %v811_v48, 3  ;;  %v815_v25 = vunpack.i.h.s16 %v803_v56 }
 0x377   : > { %v3013_v41 = vpack.i.b16 %v803_v56, %v803_v56 }
 0x378   : > { %v817_v19 = vunpack.i.h.s16 %v807_v20  ;;  %v819_v5 = vunpack.i.h.s16 %v810_v27  ;;  %v821_v7 = vunpack.i.h.s16 %v813_v42  ;;  %v823_v59 = vpack.i.b16 %v815_v25, %v815_v25  ;;  %v796_v1 = vpop.f32.mrf.mxu3  ;;  %v1461_v45 = vpop.f32.mrf.mxu2 }
 0x379   : > { %v3014_v34 = vpack.i.b16 %v807_v20, %v807_v20  ;;  %v3015_v60 = vpack.i.b16 %v810_v27, %v810_v27  ;;  %v3016_v31 = vpack.i.b16 %v813_v42, %v813_v42  ;;  %v833_v17 = vperm.slane %v3013_v41, %v3795_v18 }
 0x37a   : > { %v825_v36 = vpack.i.b16 %v817_v19, %v817_v19  ;;  %v827_v21 = vpack.i.b16 %v819_v5, %v819_v5  ;;  %v829_v10 = vpack.i.b16 %v821_v7, %v821_v7  ;;  %v837_v32 = vperm.slane %v823_v59, %v3795_v18 }
 0x37b   : > { %v841_v53 = vperm.slane %v3014_v34, %v3795_v18  ;;  %v849_v26 = vperm.slane %v3015_v60, %v3795_v18  ;;  %v857_v3 = vperm.slane %v3016_v31, %v3795_v18  ;;  %v873_v47 = vsel %vm4035_vm3, %v833_v17, %v872_v33  ;;  %v1206_v34 = vld [vmem:[%s3802_s27] sm:$0x2] }
 0x37c   : > { %v845_v9 = vperm.slane %v825_v36, %v3795_v18  ;;  %v853_v6 = vperm.slane %v827_v21, %v3795_v18  ;;  %v861_v39 = vperm.slane %v829_v10, %v3795_v18  ;;  %874 = vst [vmem:[%s3802_s27] sm:$0x1] %v873_v47  ;;  %v876_v50 = vsel %vm4035_vm3, %v837_v32, %v875_v58  ;;  %v1209_v32 = vld [vmem:[%s3802_s27 + $0x4] sm:$0x2]  ;;  %v1212_v47 = vld [vmem:[%s3802_s27 + $0x8] sm:$0x2] }
 0x37d   : > { %877 = vst [vmem:[%s3802_s27 + $0x4] sm:$0x1] %v876_v50  ;;  %v879_v40 = vsel %vm4035_vm3, %v841_v53, %v878_v0  ;;  %v885_v63 = vsel %vm4035_vm3, %v849_v26, %v884_v38  ;;  %v891_v8 = vsel %vm4035_vm3, %v857_v3, %v890_v4  ;;  %v1465_v22 = vpack.c.bf16 %v1461_v45, %v1461_v45  ;;  %v1218_v58 = vld [vmem:[%s3802_s27 + $0x10] sm:$0x2]  ;;  %v1215_v0 = vld [vmem:[%s3802_s27 + $0xc] sm:$0x2] }
 0x37e   : > { %880 = vst [vmem:[%s3802_s27 + $0x8] sm:$0x1] %v879_v40  ;;  %v882_v62 = vsel %vm4035_vm3, %v845_v9, %v881_v35  ;;  %v888_v30 = vsel %vm4035_vm3, %v853_v6, %v887_v16  ;;  %v894_v11 = vsel %vm4035_vm3, %v861_v39, %v893_v28  ;;  %v1221_v38 = vld [vmem:[%s3802_s27 + $0x14] sm:$0x2]  ;;  %v1227_v28 = vld [vmem:[%s3802_s27 + $0x1c] sm:$0x2] }
 0x37f   : > { %883 = vst [vmem:[%s3802_s27 + $0xc] sm:$0x1] %v882_v62  ;;  %v1467_v52 = vrot.slane %v1465_v22, 3  ;;  %v1224_v62 = vld [vmem:[%s3802_s27 + $0x18] sm:$0x2] }
 0x380   : > { %886 = vst [vmem:[%s3802_s27 + $0x10] sm:$0x1] %v885_v63  ;;  %v1463_v54 = vpop.f32.mrf.mxu2  ;;  %vm2538_vm3 = vsmask.f32 3328 }
 0x381   : > { %889 = vst [vmem:[%s3802_s27 + $0x14] sm:$0x1] %v888_v30  ;;  %v1472_v61 = vsel %vm275_vm0, %v1465_v22, %v1467_v52  ;;  %v1475_v49 = vsel %vm278_vm1, %v1465_v22, %v1467_v52  ;;  %v4084_v29 = vsel %vm466_vm11, %v1465_v22, %v1467_v52  ;;  %v1478_v55 = vsel %vm281_vm2, %v1465_v22, %v1467_v52  ;;  %vm4321_vm4 = vmand %vm2537_vm14, %vm2538_vm3 }
 0x382   : > { %892 = vst [vmem:[%s3802_s27 + $0x18] sm:$0x1] %v891_v8  ;;  %v2720_v43 = vpop.xlane.xlu0 %2719  ;;  %v4087_v23 = vrot.slane %v1472_v61, 1  ;;  %v4095_v25 = vrot.slane %v1478_v55, 3  ;;  %v1482_v41 = vunpack.i.h.s16 %v4084_v29  ;;  %v3041_v19 = vpack.i.b16 %v4084_v29, %v4084_v29 }
 0x383   : > { %895 = vst [vmem:[%s3802_s27 + $0x1c] sm:$0x1] %v894_v11  ;;  %3147 = vrcp.f32 %v2720_v43 }
 0x384   : > { %v1484_v30 = vunpack.i.h.s16 %v4087_v23  ;;  %v3042_v22 = vpack.i.b16 %v4087_v23, %v4087_v23 }
 0x386   : > { %v1492_v29 = vpack.i.b16 %v1484_v30, %v1484_v30 }
 0x389   : > { %v3148_v44 = vpop.eup %3147 }
 0x38a   : > { %v2722_v37 = vmul.f32 %v3148_v44, %v3937_v2  ;;  %v4089_v2 = vrot.slane %v1475_v49, 2 }
 0x38c   : > { %v2723_v57 = vpack.c.bf16 %v2722_v37, %v2722_v37  ;;  %v1486_v54 = vunpack.i.h.s16 %v4089_v2  ;;  %v1490_v37 = vpack.i.b16 %v1482_v41, %v1482_v41  ;;  %v3043_v55 = vpack.i.b16 %v4089_v2, %v4089_v2 }
 0x38d   : > { %v3044_v2 = vpack.i.b16 %v4095_v25, %v4095_v25  ;;  %v1512_v41 = vperm.slane %v1492_v29, %v3795_v18 }
 0x38e   : > { %3096 = vmatmul.msk.bf16.vlgmr.msrb.gmra.mxu2 %vm374_vm9, %v2723_v57  ;;  %v1494_v23 = vpack.i.b16 %v1486_v54, %v1486_v54  ;;  %vm1870_vm9 = vcmask 256002  }
 0x38f   : > { %vm4226_vm13 = vmand %vm1870_vm9, %vm1871_vm10 }
 0x390   : > { %vm4286_vm15 = vmand %vm1870_vm9, %vm2204_vm12 }
 0x3d8   : > { %v1127_v14 = vpop.f32.mrf.mxu3 }
 0x3d9   : > { %v1131_v12 = vpack.c.bf16 %v1127_v14, %v1127_v14 }
 0x3db   : > { %v1133_v15 = vrot.slane %v1131_v12, 3 }
 0x3dd   : > { %v1136_v51 = vsel %vm466_vm11, %v1131_v12, %v1133_v15  ;;  %v1138_v56 = vsel %vm275_vm0, %v1131_v12, %v1133_v15  ;;  %v1141_v24 = vsel %vm278_vm1, %v1131_v12, %v1133_v15  ;;  %v1144_v46 = vsel %vm281_vm2, %v1131_v12, %v1133_v15  ;;  %v1876_v15 = vld [vmem:[%s3802_s27 + $0x4] sm:$0x4] }
 0x3de   : > { %v1140_v48 = vrot.slane %v1138_v56, 1  ;;  %v1143_v20 = vrot.slane %v1141_v24, 2  ;;  %v1146_v27 = vrot.slane %v1144_v46, 3  ;;  %v1148_v42 = vunpack.i.h.s16 %v1136_v51 }
 0x3df   : > { %v3027_v5 = vpack.i.b16 %v1136_v51, %v1136_v51  ;;  %v1488_v12 = vunpack.i.h.s16 %v4095_v25  ;;  %v1500_v51 = vperm.slane %v3041_v19, %v3795_v18  ;;  %v1504_v56 = vperm.slane %v1490_v37, %v3795_v18 }
 0x3e0   : > { %v1150_v7 = vunpack.i.h.s16 %v1140_v48  ;;  %v1152_v59 = vunpack.i.h.s16 %v1143_v20  ;;  %v1154_v13 = vunpack.i.h.s16 %v1146_v27  ;;  %v1156_v1 = vpack.i.b16 %v1148_v42, %v1148_v42  ;;  %v1129_v60 = vpop.f32.mrf.mxu3  ;;  %v2128_v31 = vpop.f32.mrf.mxu2 }
 0x3e1   : > { %v3028_v17 = vpack.i.b16 %v1140_v48, %v1140_v48  ;;  %v3029_v36 = vpack.i.b16 %v1143_v20, %v1143_v20  ;;  %v3030_v21 = vpack.i.b16 %v1146_v27, %v1146_v27  ;;  %v1166_v10 = vperm.slane %v3027_v5, %v3795_v18 }
 0x3e2   : > { %v1158_v33 = vpack.i.b16 %v1150_v7, %v1150_v7  ;;  %v1160_v53 = vpack.i.b16 %v1152_v59, %v1152_v59  ;;  %v1162_v26 = vpack.i.b16 %v1154_v13, %v1154_v13  ;;  %v1170_v3 = vperm.slane %v1156_v1, %v3795_v18 }
 0x3e3   : > { %v1174_v9 = vperm.slane %v3028_v17, %v3795_v18  ;;  %v1182_v6 = vperm.slane %v3029_v36, %v3795_v18  ;;  %v1190_v39 = vperm.slane %v3030_v21, %v3795_v18  ;;  %v1207_v50 = vsel %vm4102_vm6, %v1166_v10, %v1206_v34 }
 0x3e4   : > { %v1178_v40 = vperm.slane %v1158_v33, %v3795_v18  ;;  %v1186_v35 = vperm.slane %v1160_v53, %v3795_v18  ;;  %v1194_v63 = vperm.slane %v1162_v26, %v3795_v18  ;;  %1208 = vst [vmem:[%s3802_s27] sm:$0x2] %v1207_v50  ;;  %v1210_v16 = vsel %vm4102_vm6, %v1170_v3, %v1209_v32 }
 0x3e5   : > { %1211 = vst [vmem:[%s3802_s27 + $0x4] sm:$0x2] %v1210_v16  ;;  %v1213_v4 = vsel %vm4102_vm6, %v1174_v9, %v1212_v47  ;;  %v1219_v8 = vsel %vm4102_vm6, %v1182_v6, %v1218_v58  ;;  %v2132_v11 = vpack.c.bf16 %v2128_v31, %v2128_v31  ;;  %v1225_v57 = vsel %vm4102_vm6, %v1190_v39, %v1224_v62 }
 0x3e6   : > { %1214 = vst [vmem:[%s3802_s27 + $0x8] sm:$0x2] %v1213_v4  ;;  %v1216_v43 = vsel %vm4102_vm6, %v1178_v40, %v1215_v0  ;;  %v1222_v44 = vsel %vm4102_vm6, %v1186_v35, %v1221_v38  ;;  %v1228_v52 = vsel %vm4102_vm6, %v1194_v63, %v1227_v28  ;;  %v1508_v46 = vperm.slane %v3042_v22, %v3795_v18  ;;  %vm4387_vm6 = vmand %vm2537_vm14, %vm2871_vm5 }
 0x3e7   : > { %1217 = vst [vmem:[%s3802_s27 + $0xc] sm:$0x2] %v1216_v43  ;;  %v2134_v14 = vrot.slane %v2132_v11, 3  ;;  %v1496_v42 = vpack.i.b16 %v1488_v12, %v1488_v12  ;;  %v1516_v19 = vperm.slane %v3043_v55, %v3795_v18  ;;  %v1520_v7 = vperm.slane %v1494_v23, %v3795_v18 }
 0x3e8   : > { %1220 = vst [vmem:[%s3802_s27 + $0x10] sm:$0x2] %v1219_v8  ;;  %v1794_v61 = vpop.f32.mrf.mxu3  ;;  %v2130_v49 = vpop.f32.mrf.mxu2  ;;  %v1524_v21 = vperm.slane %v3044_v2, %v3795_v18 }
 0x3e9   : > { %1223 = vst [vmem:[%s3802_s27 + $0x14] sm:$0x2] %v1222_v44  ;;  %v2139_v27 = vsel %vm275_vm0, %v2132_v11, %v2134_v14  ;;  %v2142_v1 = vsel %vm278_vm1, %v2132_v11, %v2134_v14  ;;  %v1798_v45 = vpack.c.bf16 %v1794_v61, %v1794_v61  ;;  %v4185_v31 = vsel %vm466_vm11, %v2132_v11, %v2134_v14  ;;  %v1873_v61 = vld [vmem:[%s3802_s27] sm:$0x4] }
 0x3ea   : > { %1226 = vst [vmem:[%s3802_s27 + $0x18] sm:$0x2] %v1225_v57  ;;  %v4187_v17 = vrot.slane %v2139_v27, 1  ;;  %v2145_v36 = vsel %vm281_vm2, %v2132_v11, %v2134_v14  ;;  %v1528_v53 = vperm.slane %v1496_v42, %v3795_v18  ;;  %v4200_v47 = vrot.slane %v2142_v1, 2  ;;  %v1891_v1 = vld [vmem:[%s3802_s27 + $0x18] sm:$0x4] }
 0x3eb   : > { %1229 = vst [vmem:[%s3802_s27 + $0x1c] sm:$0x2] %v1228_v52  ;;  %v1539_v24 = vld [vmem:[%s3802_s27] sm:$0x2]  ;;  %v4206_v6 = vrot.slane %v2145_v36, 3  ;;  %v2149_v39 = vunpack.i.h.s16 %v4185_v31  ;;  %v1800_v50 = vrot.slane %v1798_v45, 3  ;;  %v3069_v40 = vpack.i.b16 %v4185_v31, %v4185_v31 }
 0x3ec   : > { %v1540_v48 = vsel %vm4152_vm8, %v1500_v51, %v1539_v24  ;;  %v1542_v20 = vld [vmem:[%s3802_s27 + $0x4] sm:$0x2]  ;;  %v2151_v38 = vunpack.i.h.s16 %v4187_v17  ;;  %v2153_v11 = vunpack.i.h.s16 %v4200_v47  ;;  %v1894_v36 = vld [vmem:[%s3802_s27 + $0x1c] sm:$0x4] }
 0x3ed   : > { %1541 = vst [vmem:[%s3802_s27] sm:$0x2] %v1540_v48  ;;  %v1543_v25 = vsel %vm4152_vm8, %v1504_v56, %v1542_v20  ;;  %v1545_v5 = vld [vmem:[%s3802_s27 + $0x8] sm:$0x2]  ;;  %v1803_v35 = vsel %vm466_vm11, %v1798_v45, %v1800_v50  ;;  %v1805_v63 = vsel %vm275_vm0, %v1798_v45, %v1800_v50  ;;  %v1808_v16 = vsel %vm278_vm1, %v1798_v45, %v1800_v50  ;;  %v1885_v48 = vld [vmem:[%s3802_s27 + $0x10] sm:$0x4] }
 0x3ee   : > { %1544 = vst [vmem:[%s3802_s27 + $0x4] sm:$0x2] %v1543_v25  ;;  %v1546_v59 = vsel %vm4152_vm8, %v1508_v46, %v1545_v5  ;;  %v1548_v13 = vld [vmem:[%s3802_s27 + $0xc] sm:$0x2]  ;;  %v1811_v62 = vsel %vm281_vm2, %v1798_v45, %v1800_v50  ;;  %v1807_v30 = vrot.slane %v1805_v63, 1  ;;  %v1810_v4 = vrot.slane %v1808_v16, 2 }
 0x3ef   : > { %1547 = vst [vmem:[%s3802_s27 + $0x8] sm:$0x2] %v1546_v59  ;;  %v1549_v34 = vsel %vm4152_vm8, %v1512_v41, %v1548_v13  ;;  %v1551_v60 = vld [vmem:[%s3802_s27 + $0x10] sm:$0x2]  ;;  %v1813_v8 = vrot.slane %v1811_v62, 3  ;;  %v1815_v28 = vunpack.i.h.s16 %v1803_v35  ;;  %v2155_v54 = vunpack.i.h.s16 %v4206_v6 }
 0x3f0   : > { %1550 = vst [vmem:[%s3802_s27 + $0xc] sm:$0x2] %v1549_v34  ;;  %v1552_v10 = vsel %vm4152_vm8, %v1516_v19, %v1551_v60  ;;  %v1554_v32 = vld [vmem:[%s3802_s27 + $0x14] sm:$0x2]  ;;  %v1796_v33 = vpop.f32.mrf.mxu3  ;;  %v4222_v43 = vpack.i.b16 %v2149_v39, %v2149_v39  ;;  %v3055_v44 = vpack.i.b16 %v1803_v35, %v1803_v35  ;;  %v1817_v37 = vunpack.i.h.s16 %v1807_v30  ;;  %v1879_v46 = vld [vmem:[%s3802_s27 + $0x8] sm:$0x4] }
 0x3f1   : > { %1553 = vst [vmem:[%s3802_s27 + $0x10] sm:$0x2] %v1552_v10  ;;  %v1555_v26 = vsel %vm4152_vm8, %v1520_v7, %v1554_v32  ;;  %v1557_v3 = vld [vmem:[%s3802_s27 + $0x18] sm:$0x2]  ;;  %v1819_v57 = vunpack.i.h.s16 %v1810_v4  ;;  %v1821_v22 = vunpack.i.h.s16 %v1813_v8  ;;  %v1823_v52 = vpack.i.b16 %v1815_v28, %v1815_v28  ;;  %v1882_v19 = vld [vmem:[%s3802_s27 + $0xc] sm:$0x4] }
 0x3f2   : > { %1556 = vst [vmem:[%s3802_s27 + $0x14] sm:$0x2] %v1555_v26  ;;  %v1558_v58 = vsel %vm4152_vm8, %v1524_v21, %v1557_v3  ;;  %v1560_v9 = vld [vmem:[%s3802_s27 + $0x1c] sm:$0x2]  ;;  %v3056_v49 = vpack.i.b16 %v1807_v30, %v1807_v30  ;;  %v3057_v12 = vpack.i.b16 %v1810_v4, %v1810_v4  ;;  %v3058_v29 = vpack.i.b16 %v1813_v8, %v1813_v8  ;;  %v1888_v25 = vld [vmem:[%s3802_s27 + $0x14] sm:$0x4] }
 0x3f3   : > { %1559 = vst [vmem:[%s3802_s27 + $0x18] sm:$0x2] %v1558_v58  ;;  %v1561_v0 = vsel %vm4152_vm8, %v1528_v53, %v1560_v9  ;;  %v1833_v55 = vperm.slane %v3055_v44, %v3795_v18  ;;  %v1825_v51 = vpack.i.b16 %v1817_v37, %v1817_v37  ;;  %v1827_v56 = vpack.i.b16 %v1819_v57, %v1819_v57 }
 0x3f4   : > { %1562 = vst [vmem:[%s3802_s27 + $0x1c] sm:$0x2] %v1561_v0  ;;  %v1829_v24 = vpack.i.b16 %v1821_v22, %v1821_v22  ;;  %v1837_v2 = vperm.slane %v1823_v52, %v3795_v18  ;;  %v1841_v20 = vperm.slane %v3056_v49, %v3795_v18  ;;  %v1849_v27 = vperm.slane %v3057_v12, %v3795_v18 }
 0x3f5   : > { %v1857_v42 = vperm.slane %v3058_v29, %v3795_v18  ;;  %v1874_v41 = vsel %vm4226_vm13, %v1833_v55, %v1873_v61  ;;  %v1845_v5 = vperm.slane %v1825_v51, %v3795_v18  ;;  %v1853_v7 = vperm.slane %v1827_v56, %v3795_v18 }
 0x3f6   : > { %v1861_v59 = vperm.slane %v1829_v24, %v3795_v18  ;;  %1875 = vst [vmem:[%s3802_s27] sm:$0x4] %v1874_v41  ;;  %v1877_v13 = vsel %vm4226_vm13, %v1837_v2, %v1876_v15  ;;  %v3070_v45 = vpack.i.b16 %v4187_v17, %v4187_v17  ;;  %v1880_v34 = vsel %vm4226_vm13, %v1841_v20, %v1879_v46  ;;  %v2540_v20 = vld [vmem:[%s3802_s27] sm:$0x8] }
 0x3f7   : > { %1878 = vst [vmem:[%s3802_s27 + $0x4] sm:$0x4] %v1877_v13  ;;  %v1886_v60 = vsel %vm4226_vm13, %v1849_v27, %v1885_v48  ;;  %v2159_v10 = vpack.i.b16 %v2151_v38, %v2151_v38  ;;  %v3071_v32 = vpack.i.b16 %v4200_v47, %v4200_v47  ;;  %v1883_v33 = vsel %vm4226_vm13, %v1845_v5, %v1882_v19  ;;  %v2543_v5 = vld [vmem:[%s3802_s27 + $0x4] sm:$0x8] }
 0x3f8   : > { %v2461_v23 = vpop.f32.mrf.mxu3  ;;  %1881 = vst [vmem:[%s3802_s27 + $0x8] sm:$0x4] %v1880_v34  ;;  %v1889_v17 = vsel %vm4226_vm13, %v1853_v7, %v1888_v25  ;;  %v4265_v53 = vpack.i.b16 %v2153_v11, %v2153_v11  ;;  %v3072_v26 = vpack.i.b16 %v4206_v6, %v4206_v6  ;;  %v1892_v3 = vsel %vm4226_vm13, %v1857_v42, %v1891_v1  ;;  %v2546_v34 = vld [vmem:[%s3802_s27 + $0x8] sm:$0x8] }
 0x3f9   : > { %v2465_v21 = vpack.c.bf16 %v2461_v23, %v2461_v23  ;;  %1884 = vst [vmem:[%s3802_s27 + $0xc] sm:$0x4] %v1883_v33  ;;  %v4272_v9 = vpack.i.b16 %v2155_v54, %v2155_v54  ;;  %v2167_v47 = vperm.slane %v3069_v40, %v3795_v18  ;;  %v2171_v39 = vperm.slane %v4222_v43, %v3795_v18 }
 0x3fa   : > { %1887 = vst [vmem:[%s3802_s27 + $0x10] sm:$0x4] %v1886_v60  ;;  %v1895_v6 = vsel %vm4226_vm13, %v1861_v59, %v1894_v36  ;;  %v2175_v4 = vperm.slane %v3070_v45, %v3795_v18  ;;  %v2179_v8 = vperm.slane %v2159_v10, %v3795_v18  ;;  %v2183_v28 = vperm.slane %v3071_v32, %v3795_v18  ;;  %v2549_v32 = vld [vmem:[%s3802_s27 + $0xc] sm:$0x8] }
 0x3fb   : > { %v2467_v58 = vrot.slane %v2465_v21, 3  ;;  %1890 = vst [vmem:[%s3802_s27 + $0x14] sm:$0x4] %v1889_v17  ;;  %v2187_v12 = vperm.slane %v4265_v53, %v3795_v18  ;;  %v2191_v27 = vperm.slane %v3072_v26, %v3795_v18  ;;  %v2195_v7 = vperm.slane %v4272_v9, %v3795_v18  ;;  %v2552_v26 = vld [vmem:[%s3802_s27 + $0x10] sm:$0x8] }
 0x3fc   : > { %1893 = vst [vmem:[%s3802_s27 + $0x18] sm:$0x4] %v1892_v3  ;;  %v2555_v9 = vld [vmem:[%s3802_s27 + $0x14] sm:$0x8] }
 0x3fd   : > { %v2470_v0 = vsel %vm466_vm11, %v2465_v21, %v2467_v58  ;;  %v2472_v31 = vsel %vm275_vm0, %v2465_v21, %v2467_v58  ;;  %v2475_v38 = vsel %vm278_vm1, %v2465_v21, %v2467_v58  ;;  %v2478_v40 = vsel %vm281_vm2, %v2465_v21, %v2467_v58  ;;  %1896 = vst [vmem:[%s3802_s27 + $0x1c] sm:$0x4] %v1895_v6  ;;  %v2206_v11 = vld [vmem:[%s3802_s27] sm:$0x4]  ;;  %v2558_v6 = vld [vmem:[%s3802_s27 + $0x18] sm:$0x8] }
 0x3fe   : > { %v2474_v63 = vrot.slane %v2472_v31, 1  ;;  %v2477_v16 = vrot.slane %v2475_v38, 2  ;;  %v2480_v62 = vrot.slane %v2478_v40, 3  ;;  %v2482_v30 = vunpack.i.h.s16 %v2470_v0  ;;  %v2209_v44 = vld [vmem:[%s3802_s27 + $0x4] sm:$0x4] }
 0x3ff   : > { %v3083_v54 = vpack.i.b16 %v2470_v0, %v2470_v0  ;;  %v2207_v43 = vsel %vm4286_vm15, %v2167_v47, %v2206_v11  ;;  %v2210_v22 = vsel %vm4286_vm15, %v2171_v39, %v2209_v44  ;;  %v2212_v52 = vld [vmem:[%s3802_s27 + $0x8] sm:$0x4]  ;;  %v2561_v0 = vld [vmem:[%s3802_s27 + $0x1c] sm:$0x8] }
 0x400   : > { %v2463_v35 = vpop.f32.mrf.mxu3  ;;  %v2484_v37 = vunpack.i.h.s16 %v2474_v63  ;;  %v2486_v57 = vunpack.i.h.s16 %v2477_v16  ;;  %2208 = vst [vmem:[%s3802_s27] sm:$0x4] %v2207_v43  ;;  %v2488_v14 = vunpack.i.h.s16 %v2480_v62  ;;  %v2490_v61 = vpack.i.b16 %v2482_v30, %v2482_v30  ;;  %v2215_v55 = vld [vmem:[%s3802_s27 + $0xc] sm:$0x4] }
 0x401   : > { %v3084_v49 = vpack.i.b16 %v2474_v63, %v2474_v63  ;;  %2211 = vst [vmem:[%s3802_s27 + $0x4] sm:$0x4] %v2210_v22  ;;  %v2213_v29 = vsel %vm4286_vm15, %v2175_v4, %v2212_v52  ;;  %v3085_v23 = vpack.i.b16 %v2477_v16, %v2477_v16  ;;  %v2216_v51 = vsel %vm4286_vm15, %v2179_v8, %v2215_v55  ;;  %v2218_v56 = vld [vmem:[%s3802_s27 + $0x10] sm:$0x4] }
 0x402   : > { %v2492_v15 = vpack.i.b16 %v2484_v37, %v2484_v37  ;;  %2214 = vst [vmem:[%s3802_s27 + $0x8] sm:$0x4] %v2213_v29  ;;  %v2494_v24 = vpack.i.b16 %v2486_v57, %v2486_v57  ;;  %v2500_v2 = vperm.slane %v3083_v54, %v3795_v18  ;;  %v2504_v46 = vperm.slane %v2490_v61, %v3795_v18  ;;  %v2221_v41 = vld [vmem:[%s3802_s27 + $0x14] sm:$0x4] }
 0x403   : > { %2217 = vst [vmem:[%s3802_s27 + $0xc] sm:$0x4] %v2216_v51  ;;  %v2219_v42 = vsel %vm4286_vm15, %v2183_v28, %v2218_v56  ;;  %v3086_v19 = vpack.i.b16 %v2480_v62, %v2480_v62  ;;  %v2508_v25 = vperm.slane %v3084_v49, %v3795_v18  ;;  %v2222_v59 = vsel %vm4286_vm15, %v2187_v12, %v2221_v41  ;;  %v2224_v13 = vld [vmem:[%s3802_s27 + $0x18] sm:$0x4] }
 0x404   : > { %2220 = vst [vmem:[%s3802_s27 + $0x10] sm:$0x4] %v2219_v42  ;;  %v2496_v1 = vpack.i.b16 %v2488_v14, %v2488_v14  ;;  %v2512_v45 = vperm.slane %v2492_v15, %v3795_v18  ;;  %v2225_v60 = vsel %vm4286_vm15, %v2191_v27, %v2224_v13  ;;  %v2227_v36 = vld [vmem:[%s3802_s27 + $0x1c] sm:$0x4]  ;;  %v2516_v21 = vperm.slane %v3085_v23, %v3795_v18 }
 0x405   : > { %2223 = vst [vmem:[%s3802_s27 + $0x14] sm:$0x4] %v2222_v59  ;;  %v2541_v10 = vsel %vm4321_vm4, %v2500_v2, %v2540_v20  ;;  %v2228_v33 = vsel %vm4286_vm15, %v2195_v7, %v2227_v36  ;;  %v2520_v17 = vperm.slane %v2494_v24, %v3795_v18  ;;  %v2544_v53 = vsel %vm4321_vm4, %v2504_v46, %v2543_v5 }
 0x406   : > { %2226 = vst [vmem:[%s3802_s27 + $0x18] sm:$0x4] %v2225_v60  ;;  %v2524_v3 = vperm.slane %v3086_v19, %v3795_v18  ;;  %v2547_v58 = vsel %vm4321_vm4, %v2508_v25, %v2546_v34  ;;  %v2528_v47 = vperm.slane %v2496_v1, %v3795_v18  ;;  %v2550_v39 = vsel %vm4321_vm4, %v2512_v45, %v2549_v32 }
 0x407   : > { %2229 = vst [vmem:[%s3802_s27 + $0x1c] sm:$0x4] %v2228_v33  ;;  %v2553_v50 = vsel %vm4321_vm4, %v2516_v21, %v2552_v26  ;;  %v2556_v31 = vsel %vm4321_vm4, %v2520_v17, %v2555_v9 }
 0x408   : > { %2542 = vst [vmem:[%s3802_s27] sm:$0x8] %v2541_v10  ;;  %v2559_v38 = vsel %vm4321_vm4, %v2524_v3, %v2558_v6  ;;  %v2562_v40 = vsel %vm4321_vm4, %v2528_v47, %v2561_v0 }
 0x409   : > { %2545 = vst [vmem:[%s3802_s27 + $0x4] sm:$0x8] %v2544_v53 }
 0x40a   : > { %2548 = vst [vmem:[%s3802_s27 + $0x8] sm:$0x8] %v2547_v58 }
 0x40b   : > { %2551 = vst [vmem:[%s3802_s27 + $0xc] sm:$0x8] %v2550_v39 }
 0x40c   : > { %2554 = vst [vmem:[%s3802_s27 + $0x10] sm:$0x8] %v2553_v50 }
 0x40d   : > { %2557 = vst [vmem:[%s3802_s27 + $0x14] sm:$0x8] %v2556_v31 }
 0x40e   : > { %2560 = vst [vmem:[%s3802_s27 + $0x18] sm:$0x8] %v2559_v38 }
 0x40f   : > { %2563 = vst [vmem:[%s3802_s27 + $0x1c] sm:$0x8] %v2562_v40  ;;  %v2873_v24 = vld [vmem:[%s3802_s27] sm:$0x8] }
 0x410   : > { %v2876_v27 = vld [vmem:[%s3802_s27 + $0x4] sm:$0x8] }
 0x411   : > { %v2795_v35 = vpop.f32.mrf.mxu2  ;;  %v2879_v5 = vld [vmem:[%s3802_s27 + $0x8] sm:$0x8] }
 0x412   : > { %v2799_v63 = vpack.c.bf16 %v2795_v35, %v2795_v35  ;;  %v2882_v13 = vld [vmem:[%s3802_s27 + $0xc] sm:$0x8] }
 0x413   : > { %v2885_v7 = vld [vmem:[%s3802_s27 + $0x10] sm:$0x8] }
 0x414   : > { %v2801_v16 = vrot.slane %v2799_v63, 3 }
 0x415   : > { %v2891_v60 = vld [vmem:[%s3802_s27 + $0x18] sm:$0x8] }
 0x416   : > { %v2804_v62 = vsel %vm466_vm11, %v2799_v63, %v2801_v16  ;;  %v2806_v30 = vsel %vm275_vm0, %v2799_v63, %v2801_v16  ;;  %v2809_v4 = vsel %vm278_vm1, %v2799_v63, %v2801_v16  ;;  %v2812_v8 = vsel %vm281_vm2, %v2799_v63, %v2801_v16  ;;  %v2894_v21 = vld [vmem:[%s3802_s27 + $0x1c] sm:$0x8] }
 0x417   : > { %v2808_v28 = vrot.slane %v2806_v30, 1  ;;  %v2811_v11 = vrot.slane %v2809_v4, 2  ;;  %v2814_v54 = vrot.slane %v2812_v8, 3  ;;  %v2816_v43 = vunpack.i.h.s16 %v2804_v62 }
 0x418   : > { %v3097_v44 = vpack.i.b16 %v2804_v62, %v2804_v62 }
 0x419   : > { %v2818_v37 = vunpack.i.h.s16 %v2808_v28  ;;  %v2820_v57 = vunpack.i.h.s16 %v2811_v11  ;;  %v2822_v22 = vunpack.i.h.s16 %v2814_v54  ;;  %v2824_v52 = vpack.i.b16 %v2816_v43, %v2816_v43  ;;  %v2797_v61 = vpop.f32.mrf.mxu2 }
 0x41a   : > { %v3098_v49 = vpack.i.b16 %v2808_v28, %v2808_v28  ;;  %v3099_v12 = vpack.i.b16 %v2811_v11, %v2811_v11  ;;  %v3100_v29 = vpack.i.b16 %v2814_v54, %v2814_v54  ;;  %v2834_v55 = vperm.slane %v3097_v44, %v3795_v18 }
 0x41b   : > { %v2826_v15 = vpack.i.b16 %v2818_v37, %v2818_v37  ;;  %v2828_v23 = vpack.i.b16 %v2820_v57, %v2820_v57  ;;  %v2830_v51 = vpack.i.b16 %v2822_v22, %v2822_v22  ;;  %v2838_v56 = vperm.slane %v2824_v52, %v3795_v18 }
 0x41c   : > { %v2842_v2 = vperm.slane %v3098_v49, %v3795_v18  ;;  %v2850_v46 = vperm.slane %v3099_v12, %v3795_v18  ;;  %v2858_v48 = vperm.slane %v3100_v29, %v3795_v18  ;;  %v2874_v20 = vsel %vm4387_vm6, %v2834_v55, %v2873_v24 }
 0x41d   : > { %v2846_v42 = vperm.slane %v2826_v15, %v3795_v18  ;;  %v2854_v41 = vperm.slane %v2828_v23, %v3795_v18  ;;  %v2862_v19 = vperm.slane %v2830_v51, %v3795_v18  ;;  %2875 = vst [vmem:[%s3802_s27] sm:$0x8] %v2874_v20  ;;  %v2877_v25 = vsel %vm4387_vm6, %v2838_v56, %v2876_v27  ;;  %v2888_v18 = vld [vmem:[%s3802_s27 + $0x14] sm:$0x8] }
 0x41e   : > { %2878 = vst [vmem:[%s3802_s27 + $0x4] sm:$0x8] %v2877_v25  ;;  %v2880_v59 = vsel %vm4387_vm6, %v2842_v2, %v2879_v5  ;;  %v2886_v1 = vsel %vm4387_vm6, %v2850_v46, %v2885_v7  ;;  %v2892_v36 = vsel %vm4387_vm6, %v2858_v48, %v2891_v60 }
 0x41f   : > { %2881 = vst [vmem:[%s3802_s27 + $0x8] sm:$0x8] %v2880_v59  ;;  %v2883_v45 = vsel %vm4387_vm6, %v2846_v42, %v2882_v13  ;;  %v2889_v34 = vsel %vm4387_vm6, %v2854_v41, %v2888_v18  ;;  %v2895_v10 = vsel %vm4387_vm6, %v2862_v19, %v2894_v21 }
 0x420   : > { %2884 = vst [vmem:[%s3802_s27 + $0xc] sm:$0x8] %v2883_v45 }
 0x421   : > { %2887 = vst [vmem:[%s3802_s27 + $0x10] sm:$0x8] %v2886_v1 }
 0x422   : > { %2890 = vst [vmem:[%s3802_s27 + $0x14] sm:$0x8] %v2889_v34 }
 0x423   : > { %2893 = vst [vmem:[%s3802_s27 + $0x18] sm:$0x8] %v2892_v36 }
 0x424   : > { %2896 = vst [vmem:[%s3802_s27 + $0x1c] sm:$0x8] %v2895_v10 }
 0x425 PF: > { %s13_s12 = sadd.s32 1, %s3155_s12  }
 0x426   : > { %p10_p4 = scmp.ge.s32.totalorder %s13_s12, 4  }
 0x428   :  { %12 = sbr.rel (!%p10_p4) target bundleno = 1 (0x1), region = 84 }

</bundles_post_ra>
